<compile_context>
chip_gen: v7x
topology: tpu7x:2x2x1
jax: 0.10.0
libtpu: 0.0.40
codegen_flags: <defaults>
</compile_context>

<pallas_src>
import jax
import jax.numpy as jnp
from jax.experimental import pallas as pl
from jax.experimental.pallas import tpu as pltpu


# ----------------------------------------------------------------------------
# Fused forward kernel: LSTMs (short+long block-diagonal) + CNN stacks + head.
# ----------------------------------------------------------------------------
def fused_forward_kernel(
    # raw model inputs
    seq_x_ref, seq_xt_ref, past_x_ref, past_xt_ref,
    # combined (short|long) LSTM params: (2D, 8H), (2H, 8H), (1, 8H)
    w_ih_ref, w_hh_ref, b_lstm_ref,
    # short CNN stack: conv0, conv1, ln1, conv2, ln2
    s_w0_ref, s_b0_ref, s_w1_ref, s_b1_ref, s_g1_ref, s_be1_ref,
    s_w2_ref, s_b2_ref, s_g2_ref, s_be2_ref,
    # long CNN stack
    l_w0_ref, l_b0_ref, l_w1_ref, l_b1_ref, l_g1_ref, l_be1_ref,
    l_w2_ref, l_b2_ref, l_g2_ref, l_be2_ref,
    # head: mappings + fc + fc2 pre-composed into one affine map (2H+2C, P)
    w_head_ref, b_head_ref,
    # output (B, S, P)
    o_ref):
  B, S, _ = seq_x_ref.shape
  H2 = w_hh_ref.shape[0]              # 2 * hidden_size  ([short | long] stacked)
  P = b_head_ref.shape[-1]
  BS = B * S
  f32 = jnp.float32

  def dot(a, b):
    return jnp.dot(a, b, preferred_element_type=f32)

  seq_x = seq_x_ref[...]
  seq_xt = seq_xt_ref[...]
  past_x = past_x_ref[...]
  past_xt = past_xt_ref[...]

  # ---------------- LSTM: short & long branches in one recurrence ------------
  # power inputs: [short power(8) + time(4) | long power(8) + time(4)] -> 2D
  x_comb = jnp.concatenate(
      [seq_x[:, :, :8], seq_xt, past_x[:, :, :8], past_xt], axis=-1)  # (B,S,2D)
  D2 = x_comb.shape[-1]
  # Hoisted input projection + bias for ALL timesteps: one matmul, one bias add.
  xw = dot(x_comb.reshape(BS, D2), w_ih_ref[...]) + b_lstm_ref[...]   # (BS, 8H)
  xw = xw.reshape(B, S, 4 * H2)

  w_hh = w_hh_ref[...]                                                # (2H, 8H)
  h = jnp.zeros((B, H2), f32)
  c = jnp.zeros((B, H2), f32)
  hs = []
  for t in range(S):  # fully unrolled: exactly one MXU push per recurrent step
    g_t = xw[:, t, :] + dot(h, w_hh)                                  # (B, 8H)
    # one EUP sigmoid over the whole gate slab (covers i, f, o), one tanh on g
    sig = jax.nn.sigmoid(g_t)
    i_g = sig[:, 0 * H2:1 * H2]
    f_g = sig[:, 1 * H2:2 * H2]
    o_g = sig[:, 3 * H2:4 * H2]
    g_g = jnp.tanh(g_t[:, 2 * H2:3 * H2])
    c = f_g * c + i_g * g_g
    h = o_g * jnp.tanh(c)
    hs.append(h[:, None, :])
  hs_all = jnp.concatenate(hs, axis=1).reshape(BS, H2)  # rows (b, s); [sl | ll]

  # ---------------- CNN: each conv layer is one 3-tap matmul -----------------
  s_pos = jax.lax.broadcasted_iota(jnp.int32, (BS, 1), 0) % S
  first = s_pos == 0
  last = s_pos == S - 1

  def conv3(x2, w_ref, b_ref):
    # x2: (BS, Cin) flattened (b, s) rows. The static shifts wrap across batch
    # boundaries, but those rows are exactly the ones masked to zero, which is
    # the "same" zero padding of Conv1d(padding=1).
    prev = jnp.where(first, 0.0, jnp.concatenate([x2[:1], x2[:-1]], axis=0))
    nxt = jnp.where(last, 0.0, jnp.concatenate([x2[1:], x2[-1:]], axis=0))
    taps = jnp.concatenate([prev, x2, nxt], axis=-1)                  # (BS, 3*Cin)
    return dot(taps, w_ref[...]) + b_ref[...]

  def ln_relu(y, g_ref, be_ref):
    mu = jnp.mean(y, axis=-1, keepdims=True)
    var = jnp.mean((y - mu) ** 2, axis=-1, keepdims=True)
    z = (y - mu) * jax.lax.rsqrt(var + 1e-5) * g_ref[...] + be_ref[...]
    return jnp.maximum(z, 0.0)

  def cnn_stack(x2, w0, b0, w1, b1, g1, be1, w2, b2, g2, be2):
    y = conv3(x2, w0, b0)
    y = ln_relu(conv3(y, w1, b1), g1, be1)
    y = ln_relu(conv3(y, w2, b2), g2, be2)
    return y

  sw = cnn_stack(seq_x[:, :, 8:].reshape(BS, -1),
                 s_w0_ref, s_b0_ref, s_w1_ref, s_b1_ref, s_g1_ref, s_be1_ref,
                 s_w2_ref, s_b2_ref, s_g2_ref, s_be2_ref)
  lw = cnn_stack(past_x[:, :, 8:].reshape(BS, -1),
                 l_w0_ref, l_b0_ref, l_w1_ref, l_b1_ref, l_g1_ref, l_be1_ref,
                 l_w2_ref, l_b2_ref, l_g2_ref, l_be2_ref)

  # ---------------- Head: mappings + fc + fc2 pre-composed -> one matmul -----
  feats = jnp.concatenate([hs_all, sw, lw], axis=-1)    # (BS, 2H + 2C)
  x = dot(feats, w_head_ref[...]) + b_head_ref[...]     # (BS, P)
  o_ref[...] = x.reshape(B, S, P)


# ----------------------------------------------------------------------------
# Wrapper: one grid-less pallas_call, everything resident in VMEM.
# ----------------------------------------------------------------------------
def model_forward(kernel_params, seq_x, seq_xt, past_x, past_xt,
                  dec_input, seq_yt):
  # dec_input / seq_yt are unused by the PyTorch forward pass as well.
  del dec_input, seq_yt
  B, S, _ = seq_x.shape
  P = kernel_params[-1].shape[-1]
  args = [seq_x, seq_xt, past_x, past_xt] + list(kernel_params)
  return pl.pallas_call(
      fused_forward_kernel,
      out_shape=jax.ShapeDtypeStruct((B, S, P), jnp.float32),
      in_specs=[pl.BlockSpec(memory_space=pltpu.MemorySpace.VMEM)
                for _ in range(len(args))],
      out_specs=pl.BlockSpec(memory_space=pltpu.MemorySpace.VMEM),
  )(*args)


# ----------------------------------------------------------------------------
# Parameters: PyTorch layouts (what nn.Module stores) + packing to kernel layout
# ----------------------------------------------------------------------------
def init_torch_params(key, *, D, H, C_in, C, S, P):
  keys = iter(jax.random.split(key, 64))

  def nrm(shape, scale=0.1):
    return jax.random.normal(next(keys), shape, jnp.float32) * scale

  def lstm():
    return dict(w_ih=nrm((4 * H, D)), w_hh=nrm((4 * H, H)),
                b_ih=nrm((4 * H,)), b_hh=nrm((4 * H,)))

  def conv(cin):
    return (nrm((C, cin, 3)), nrm((C,)))          # torch Conv1d: (out, in, k)

  def cnn():
    return dict(conv0=conv(C_in), conv1=conv(C), conv2=conv(C),
                ln1=(1.0 + nrm((C,)), nrm((C,))),
                ln2=(1.0 + nrm((C,)), nrm((C,))))

  def linear(din, dout):
    return (nrm((dout, din)), nrm((dout,)))       # torch Linear: (out, in)

  return dict(short_lstm=lstm(), long_lstm=lstm(),
              short_cnn=cnn(), long_cnn=cnn(),
              short_mapping=linear(2 * S, P), long_mapping=linear(2 * S, P),
              fc=linear(P, 2 * P), fc2=linear(2 * P, P))


def pack_kernel_params(tp, *, D, H, C):
  """PyTorch-layout params -> fused kernel layouts (ordered kernel arg list)."""
  f32 = jnp.float32
  H2 = 2 * H

  def lstm_comb():
    s, l = tp["short_lstm"], tp["long_lstm"]
    w_ih = jnp.zeros((2 * D, 4 * H2), f32)
    w_hh = jnp.zeros((H2, 4 * H2), f32)
    b = jnp.zeros((4 * H2,), f32)
    for k in range(4):                       # torch gate order: i, f, g, o
      r = slice(k * H, (k + 1) * H)
      c0 = k * H2
      w_ih = w_ih.at[:D, c0:c0 + H].set(s["w_ih"][r].T)
      w_ih = w_ih.at[D:, c0 + H:c0 + H2].set(l["w_ih"][r].T)
      w_hh = w_hh.at[:H, c0:c0 + H].set(s["w_hh"][r].T)
      w_hh = w_hh.at[H:, c0 + H:c0 + H2].set(l["w_hh"][r].T)
      b = b.at[c0:c0 + H].set(s["b_ih"][r] + s["b_hh"][r])
      b = b.at[c0 + H:c0 + H2].set(l["b_ih"][r] + l["b_hh"][r])
    return [w_ih, w_hh, b[None, :]]

  def conv_flat(wb):
    w, b = wb                                # (Cout, Cin, 3)
    w_kio = jnp.transpose(w, (2, 1, 0))      # (3, Cin, Cout): tap k=0 <-> x[s-1]
    return w_kio.reshape(3 * w.shape[1], w.shape[0]), b[None, :]

  def cnn_pack(p):
    w0, b0 = conv_flat(p["conv0"])
    w1, b1 = conv_flat(p["conv1"])
    w2, b2 = conv_flat(p["conv2"])
    g1, be1 = p["ln1"]
    g2, be2 = p["ln2"]
    return [w0, b0, w1, b1, g1[None, :], be1[None, :],
            w2, b2, g2[None, :], be2[None, :]]

  # ----- head: mapping + fc + fc2 are affine with no activations between, so
  # pre-compose them into one (2H+2C, P) matmul + bias on the host -----------
  wsm, bsm = tp["short_mapping"]
  wlm, blm = tp["long_mapping"]
  WsT, WlT = wsm.T, wlm.T                    # (H+C, P)
  # kernel feature order: [sl(H) | ll(H) | sw(C) | lw(C)]
  w_map = jnp.concatenate([WsT[:H], WlT[:H], WsT[H:], WlT[H:]], axis=0)
  b_map = (bsm + blm)[None, :]
  fcw, fcb = tp["fc"]
  fc2w, fc2b = tp["fc2"]
  fcwT, fc2wT = fcw.T, fc2w.T                # (P, 2P), (2P, P)
  w_head = w_map @ fcwT @ fc2wT                              # (2H+2C, P)
  b_head = b_map @ fcwT @ fc2wT + fcb[None, :] @ fc2wT + fc2b[None, :]
  return (lstm_comb()
          + cnn_pack(tp["short_cnn"]) + cnn_pack(tp["long_cnn"])
          + [w_head, b_head])


# ----------------------------------------------------------------------------
# Plain-JAX reference straight from the PyTorch-layout parameters
# (also validates the weight packing / head pre-composition).
# ----------------------------------------------------------------------------
def ref_forward(tp, seq_x, seq_xt, past_x, past_xt):
  def lstm(x, p):
    H = p["w_hh"].shape[1]

    def step(carry, x_t):
      h, c = carry
      g = x_t @ p["w_ih"].T + h @ p["w_hh"].T + p["b_ih"] + p["b_hh"]
      i = jax.nn.sigmoid(g[:, :H])
      f = jax.nn.sigmoid(g[:, H:2 * H])
      gg = jnp.tanh(g[:, 2 * H:3 * H])
      o = jax.nn.sigmoid(g[:, 3 * H:])
      c = f * c + i * gg
      h = o * jnp.tanh(c)
      return (h, c), h

    B = x.shape[0]
    init = (jnp.zeros((B, H), jnp.float32), jnp.zeros((B, H), jnp.float32))
    _, hs = jax.lax.scan(step, init, jnp.swapaxes(x, 0, 1))
    return jnp.swapaxes(hs, 0, 1)

  def conv1d_same(x, wb):
    w, b = wb
    xp = jnp.pad(x, ((0, 0), (1, 1), (0, 0)))
    return (jnp.einsum("bsc,oc->bso", xp[:, :-2], w[:, :, 0])
            + jnp.einsum("bsc,oc->bso", xp[:, 1:-1], w[:, :, 1])
            + jnp.einsum("bsc,oc->bso", xp[:, 2:], w[:, :, 2]) + b)

  def ln_relu(x, gb):
    g, be = gb
    mu = jnp.mean(x, axis=-1, keepdims=True)
    var = jnp.mean((x - mu) ** 2, axis=-1, keepdims=True)
    return jnp.maximum((x - mu) * jax.lax.rsqrt(var + 1e-5) * g + be, 0.0)

  def cnn(x, p):
    y = conv1d_same(x, p["conv0"])
    y = ln_relu(conv1d_same(y, p["conv1"]), p["ln1"])
    y = ln_relu(conv1d_same(y, p["conv2"]), p["ln2"])
    return y

  sp = jnp.concatenate([seq_x[:, :, :8], seq_xt], axis=-1)
  lp = jnp.concatenate([past_x[:, :, :8], past_xt], axis=-1)
  sl = lstm(sp, tp["short_lstm"])
  ll = lstm(lp, tp["long_lstm"])
  sw = cnn(seq_x[:, :, 8:], tp["short_cnn"])
  lw = cnn(past_x[:, :, 8:], tp["long_cnn"])

  wsm, bsm = tp["short_mapping"]
  wlm, blm = tp["long_mapping"]
  short_x = jnp.concatenate([sl, sw], axis=-1) @ wsm.T + bsm
  long_x = jnp.concatenate([ll, lw], axis=-1) @ wlm.T + blm
  x = short_x + long_x
  fcw, fcb = tp["fc"]
  fc2w, fc2b = tp["fc2"]
  x = x @ fcw.T + fcb
  x = x @ fc2w.T + fc2b
  return x


# ----------------------------------------------------------------------------
# Demo
# ----------------------------------------------------------------------------
if __name__ == "__main__":
  jax.config.update("jax_default_matmul_precision", "highest")

  B = 2
  S = 16            # seq_len == past_len (required by short_x + long_x)
  P = 8             # pred_len
  LABEL = 4         # label_len (unused in forward)
  D_POWER, D_WEATHER, D_TIME = 8, 4, 4
  H, C = 8, 24      # hidden_size, cnn_out_channel; H + C == 2*S
  D = D_POWER + D_TIME  # LSTM input_size
  assert H + C == 2 * S

  key = jax.random.PRNGKey(0)
  kx, kxt, kpx, kpxt, kd, kyt, kp = jax.random.split(key, 7)
  seq_x = jax.random.normal(kx, (B, S, D_POWER + D_WEATHER), jnp.float32)
  seq_xt = jax.random.normal(kxt, (B, S, D_TIME), jnp.float32)
  past_x = jax.random.normal(kpx, (B, S, D_POWER + D_WEATHER), jnp.float32)
  past_xt = jax.random.normal(kpxt, (B, S, D_TIME), jnp.float32)
  dec_input = jax.random.normal(kd, (B, LABEL + P, D_POWER + D_WEATHER),
                                jnp.float32)
  seq_yt = jax.random.normal(kyt, (B, LABEL + P, D_TIME), jnp.float32)

  torch_params = init_torch_params(kp, D=D, H=H, C_in=D_WEATHER, C=C, S=S, P=P)
  kernel_params = pack_kernel_params(torch_params, D=D, H=H, C=C)

  out = jax.jit(model_forward)(kernel_params, seq_x, seq_xt, past_x, past_xt,
                               dec_input, seq_yt)
  out = jax.block_until_ready(out)
  assert out.shape == (B, S, P), out.shape

  ref = ref_forward(torch_params, seq_x, seq_xt, past_x, past_xt)
  err = float(jnp.max(jnp.abs(out - ref)))
  assert err < 1e-4, f"max abs error vs reference: {err}"

  print("KERNEL_OK")
</pallas_src>

<mosaic_0001>
module attributes {stable_mosaic.version = 11 : i64} {
  func.func @fused_forward_kernel(%arg0: memref<2x16x12xf32, #tpu.memory_space<vmem>>, %arg1: memref<2x16x4xf32, #tpu.memory_space<vmem>>, %arg2: memref<2x16x12xf32, #tpu.memory_space<vmem>>, %arg3: memref<2x16x4xf32, #tpu.memory_space<vmem>>, %arg4: memref<24x64xf32, #tpu.memory_space<vmem>>, %arg5: memref<16x64xf32, #tpu.memory_space<vmem>>, %arg6: memref<1x64xf32, #tpu.memory_space<vmem>>, %arg7: memref<12x24xf32, #tpu.memory_space<vmem>>, %arg8: memref<1x24xf32, #tpu.memory_space<vmem>>, %arg9: memref<72x24xf32, #tpu.memory_space<vmem>>, %arg10: memref<1x24xf32, #tpu.memory_space<vmem>>, %arg11: memref<1x24xf32, #tpu.memory_space<vmem>>, %arg12: memref<1x24xf32, #tpu.memory_space<vmem>>, %arg13: memref<72x24xf32, #tpu.memory_space<vmem>>, %arg14: memref<1x24xf32, #tpu.memory_space<vmem>>, %arg15: memref<1x24xf32, #tpu.memory_space<vmem>>, %arg16: memref<1x24xf32, #tpu.memory_space<vmem>>, %arg17: memref<12x24xf32, #tpu.memory_space<vmem>>, %arg18: memref<1x24xf32, #tpu.memory_space<vmem>>, %arg19: memref<72x24xf32, #tpu.memory_space<vmem>>, %arg20: memref<1x24xf32, #tpu.memory_space<vmem>>, %arg21: memref<1x24xf32, #tpu.memory_space<vmem>>, %arg22: memref<1x24xf32, #tpu.memory_space<vmem>>, %arg23: memref<72x24xf32, #tpu.memory_space<vmem>>, %arg24: memref<1x24xf32, #tpu.memory_space<vmem>>, %arg25: memref<1x24xf32, #tpu.memory_space<vmem>>, %arg26: memref<1x24xf32, #tpu.memory_space<vmem>>, %arg27: memref<64x8xf32, #tpu.memory_space<vmem>>, %arg28: memref<1x8xf32, #tpu.memory_space<vmem>>, %arg29: memref<2x16x8xf32, #tpu.memory_space<vmem>>) attributes {dimension_semantics = [], scalar_prefetch = 0 : i64, scratch_operands = 0 : i64, tpu.core_type = #tpu.core_type<tc>} {
    %c0 = arith.constant 0 : index
    %c0_0 = arith.constant 0 : index
    %c0_1 = arith.constant 0 : index
    %0 = vector.load %arg0[%c0, %c0_0, %c0_1] : memref<2x16x12xf32, #tpu.memory_space<vmem>>, vector<2x16x12xf32>
    %c0_2 = arith.constant 0 : index
    %c0_3 = arith.constant 0 : index
    %c0_4 = arith.constant 0 : index
    %1 = vector.load %arg1[%c0_2, %c0_3, %c0_4] : memref<2x16x4xf32, #tpu.memory_space<vmem>>, vector<2x16x4xf32>
    %c0_5 = arith.constant 0 : index
    %c0_6 = arith.constant 0 : index
    %c0_7 = arith.constant 0 : index
    %2 = vector.load %arg2[%c0_5, %c0_6, %c0_7] : memref<2x16x12xf32, #tpu.memory_space<vmem>>, vector<2x16x12xf32>
    %c0_8 = arith.constant 0 : index
    %c0_9 = arith.constant 0 : index
    %c0_10 = arith.constant 0 : index
    %3 = vector.load %arg3[%c0_8, %c0_9, %c0_10] : memref<2x16x4xf32, #tpu.memory_space<vmem>>, vector<2x16x4xf32>
    %4 = vector.extract_strided_slice %0 {offsets = [0, 0, 0], sizes = [2, 16, 8], strides = [1, 1, 1]} : vector<2x16x12xf32> to vector<2x16x8xf32>
    %5 = vector.extract_strided_slice %2 {offsets = [0, 0, 0], sizes = [2, 16, 8], strides = [1, 1, 1]} : vector<2x16x12xf32> to vector<2x16x8xf32>
    %6 = tpu.concatenate %4, %1, %5, %3 in 2 : vector<2x16x8xf32>, vector<2x16x4xf32>, vector<2x16x8xf32>, vector<2x16x4xf32> -> vector<2x16x24xf32>
    %7 = vector.shape_cast %6 : vector<2x16x24xf32> to vector<32x24xf32>
    %c0_11 = arith.constant 0 : index
    %c0_12 = arith.constant 0 : index
    %8 = vector.load %arg4[%c0_11, %c0_12] : memref<24x64xf32, #tpu.memory_space<vmem>>, vector<24x64xf32>
    %cst = arith.constant dense<0.000000e+00> : vector<32x64xf32>
    %9 = tpu.matmul %7, %8, %cst {dimension_numbers = #tpu.dot_dimension_numbers<[1], [0], [0], [1], [0, 0, 1, 1], [], []>, precision = #tpu.contract_precision<fp32>} : vector<32x24xf32>, vector<24x64xf32>, vector<32x64xf32> -> vector<32x64xf32>
    %c0_13 = arith.constant 0 : index
    %c0_14 = arith.constant 0 : index
    %10 = vector.load %arg6[%c0_13, %c0_14] : memref<1x64xf32, #tpu.memory_space<vmem>>, vector<1x64xf32>
    %11 = vector.broadcast %10 : vector<1x64xf32> to vector<32x64xf32>
    %12 = arith.addf %9, %11 : vector<32x64xf32>
    %13 = vector.shape_cast %12 : vector<32x64xf32> to vector<2x16x64xf32>
    %c0_15 = arith.constant 0 : index
    %c0_16 = arith.constant 0 : index
    %14 = vector.load %arg5[%c0_15, %c0_16] : memref<16x64xf32, #tpu.memory_space<vmem>>, vector<16x64xf32>
    %cst_17 = arith.constant 0.000000e+00 : f32
    %15 = vector.broadcast %cst_17 : f32 to vector<2x16xf32>
    %cst_18 = arith.constant 0.000000e+00 : f32
    %16 = vector.broadcast %cst_18 : f32 to vector<2x16xf32>
    %17 = vector.extract_strided_slice %13 {offsets = [0, 0, 0], sizes = [2, 1, 64], strides = [1, 1, 1]} : vector<2x16x64xf32> to vector<2x1x64xf32>
    %18 = vector.shape_cast %17 : vector<2x1x64xf32> to vector<2x64xf32>
    %cst_19 = arith.constant dense<0.000000e+00> : vector<2x64xf32>
    %19 = tpu.matmul %15, %14, %cst_19 {dimension_numbers = #tpu.dot_dimension_numbers<[1], [0], [0], [1], [0, 0, 1, 1], [], []>, precision = #tpu.contract_precision<fp32>} : vector<2x16xf32>, vector<16x64xf32>, vector<2x64xf32> -> vector<2x64xf32>
    %20 = arith.addf %18, %19 : vector<2x64xf32>
    %21 = arith.negf %20 : vector<2x64xf32>
    %22 = math.exp %21 : vector<2x64xf32>
    %cst_20 = arith.constant 1.000000e+00 : f32
    %23 = vector.broadcast %cst_20 : f32 to vector<2x64xf32>
    %24 = arith.addf %23, %22 : vector<2x64xf32>
    %25 = arith.divf %23, %24 : vector<2x64xf32>
    %26 = vector.extract_strided_slice %25 {offsets = [0, 0], sizes = [2, 16], strides = [1, 1]} : vector<2x64xf32> to vector<2x16xf32>
    %27 = vector.extract_strided_slice %25 {offsets = [0, 16], sizes = [2, 16], strides = [1, 1]} : vector<2x64xf32> to vector<2x16xf32>
    %28 = vector.extract_strided_slice %25 {offsets = [0, 48], sizes = [2, 16], strides = [1, 1]} : vector<2x64xf32> to vector<2x16xf32>
    %29 = vector.extract_strided_slice %20 {offsets = [0, 32], sizes = [2, 16], strides = [1, 1]} : vector<2x64xf32> to vector<2x16xf32>
    %30 = math.tanh %29 : vector<2x16xf32>
    %31 = arith.mulf %27, %16 : vector<2x16xf32>
    %32 = arith.mulf %26, %30 : vector<2x16xf32>
    %33 = arith.addf %31, %32 : vector<2x16xf32>
    %34 = math.tanh %33 : vector<2x16xf32>
    %35 = arith.mulf %28, %34 : vector<2x16xf32>
    %36 = vector.shape_cast %35 : vector<2x16xf32> to vector<2x1x16xf32>
    %37 = vector.extract_strided_slice %13 {offsets = [0, 1, 0], sizes = [2, 1, 64], strides = [1, 1, 1]} : vector<2x16x64xf32> to vector<2x1x64xf32>
    %38 = vector.shape_cast %37 : vector<2x1x64xf32> to vector<2x64xf32>
    %cst_21 = arith.constant dense<0.000000e+00> : vector<2x64xf32>
    %39 = tpu.matmul %35, %14, %cst_21 {dimension_numbers = #tpu.dot_dimension_numbers<[1], [0], [0], [1], [0, 0, 1, 1], [], []>, precision = #tpu.contract_precision<fp32>} : vector<2x16xf32>, vector<16x64xf32>, vector<2x64xf32> -> vector<2x64xf32>
    %40 = arith.addf %38, %39 : vector<2x64xf32>
    %41 = arith.negf %40 : vector<2x64xf32>
    %42 = math.exp %41 : vector<2x64xf32>
    %cst_22 = arith.constant 1.000000e+00 : f32
    %43 = vector.broadcast %cst_22 : f32 to vector<2x64xf32>
    %44 = arith.addf %43, %42 : vector<2x64xf32>
    %45 = arith.divf %43, %44 : vector<2x64xf32>
    %46 = vector.extract_strided_slice %45 {offsets = [0, 0], sizes = [2, 16], strides = [1, 1]} : vector<2x64xf32> to vector<2x16xf32>
    %47 = vector.extract_strided_slice %45 {offsets = [0, 16], sizes = [2, 16], strides = [1, 1]} : vector<2x64xf32> to vector<2x16xf32>
    %48 = vector.extract_strided_slice %45 {offsets = [0, 48], sizes = [2, 16], strides = [1, 1]} : vector<2x64xf32> to vector<2x16xf32>
    %49 = vector.extract_strided_slice %40 {offsets = [0, 32], sizes = [2, 16], strides = [1, 1]} : vector<2x64xf32> to vector<2x16xf32>
    %50 = math.tanh %49 : vector<2x16xf32>
    %51 = arith.mulf %47, %33 : vector<2x16xf32>
    %52 = arith.mulf %46, %50 : vector<2x16xf32>
    %53 = arith.addf %51, %52 : vector<2x16xf32>
    %54 = math.tanh %53 : vector<2x16xf32>
    %55 = arith.mulf %48, %54 : vector<2x16xf32>
    %56 = vector.shape_cast %55 : vector<2x16xf32> to vector<2x1x16xf32>
    %57 = vector.extract_strided_slice %13 {offsets = [0, 2, 0], sizes = [2, 1, 64], strides = [1, 1, 1]} : vector<2x16x64xf32> to vector<2x1x64xf32>
    %58 = vector.shape_cast %57 : vector<2x1x64xf32> to vector<2x64xf32>
    %cst_23 = arith.constant dense<0.000000e+00> : vector<2x64xf32>
    %59 = tpu.matmul %55, %14, %cst_23 {dimension_numbers = #tpu.dot_dimension_numbers<[1], [0], [0], [1], [0, 0, 1, 1], [], []>, precision = #tpu.contract_precision<fp32>} : vector<2x16xf32>, vector<16x64xf32>, vector<2x64xf32> -> vector<2x64xf32>
    %60 = arith.addf %58, %59 : vector<2x64xf32>
    %61 = arith.negf %60 : vector<2x64xf32>
    %62 = math.exp %61 : vector<2x64xf32>
    %cst_24 = arith.constant 1.000000e+00 : f32
    %63 = vector.broadcast %cst_24 : f32 to vector<2x64xf32>
    %64 = arith.addf %63, %62 : vector<2x64xf32>
    %65 = arith.divf %63, %64 : vector<2x64xf32>
    %66 = vector.extract_strided_slice %65 {offsets = [0, 0], sizes = [2, 16], strides = [1, 1]} : vector<2x64xf32> to vector<2x16xf32>
    %67 = vector.extract_strided_slice %65 {offsets = [0, 16], sizes = [2, 16], strides = [1, 1]} : vector<2x64xf32> to vector<2x16xf32>
    %68 = vector.extract_strided_slice %65 {offsets = [0, 48], sizes = [2, 16], strides = [1, 1]} : vector<2x64xf32> to vector<2x16xf32>
    %69 = vector.extract_strided_slice %60 {offsets = [0, 32], sizes = [2, 16], strides = [1, 1]} : vector<2x64xf32> to vector<2x16xf32>
    %70 = math.tanh %69 : vector<2x16xf32>
    %71 = arith.mulf %67, %53 : vector<2x16xf32>
    %72 = arith.mulf %66, %70 : vector<2x16xf32>
    %73 = arith.addf %71, %72 : vector<2x16xf32>
    %74 = math.tanh %73 : vector<2x16xf32>
    %75 = arith.mulf %68, %74 : vector<2x16xf32>
    %76 = vector.shape_cast %75 : vector<2x16xf32> to vector<2x1x16xf32>
    %77 = vector.extract_strided_slice %13 {offsets = [0, 3, 0], sizes = [2, 1, 64], strides = [1, 1, 1]} : vector<2x16x64xf32> to vector<2x1x64xf32>
    %78 = vector.shape_cast %77 : vector<2x1x64xf32> to vector<2x64xf32>
    %cst_25 = arith.constant dense<0.000000e+00> : vector<2x64xf32>
    %79 = tpu.matmul %75, %14, %cst_25 {dimension_numbers = #tpu.dot_dimension_numbers<[1], [0], [0], [1], [0, 0, 1, 1], [], []>, precision = #tpu.contract_precision<fp32>} : vector<2x16xf32>, vector<16x64xf32>, vector<2x64xf32> -> vector<2x64xf32>
    %80 = arith.addf %78, %79 : vector<2x64xf32>
    %81 = arith.negf %80 : vector<2x64xf32>
    %82 = math.exp %81 : vector<2x64xf32>
    %cst_26 = arith.constant 1.000000e+00 : f32
    %83 = vector.broadcast %cst_26 : f32 to vector<2x64xf32>
    %84 = arith.addf %83, %82 : vector<2x64xf32>
    %85 = arith.divf %83, %84 : vector<2x64xf32>
    %86 = vector.extract_strided_slice %85 {offsets = [0, 0], sizes = [2, 16], strides = [1, 1]} : vector<2x64xf32> to vector<2x16xf32>
    %87 = vector.extract_strided_slice %85 {offsets = [0, 16], sizes = [2, 16], strides = [1, 1]} : vector<2x64xf32> to vector<2x16xf32>
    %88 = vector.extract_strided_slice %85 {offsets = [0, 48], sizes = [2, 16], strides = [1, 1]} : vector<2x64xf32> to vector<2x16xf32>
    %89 = vector.extract_strided_slice %80 {offsets = [0, 32], sizes = [2, 16], strides = [1, 1]} : vector<2x64xf32> to vector<2x16xf32>
    %90 = math.tanh %89 : vector<2x16xf32>
    %91 = arith.mulf %87, %73 : vector<2x16xf32>
    %92 = arith.mulf %86, %90 : vector<2x16xf32>
    %93 = arith.addf %91, %92 : vector<2x16xf32>
    %94 = math.tanh %93 : vector<2x16xf32>
    %95 = arith.mulf %88, %94 : vector<2x16xf32>
    %96 = vector.shape_cast %95 : vector<2x16xf32> to vector<2x1x16xf32>
    %97 = vector.extract_strided_slice %13 {offsets = [0, 4, 0], sizes = [2, 1, 64], strides = [1, 1, 1]} : vector<2x16x64xf32> to vector<2x1x64xf32>
    %98 = vector.shape_cast %97 : vector<2x1x64xf32> to vector<2x64xf32>
    %cst_27 = arith.constant dense<0.000000e+00> : vector<2x64xf32>
    %99 = tpu.matmul %95, %14, %cst_27 {dimension_numbers = #tpu.dot_dimension_numbers<[1], [0], [0], [1], [0, 0, 1, 1], [], []>, precision = #tpu.contract_precision<fp32>} : vector<2x16xf32>, vector<16x64xf32>, vector<2x64xf32> -> vector<2x64xf32>
    %100 = arith.addf %98, %99 : vector<2x64xf32>
    %101 = arith.negf %100 : vector<2x64xf32>
    %102 = math.exp %101 : vector<2x64xf32>
    %cst_28 = arith.constant 1.000000e+00 : f32
    %103 = vector.broadcast %cst_28 : f32 to vector<2x64xf32>
    %104 = arith.addf %103, %102 : vector<2x64xf32>
    %105 = arith.divf %103, %104 : vector<2x64xf32>
    %106 = vector.extract_strided_slice %105 {offsets = [0, 0], sizes = [2, 16], strides = [1, 1]} : vector<2x64xf32> to vector<2x16xf32>
    %107 = vector.extract_strided_slice %105 {offsets = [0, 16], sizes = [2, 16], strides = [1, 1]} : vector<2x64xf32> to vector<2x16xf32>
    %108 = vector.extract_strided_slice %105 {offsets = [0, 48], sizes = [2, 16], strides = [1, 1]} : vector<2x64xf32> to vector<2x16xf32>
    %109 = vector.extract_strided_slice %100 {offsets = [0, 32], sizes = [2, 16], strides = [1, 1]} : vector<2x64xf32> to vector<2x16xf32>
    %110 = math.tanh %109 : vector<2x16xf32>
    %111 = arith.mulf %107, %93 : vector<2x16xf32>
    %112 = arith.mulf %106, %110 : vector<2x16xf32>
    %113 = arith.addf %111, %112 : vector<2x16xf32>
    %114 = math.tanh %113 : vector<2x16xf32>
    %115 = arith.mulf %108, %114 : vector<2x16xf32>
    %116 = vector.shape_cast %115 : vector<2x16xf32> to vector<2x1x16xf32>
    %117 = vector.extract_strided_slice %13 {offsets = [0, 5, 0], sizes = [2, 1, 64], strides = [1, 1, 1]} : vector<2x16x64xf32> to vector<2x1x64xf32>
    %118 = vector.shape_cast %117 : vector<2x1x64xf32> to vector<2x64xf32>
    %cst_29 = arith.constant dense<0.000000e+00> : vector<2x64xf32>
    %119 = tpu.matmul %115, %14, %cst_29 {dimension_numbers = #tpu.dot_dimension_numbers<[1], [0], [0], [1], [0, 0, 1, 1], [], []>, precision = #tpu.contract_precision<fp32>} : vector<2x16xf32>, vector<16x64xf32>, vector<2x64xf32> -> vector<2x64xf32>
    %120 = arith.addf %118, %119 : vector<2x64xf32>
    %121 = arith.negf %120 : vector<2x64xf32>
    %122 = math.exp %121 : vector<2x64xf32>
    %cst_30 = arith.constant 1.000000e+00 : f32
    %123 = vector.broadcast %cst_30 : f32 to vector<2x64xf32>
    %124 = arith.addf %123, %122 : vector<2x64xf32>
    %125 = arith.divf %123, %124 : vector<2x64xf32>
    %126 = vector.extract_strided_slice %125 {offsets = [0, 0], sizes = [2, 16], strides = [1, 1]} : vector<2x64xf32> to vector<2x16xf32>
    %127 = vector.extract_strided_slice %125 {offsets = [0, 16], sizes = [2, 16], strides = [1, 1]} : vector<2x64xf32> to vector<2x16xf32>
    %128 = vector.extract_strided_slice %125 {offsets = [0, 48], sizes = [2, 16], strides = [1, 1]} : vector<2x64xf32> to vector<2x16xf32>
    %129 = vector.extract_strided_slice %120 {offsets = [0, 32], sizes = [2, 16], strides = [1, 1]} : vector<2x64xf32> to vector<2x16xf32>
    %130 = math.tanh %129 : vector<2x16xf32>
    %131 = arith.mulf %127, %113 : vector<2x16xf32>
    %132 = arith.mulf %126, %130 : vector<2x16xf32>
    %133 = arith.addf %131, %132 : vector<2x16xf32>
    %134 = math.tanh %133 : vector<2x16xf32>
    %135 = arith.mulf %128, %134 : vector<2x16xf32>
    %136 = vector.shape_cast %135 : vector<2x16xf32> to vector<2x1x16xf32>
    %137 = vector.extract_strided_slice %13 {offsets = [0, 6, 0], sizes = [2, 1, 64], strides = [1, 1, 1]} : vector<2x16x64xf32> to vector<2x1x64xf32>
    %138 = vector.shape_cast %137 : vector<2x1x64xf32> to vector<2x64xf32>
    %cst_31 = arith.constant dense<0.000000e+00> : vector<2x64xf32>
    %139 = tpu.matmul %135, %14, %cst_31 {dimension_numbers = #tpu.dot_dimension_numbers<[1], [0], [0], [1], [0, 0, 1, 1], [], []>, precision = #tpu.contract_precision<fp32>} : vector<2x16xf32>, vector<16x64xf32>, vector<2x64xf32> -> vector<2x64xf32>
    %140 = arith.addf %138, %139 : vector<2x64xf32>
    %141 = arith.negf %140 : vector<2x64xf32>
    %142 = math.exp %141 : vector<2x64xf32>
    %cst_32 = arith.constant 1.000000e+00 : f32
    %143 = vector.broadcast %cst_32 : f32 to vector<2x64xf32>
    %144 = arith.addf %143, %142 : vector<2x64xf32>
    %145 = arith.divf %143, %144 : vector<2x64xf32>
    %146 = vector.extract_strided_slice %145 {offsets = [0, 0], sizes = [2, 16], strides = [1, 1]} : vector<2x64xf32> to vector<2x16xf32>
    %147 = vector.extract_strided_slice %145 {offsets = [0, 16], sizes = [2, 16], strides = [1, 1]} : vector<2x64xf32> to vector<2x16xf32>
    %148 = vector.extract_strided_slice %145 {offsets = [0, 48], sizes = [2, 16], strides = [1, 1]} : vector<2x64xf32> to vector<2x16xf32>
    %149 = vector.extract_strided_slice %140 {offsets = [0, 32], sizes = [2, 16], strides = [1, 1]} : vector<2x64xf32> to vector<2x16xf32>
    %150 = math.tanh %149 : vector<2x16xf32>
    %151 = arith.mulf %147, %133 : vector<2x16xf32>
    %152 = arith.mulf %146, %150 : vector<2x16xf32>
    %153 = arith.addf %151, %152 : vector<2x16xf32>
    %154 = math.tanh %153 : vector<2x16xf32>
    %155 = arith.mulf %148, %154 : vector<2x16xf32>
    %156 = vector.shape_cast %155 : vector<2x16xf32> to vector<2x1x16xf32>
    %157 = vector.extract_strided_slice %13 {offsets = [0, 7, 0], sizes = [2, 1, 64], strides = [1, 1, 1]} : vector<2x16x64xf32> to vector<2x1x64xf32>
    %158 = vector.shape_cast %157 : vector<2x1x64xf32> to vector<2x64xf32>
    %cst_33 = arith.constant dense<0.000000e+00> : vector<2x64xf32>
    %159 = tpu.matmul %155, %14, %cst_33 {dimension_numbers = #tpu.dot_dimension_numbers<[1], [0], [0], [1], [0, 0, 1, 1], [], []>, precision = #tpu.contract_precision<fp32>} : vector<2x16xf32>, vector<16x64xf32>, vector<2x64xf32> -> vector<2x64xf32>
    %160 = arith.addf %158, %159 : vector<2x64xf32>
    %161 = arith.negf %160 : vector<2x64xf32>
    %162 = math.exp %161 : vector<2x64xf32>
    %cst_34 = arith.constant 1.000000e+00 : f32
    %163 = vector.broadcast %cst_34 : f32 to vector<2x64xf32>
    %164 = arith.addf %163, %162 : vector<2x64xf32>
    %165 = arith.divf %163, %164 : vector<2x64xf32>
    %166 = vector.extract_strided_slice %165 {offsets = [0, 0], sizes = [2, 16], strides = [1, 1]} : vector<2x64xf32> to vector<2x16xf32>
    %167 = vector.extract_strided_slice %165 {offsets = [0, 16], sizes = [2, 16], strides = [1, 1]} : vector<2x64xf32> to vector<2x16xf32>
    %168 = vector.extract_strided_slice %165 {offsets = [0, 48], sizes = [2, 16], strides = [1, 1]} : vector<2x64xf32> to vector<2x16xf32>
    %169 = vector.extract_strided_slice %160 {offsets = [0, 32], sizes = [2, 16], strides = [1, 1]} : vector<2x64xf32> to vector<2x16xf32>
    %170 = math.tanh %169 : vector<2x16xf32>
    %171 = arith.mulf %167, %153 : vector<2x16xf32>
    %172 = arith.mulf %166, %170 : vector<2x16xf32>
    %173 = arith.addf %171, %172 : vector<2x16xf32>
    %174 = math.tanh %173 : vector<2x16xf32>
    %175 = arith.mulf %168, %174 : vector<2x16xf32>
    %176 = vector.shape_cast %175 : vector<2x16xf32> to vector<2x1x16xf32>
    %177 = vector.extract_strided_slice %13 {offsets = [0, 8, 0], sizes = [2, 1, 64], strides = [1, 1, 1]} : vector<2x16x64xf32> to vector<2x1x64xf32>
    %178 = vector.shape_cast %177 : vector<2x1x64xf32> to vector<2x64xf32>
    %cst_35 = arith.constant dense<0.000000e+00> : vector<2x64xf32>
    %179 = tpu.matmul %175, %14, %cst_35 {dimension_numbers = #tpu.dot_dimension_numbers<[1], [0], [0], [1], [0, 0, 1, 1], [], []>, precision = #tpu.contract_precision<fp32>} : vector<2x16xf32>, vector<16x64xf32>, vector<2x64xf32> -> vector<2x64xf32>
    %180 = arith.addf %178, %179 : vector<2x64xf32>
    %181 = arith.negf %180 : vector<2x64xf32>
    %182 = math.exp %181 : vector<2x64xf32>
    %cst_36 = arith.constant 1.000000e+00 : f32
    %183 = vector.broadcast %cst_36 : f32 to vector<2x64xf32>
    %184 = arith.addf %183, %182 : vector<2x64xf32>
    %185 = arith.divf %183, %184 : vector<2x64xf32>
    %186 = vector.extract_strided_slice %185 {offsets = [0, 0], sizes = [2, 16], strides = [1, 1]} : vector<2x64xf32> to vector<2x16xf32>
    %187 = vector.extract_strided_slice %185 {offsets = [0, 16], sizes = [2, 16], strides = [1, 1]} : vector<2x64xf32> to vector<2x16xf32>
    %188 = vector.extract_strided_slice %185 {offsets = [0, 48], sizes = [2, 16], strides = [1, 1]} : vector<2x64xf32> to vector<2x16xf32>
    %189 = vector.extract_strided_slice %180 {offsets = [0, 32], sizes = [2, 16], strides = [1, 1]} : vector<2x64xf32> to vector<2x16xf32>
    %190 = math.tanh %189 : vector<2x16xf32>
    %191 = arith.mulf %187, %173 : vector<2x16xf32>
    %192 = arith.mulf %186, %190 : vector<2x16xf32>
    %193 = arith.addf %191, %192 : vector<2x16xf32>
    %194 = math.tanh %193 : vector<2x16xf32>
    %195 = arith.mulf %188, %194 : vector<2x16xf32>
    %196 = vector.shape_cast %195 : vector<2x16xf32> to vector<2x1x16xf32>
    %197 = vector.extract_strided_slice %13 {offsets = [0, 9, 0], sizes = [2, 1, 64], strides = [1, 1, 1]} : vector<2x16x64xf32> to vector<2x1x64xf32>
    %198 = vector.shape_cast %197 : vector<2x1x64xf32> to vector<2x64xf32>
    %cst_37 = arith.constant dense<0.000000e+00> : vector<2x64xf32>
    %199 = tpu.matmul %195, %14, %cst_37 {dimension_numbers = #tpu.dot_dimension_numbers<[1], [0], [0], [1], [0, 0, 1, 1], [], []>, precision = #tpu.contract_precision<fp32>} : vector<2x16xf32>, vector<16x64xf32>, vector<2x64xf32> -> vector<2x64xf32>
    %200 = arith.addf %198, %199 : vector<2x64xf32>
    %201 = arith.negf %200 : vector<2x64xf32>
    %202 = math.exp %201 : vector<2x64xf32>
    %cst_38 = arith.constant 1.000000e+00 : f32
    %203 = vector.broadcast %cst_38 : f32 to vector<2x64xf32>
    %204 = arith.addf %203, %202 : vector<2x64xf32>
    %205 = arith.divf %203, %204 : vector<2x64xf32>
    %206 = vector.extract_strided_slice %205 {offsets = [0, 0], sizes = [2, 16], strides = [1, 1]} : vector<2x64xf32> to vector<2x16xf32>
    %207 = vector.extract_strided_slice %205 {offsets = [0, 16], sizes = [2, 16], strides = [1, 1]} : vector<2x64xf32> to vector<2x16xf32>
    %208 = vector.extract_strided_slice %205 {offsets = [0, 48], sizes = [2, 16], strides = [1, 1]} : vector<2x64xf32> to vector<2x16xf32>
    %209 = vector.extract_strided_slice %200 {offsets = [0, 32], sizes = [2, 16], strides = [1, 1]} : vector<2x64xf32> to vector<2x16xf32>
    %210 = math.tanh %209 : vector<2x16xf32>
    %211 = arith.mulf %207, %193 : vector<2x16xf32>
    %212 = arith.mulf %206, %210 : vector<2x16xf32>
    %213 = arith.addf %211, %212 : vector<2x16xf32>
    %214 = math.tanh %213 : vector<2x16xf32>
    %215 = arith.mulf %208, %214 : vector<2x16xf32>
    %216 = vector.shape_cast %215 : vector<2x16xf32> to vector<2x1x16xf32>
    %217 = vector.extract_strided_slice %13 {offsets = [0, 10, 0], sizes = [2, 1, 64], strides = [1, 1, 1]} : vector<2x16x64xf32> to vector<2x1x64xf32>
    %218 = vector.shape_cast %217 : vector<2x1x64xf32> to vector<2x64xf32>
    %cst_39 = arith.constant dense<0.000000e+00> : vector<2x64xf32>
    %219 = tpu.matmul %215, %14, %cst_39 {dimension_numbers = #tpu.dot_dimension_numbers<[1], [0], [0], [1], [0, 0, 1, 1], [], []>, precision = #tpu.contract_precision<fp32>} : vector<2x16xf32>, vector<16x64xf32>, vector<2x64xf32> -> vector<2x64xf32>
    %220 = arith.addf %218, %219 : vector<2x64xf32>
    %221 = arith.negf %220 : vector<2x64xf32>
    %222 = math.exp %221 : vector<2x64xf32>
    %cst_40 = arith.constant 1.000000e+00 : f32
    %223 = vector.broadcast %cst_40 : f32 to vector<2x64xf32>
    %224 = arith.addf %223, %222 : vector<2x64xf32>
    %225 = arith.divf %223, %224 : vector<2x64xf32>
    %226 = vector.extract_strided_slice %225 {offsets = [0, 0], sizes = [2, 16], strides = [1, 1]} : vector<2x64xf32> to vector<2x16xf32>
    %227 = vector.extract_strided_slice %225 {offsets = [0, 16], sizes = [2, 16], strides = [1, 1]} : vector<2x64xf32> to vector<2x16xf32>
    %228 = vector.extract_strided_slice %225 {offsets = [0, 48], sizes = [2, 16], strides = [1, 1]} : vector<2x64xf32> to vector<2x16xf32>
    %229 = vector.extract_strided_slice %220 {offsets = [0, 32], sizes = [2, 16], strides = [1, 1]} : vector<2x64xf32> to vector<2x16xf32>
    %230 = math.tanh %229 : vector<2x16xf32>
    %231 = arith.mulf %227, %213 : vector<2x16xf32>
    %232 = arith.mulf %226, %230 : vector<2x16xf32>
    %233 = arith.addf %231, %232 : vector<2x16xf32>
    %234 = math.tanh %233 : vector<2x16xf32>
    %235 = arith.mulf %228, %234 : vector<2x16xf32>
    %236 = vector.shape_cast %235 : vector<2x16xf32> to vector<2x1x16xf32>
    %237 = vector.extract_strided_slice %13 {offsets = [0, 11, 0], sizes = [2, 1, 64], strides = [1, 1, 1]} : vector<2x16x64xf32> to vector<2x1x64xf32>
    %238 = vector.shape_cast %237 : vector<2x1x64xf32> to vector<2x64xf32>
    %cst_41 = arith.constant dense<0.000000e+00> : vector<2x64xf32>
    %239 = tpu.matmul %235, %14, %cst_41 {dimension_numbers = #tpu.dot_dimension_numbers<[1], [0], [0], [1], [0, 0, 1, 1], [], []>, precision = #tpu.contract_precision<fp32>} : vector<2x16xf32>, vector<16x64xf32>, vector<2x64xf32> -> vector<2x64xf32>
    %240 = arith.addf %238, %239 : vector<2x64xf32>
    %241 = arith.negf %240 : vector<2x64xf32>
    %242 = math.exp %241 : vector<2x64xf32>
    %cst_42 = arith.constant 1.000000e+00 : f32
    %243 = vector.broadcast %cst_42 : f32 to vector<2x64xf32>
    %244 = arith.addf %243, %242 : vector<2x64xf32>
    %245 = arith.divf %243, %244 : vector<2x64xf32>
    %246 = vector.extract_strided_slice %245 {offsets = [0, 0], sizes = [2, 16], strides = [1, 1]} : vector<2x64xf32> to vector<2x16xf32>
    %247 = vector.extract_strided_slice %245 {offsets = [0, 16], sizes = [2, 16], strides = [1, 1]} : vector<2x64xf32> to vector<2x16xf32>
    %248 = vector.extract_strided_slice %245 {offsets = [0, 48], sizes = [2, 16], strides = [1, 1]} : vector<2x64xf32> to vector<2x16xf32>
    %249 = vector.extract_strided_slice %240 {offsets = [0, 32], sizes = [2, 16], strides = [1, 1]} : vector<2x64xf32> to vector<2x16xf32>
    %250 = math.tanh %249 : vector<2x16xf32>
    %251 = arith.mulf %247, %233 : vector<2x16xf32>
    %252 = arith.mulf %246, %250 : vector<2x16xf32>
    %253 = arith.addf %251, %252 : vector<2x16xf32>
    %254 = math.tanh %253 : vector<2x16xf32>
    %255 = arith.mulf %248, %254 : vector<2x16xf32>
    %256 = vector.shape_cast %255 : vector<2x16xf32> to vector<2x1x16xf32>
    %257 = vector.extract_strided_slice %13 {offsets = [0, 12, 0], sizes = [2, 1, 64], strides = [1, 1, 1]} : vector<2x16x64xf32> to vector<2x1x64xf32>
    %258 = vector.shape_cast %257 : vector<2x1x64xf32> to vector<2x64xf32>
    %cst_43 = arith.constant dense<0.000000e+00> : vector<2x64xf32>
    %259 = tpu.matmul %255, %14, %cst_43 {dimension_numbers = #tpu.dot_dimension_numbers<[1], [0], [0], [1], [0, 0, 1, 1], [], []>, precision = #tpu.contract_precision<fp32>} : vector<2x16xf32>, vector<16x64xf32>, vector<2x64xf32> -> vector<2x64xf32>
    %260 = arith.addf %258, %259 : vector<2x64xf32>
    %261 = arith.negf %260 : vector<2x64xf32>
    %262 = math.exp %261 : vector<2x64xf32>
    %cst_44 = arith.constant 1.000000e+00 : f32
    %263 = vector.broadcast %cst_44 : f32 to vector<2x64xf32>
    %264 = arith.addf %263, %262 : vector<2x64xf32>
    %265 = arith.divf %263, %264 : vector<2x64xf32>
    %266 = vector.extract_strided_slice %265 {offsets = [0, 0], sizes = [2, 16], strides = [1, 1]} : vector<2x64xf32> to vector<2x16xf32>
    %267 = vector.extract_strided_slice %265 {offsets = [0, 16], sizes = [2, 16], strides = [1, 1]} : vector<2x64xf32> to vector<2x16xf32>
    %268 = vector.extract_strided_slice %265 {offsets = [0, 48], sizes = [2, 16], strides = [1, 1]} : vector<2x64xf32> to vector<2x16xf32>
    %269 = vector.extract_strided_slice %260 {offsets = [0, 32], sizes = [2, 16], strides = [1, 1]} : vector<2x64xf32> to vector<2x16xf32>
    %270 = math.tanh %269 : vector<2x16xf32>
    %271 = arith.mulf %267, %253 : vector<2x16xf32>
    %272 = arith.mulf %266, %270 : vector<2x16xf32>
    %273 = arith.addf %271, %272 : vector<2x16xf32>
    %274 = math.tanh %273 : vector<2x16xf32>
    %275 = arith.mulf %268, %274 : vector<2x16xf32>
    %276 = vector.shape_cast %275 : vector<2x16xf32> to vector<2x1x16xf32>
    %277 = vector.extract_strided_slice %13 {offsets = [0, 13, 0], sizes = [2, 1, 64], strides = [1, 1, 1]} : vector<2x16x64xf32> to vector<2x1x64xf32>
    %278 = vector.shape_cast %277 : vector<2x1x64xf32> to vector<2x64xf32>
    %cst_45 = arith.constant dense<0.000000e+00> : vector<2x64xf32>
    %279 = tpu.matmul %275, %14, %cst_45 {dimension_numbers = #tpu.dot_dimension_numbers<[1], [0], [0], [1], [0, 0, 1, 1], [], []>, precision = #tpu.contract_precision<fp32>} : vector<2x16xf32>, vector<16x64xf32>, vector<2x64xf32> -> vector<2x64xf32>
    %280 = arith.addf %278, %279 : vector<2x64xf32>
    %281 = arith.negf %280 : vector<2x64xf32>
    %282 = math.exp %281 : vector<2x64xf32>
    %cst_46 = arith.constant 1.000000e+00 : f32
    %283 = vector.broadcast %cst_46 : f32 to vector<2x64xf32>
    %284 = arith.addf %283, %282 : vector<2x64xf32>
    %285 = arith.divf %283, %284 : vector<2x64xf32>
    %286 = vector.extract_strided_slice %285 {offsets = [0, 0], sizes = [2, 16], strides = [1, 1]} : vector<2x64xf32> to vector<2x16xf32>
    %287 = vector.extract_strided_slice %285 {offsets = [0, 16], sizes = [2, 16], strides = [1, 1]} : vector<2x64xf32> to vector<2x16xf32>
    %288 = vector.extract_strided_slice %285 {offsets = [0, 48], sizes = [2, 16], strides = [1, 1]} : vector<2x64xf32> to vector<2x16xf32>
    %289 = vector.extract_strided_slice %280 {offsets = [0, 32], sizes = [2, 16], strides = [1, 1]} : vector<2x64xf32> to vector<2x16xf32>
    %290 = math.tanh %289 : vector<2x16xf32>
    %291 = arith.mulf %287, %273 : vector<2x16xf32>
    %292 = arith.mulf %286, %290 : vector<2x16xf32>
    %293 = arith.addf %291, %292 : vector<2x16xf32>
    %294 = math.tanh %293 : vector<2x16xf32>
    %295 = arith.mulf %288, %294 : vector<2x16xf32>
    %296 = vector.shape_cast %295 : vector<2x16xf32> to vector<2x1x16xf32>
    %297 = vector.extract_strided_slice %13 {offsets = [0, 14, 0], sizes = [2, 1, 64], strides = [1, 1, 1]} : vector<2x16x64xf32> to vector<2x1x64xf32>
    %298 = vector.shape_cast %297 : vector<2x1x64xf32> to vector<2x64xf32>
    %cst_47 = arith.constant dense<0.000000e+00> : vector<2x64xf32>
    %299 = tpu.matmul %295, %14, %cst_47 {dimension_numbers = #tpu.dot_dimension_numbers<[1], [0], [0], [1], [0, 0, 1, 1], [], []>, precision = #tpu.contract_precision<fp32>} : vector<2x16xf32>, vector<16x64xf32>, vector<2x64xf32> -> vector<2x64xf32>
    %300 = arith.addf %298, %299 : vector<2x64xf32>
    %301 = arith.negf %300 : vector<2x64xf32>
    %302 = math.exp %301 : vector<2x64xf32>
    %cst_48 = arith.constant 1.000000e+00 : f32
    %303 = vector.broadcast %cst_48 : f32 to vector<2x64xf32>
    %304 = arith.addf %303, %302 : vector<2x64xf32>
    %305 = arith.divf %303, %304 : vector<2x64xf32>
    %306 = vector.extract_strided_slice %305 {offsets = [0, 0], sizes = [2, 16], strides = [1, 1]} : vector<2x64xf32> to vector<2x16xf32>
    %307 = vector.extract_strided_slice %305 {offsets = [0, 16], sizes = [2, 16], strides = [1, 1]} : vector<2x64xf32> to vector<2x16xf32>
    %308 = vector.extract_strided_slice %305 {offsets = [0, 48], sizes = [2, 16], strides = [1, 1]} : vector<2x64xf32> to vector<2x16xf32>
    %309 = vector.extract_strided_slice %300 {offsets = [0, 32], sizes = [2, 16], strides = [1, 1]} : vector<2x64xf32> to vector<2x16xf32>
    %310 = math.tanh %309 : vector<2x16xf32>
    %311 = arith.mulf %307, %293 : vector<2x16xf32>
    %312 = arith.mulf %306, %310 : vector<2x16xf32>
    %313 = arith.addf %311, %312 : vector<2x16xf32>
    %314 = math.tanh %313 : vector<2x16xf32>
    %315 = arith.mulf %308, %314 : vector<2x16xf32>
    %316 = vector.shape_cast %315 : vector<2x16xf32> to vector<2x1x16xf32>
    %317 = vector.extract_strided_slice %13 {offsets = [0, 15, 0], sizes = [2, 1, 64], strides = [1, 1, 1]} : vector<2x16x64xf32> to vector<2x1x64xf32>
    %318 = vector.shape_cast %317 : vector<2x1x64xf32> to vector<2x64xf32>
    %cst_49 = arith.constant dense<0.000000e+00> : vector<2x64xf32>
    %319 = tpu.matmul %315, %14, %cst_49 {dimension_numbers = #tpu.dot_dimension_numbers<[1], [0], [0], [1], [0, 0, 1, 1], [], []>, precision = #tpu.contract_precision<fp32>} : vector<2x16xf32>, vector<16x64xf32>, vector<2x64xf32> -> vector<2x64xf32>
    %320 = arith.addf %318, %319 : vector<2x64xf32>
    %321 = arith.negf %320 : vector<2x64xf32>
    %322 = math.exp %321 : vector<2x64xf32>
    %cst_50 = arith.constant 1.000000e+00 : f32
    %323 = vector.broadcast %cst_50 : f32 to vector<2x64xf32>
    %324 = arith.addf %323, %322 : vector<2x64xf32>
    %325 = arith.divf %323, %324 : vector<2x64xf32>
    %326 = vector.extract_strided_slice %325 {offsets = [0, 0], sizes = [2, 16], strides = [1, 1]} : vector<2x64xf32> to vector<2x16xf32>
    %327 = vector.extract_strided_slice %325 {offsets = [0, 16], sizes = [2, 16], strides = [1, 1]} : vector<2x64xf32> to vector<2x16xf32>
    %328 = vector.extract_strided_slice %325 {offsets = [0, 48], sizes = [2, 16], strides = [1, 1]} : vector<2x64xf32> to vector<2x16xf32>
    %329 = vector.extract_strided_slice %320 {offsets = [0, 32], sizes = [2, 16], strides = [1, 1]} : vector<2x64xf32> to vector<2x16xf32>
    %330 = math.tanh %329 : vector<2x16xf32>
    %331 = arith.mulf %327, %313 : vector<2x16xf32>
    %332 = arith.mulf %326, %330 : vector<2x16xf32>
    %333 = arith.addf %331, %332 : vector<2x16xf32>
    %334 = math.tanh %333 : vector<2x16xf32>
    %335 = arith.mulf %328, %334 : vector<2x16xf32>
    %336 = vector.shape_cast %335 : vector<2x16xf32> to vector<2x1x16xf32>
    %337 = tpu.concatenate %36, %56, %76, %96, %116, %136, %156, %176, %196, %216, %236, %256, %276, %296, %316, %336 in 1 : vector<2x1x16xf32>, vector<2x1x16xf32>, vector<2x1x16xf32>, vector<2x1x16xf32>, vector<2x1x16xf32>, vector<2x1x16xf32>, vector<2x1x16xf32>, vector<2x1x16xf32>, vector<2x1x16xf32>, vector<2x1x16xf32>, vector<2x1x16xf32>, vector<2x1x16xf32>, vector<2x1x16xf32>, vector<2x1x16xf32>, vector<2x1x16xf32>, vector<2x1x16xf32> -> vector<2x16x16xf32>
    %338 = vector.shape_cast %337 : vector<2x16x16xf32> to vector<32x16xf32>
    %339 = tpu.iota {dimensions = array<i32: 0>} : vector<32x1xi32>
    %c16_i32 = arith.constant 16 : i32
    %c0_i32 = arith.constant 0 : i32
    %340 = arith.cmpi eq, %c16_i32, %c0_i32 : i32
    %c1_i32 = arith.constant 1 : i32
    %341 = arith.select %340, %c1_i32, %c16_i32 : i32
    %342 = vector.broadcast %341 : i32 to vector<32x1xi32>
    %343 = arith.remsi %339, %342 : vector<32x1xi32>
    %c0_i32_51 = arith.constant 0 : i32
    %344 = vector.broadcast %c0_i32_51 : i32 to vector<32x1xi32>
    %345 = arith.cmpi ne, %343, %344 : vector<32x1xi32>
    %c0_i32_52 = arith.constant 0 : i32
    %346 = vector.broadcast %c0_i32_52 : i32 to vector<32x1xi32>
    %347 = arith.cmpi slt, %343, %346 : vector<32x1xi32>
    %c0_i32_53 = arith.constant 0 : i32
    %348 = arith.cmpi slt, %341, %c0_i32_53 : i32
    %349 = vector.broadcast %348 : i1 to vector<32x1xi1>
    %350 = vector.broadcast %349 : vector<32x1xi1> to vector<32x1xi1>
    %351 = arith.xori %347, %350 : vector<32x1xi1>
    %352 = arith.andi %351, %345 : vector<32x1xi1>
    %353 = vector.broadcast %341 : i32 to vector<32x1xi32>
    %354 = arith.addi %343, %353 : vector<32x1xi32>
    %355 = arith.select %352, %354, %343 : vector<32x1xi1>, vector<32x1xi32>
    %c0_i32_54 = arith.constant 0 : i32
    %356 = vector.broadcast %c0_i32_54 : i32 to vector<32x1xi32>
    %357 = arith.cmpi eq, %355, %356 : vector<32x1xi32>
    %c15_i32 = arith.constant 15 : i32
    %358 = vector.broadcast %c15_i32 : i32 to vector<32x1xi32>
    %359 = arith.cmpi eq, %355, %358 : vector<32x1xi32>
    %360 = vector.extract_strided_slice %0 {offsets = [0, 0, 8], sizes = [2, 16, 4], strides = [1, 1, 1]} : vector<2x16x12xf32> to vector<2x16x4xf32>
    %361 = vector.shape_cast %360 : vector<2x16x4xf32> to vector<32x4xf32>
    %362 = vector.extract_strided_slice %361 {offsets = [0, 0], sizes = [1, 4], strides = [1, 1]} : vector<32x4xf32> to vector<1x4xf32>
    %363 = vector.extract_strided_slice %361 {offsets = [0, 0], sizes = [31, 4], strides = [1, 1]} : vector<32x4xf32> to vector<31x4xf32>
    %364 = tpu.concatenate %362, %363 in 0 : vector<1x4xf32>, vector<31x4xf32> -> vector<32x4xf32>
    %cst_55 = arith.constant 0.000000e+00 : f32
    %365 = vector.shape_cast %357 : vector<32x1xi1> to vector<32x1xi1>
    %366 = vector.broadcast %365 : vector<32x1xi1> to vector<32x4xi1>
    %367 = vector.broadcast %cst_55 : f32 to vector<32x4xf32>
    %368 = arith.select %366, %367, %364 : vector<32x4xi1>, vector<32x4xf32>
    %369 = vector.extract_strided_slice %361 {offsets = [1, 0], sizes = [31, 4], strides = [1, 1]} : vector<32x4xf32> to vector<31x4xf32>
    %370 = vector.extract_strided_slice %361 {offsets = [31, 0], sizes = [1, 4], strides = [1, 1]} : vector<32x4xf32> to vector<1x4xf32>
    %371 = tpu.concatenate %369, %370 in 0 : vector<31x4xf32>, vector<1x4xf32> -> vector<32x4xf32>
    %cst_56 = arith.constant 0.000000e+00 : f32
    %372 = vector.shape_cast %359 : vector<32x1xi1> to vector<32x1xi1>
    %373 = vector.broadcast %372 : vector<32x1xi1> to vector<32x4xi1>
    %374 = vector.broadcast %cst_56 : f32 to vector<32x4xf32>
    %375 = arith.select %373, %374, %371 : vector<32x4xi1>, vector<32x4xf32>
    %376 = tpu.concatenate %368, %361, %375 in 1 : vector<32x4xf32>, vector<32x4xf32>, vector<32x4xf32> -> vector<32x12xf32>
    %c0_57 = arith.constant 0 : index
    %c0_58 = arith.constant 0 : index
    %377 = vector.load %arg7[%c0_57, %c0_58] : memref<12x24xf32, #tpu.memory_space<vmem>>, vector<12x24xf32>
    %cst_59 = arith.constant dense<0.000000e+00> : vector<32x24xf32>
    %378 = tpu.matmul %376, %377, %cst_59 {dimension_numbers = #tpu.dot_dimension_numbers<[1], [0], [0], [1], [0, 0, 1, 1], [], []>, precision = #tpu.contract_precision<fp32>} : vector<32x12xf32>, vector<12x24xf32>, vector<32x24xf32> -> vector<32x24xf32>
    %c0_60 = arith.constant 0 : index
    %c0_61 = arith.constant 0 : index
    %379 = vector.load %arg8[%c0_60, %c0_61] : memref<1x24xf32, #tpu.memory_space<vmem>>, vector<1x24xf32>
    %380 = vector.broadcast %379 : vector<1x24xf32> to vector<32x24xf32>
    %381 = arith.addf %378, %380 : vector<32x24xf32>
    %382 = vector.extract_strided_slice %381 {offsets = [0, 0], sizes = [1, 24], strides = [1, 1]} : vector<32x24xf32> to vector<1x24xf32>
    %383 = vector.extract_strided_slice %381 {offsets = [0, 0], sizes = [31, 24], strides = [1, 1]} : vector<32x24xf32> to vector<31x24xf32>
    %384 = tpu.concatenate %382, %383 in 0 : vector<1x24xf32>, vector<31x24xf32> -> vector<32x24xf32>
    %cst_62 = arith.constant 0.000000e+00 : f32
    %385 = vector.shape_cast %357 : vector<32x1xi1> to vector<32x1xi1>
    %386 = vector.broadcast %385 : vector<32x1xi1> to vector<32x24xi1>
    %387 = vector.broadcast %cst_62 : f32 to vector<32x24xf32>
    %388 = arith.select %386, %387, %384 : vector<32x24xi1>, vector<32x24xf32>
    %389 = vector.extract_strided_slice %381 {offsets = [1, 0], sizes = [31, 24], strides = [1, 1]} : vector<32x24xf32> to vector<31x24xf32>
    %390 = vector.extract_strided_slice %381 {offsets = [31, 0], sizes = [1, 24], strides = [1, 1]} : vector<32x24xf32> to vector<1x24xf32>
    %391 = tpu.concatenate %389, %390 in 0 : vector<31x24xf32>, vector<1x24xf32> -> vector<32x24xf32>
    %cst_63 = arith.constant 0.000000e+00 : f32
    %392 = vector.shape_cast %359 : vector<32x1xi1> to vector<32x1xi1>
    %393 = vector.broadcast %392 : vector<32x1xi1> to vector<32x24xi1>
    %394 = vector.broadcast %cst_63 : f32 to vector<32x24xf32>
    %395 = arith.select %393, %394, %391 : vector<32x24xi1>, vector<32x24xf32>
    %396 = tpu.concatenate %388, %381, %395 in 1 : vector<32x24xf32>, vector<32x24xf32>, vector<32x24xf32> -> vector<32x72xf32>
    %c0_64 = arith.constant 0 : index
    %c0_65 = arith.constant 0 : index
    %397 = vector.load %arg9[%c0_64, %c0_65] : memref<72x24xf32, #tpu.memory_space<vmem>>, vector<72x24xf32>
    %cst_66 = arith.constant dense<0.000000e+00> : vector<32x24xf32>
    %398 = tpu.matmul %396, %397, %cst_66 {dimension_numbers = #tpu.dot_dimension_numbers<[1], [0], [0], [1], [0, 0, 1, 1], [], []>, precision = #tpu.contract_precision<fp32>} : vector<32x72xf32>, vector<72x24xf32>, vector<32x24xf32> -> vector<32x24xf32>
    %c0_67 = arith.constant 0 : index
    %c0_68 = arith.constant 0 : index
    %399 = vector.load %arg10[%c0_67, %c0_68] : memref<1x24xf32, #tpu.memory_space<vmem>>, vector<1x24xf32>
    %400 = vector.broadcast %399 : vector<1x24xf32> to vector<32x24xf32>
    %401 = arith.addf %398, %400 : vector<32x24xf32>
    %cst_69 = arith.constant dense<0.000000e+00> : vector<32xf32>
    %402 = vector.multi_reduction <add>, %401, %cst_69 [1] : vector<32x24xf32> to vector<32xf32>
    %403 = vector.shape_cast %402 : vector<32xf32> to vector<32x1xf32>
    %cst_70 = arith.constant 2.400000e+01 : f32
    %404 = vector.broadcast %cst_70 : f32 to vector<32x1xf32>
    %405 = arith.divf %403, %404 : vector<32x1xf32>
    %406 = vector.broadcast %405 : vector<32x1xf32> to vector<32x24xf32>
    %407 = arith.subf %401, %406 : vector<32x24xf32>
    %408 = arith.mulf %407, %407 : vector<32x24xf32>
    %cst_71 = arith.constant dense<0.000000e+00> : vector<32xf32>
    %409 = vector.multi_reduction <add>, %408, %cst_71 [1] : vector<32x24xf32> to vector<32xf32>
    %410 = vector.shape_cast %409 : vector<32xf32> to vector<32x1xf32>
    %cst_72 = arith.constant 2.400000e+01 : f32
    %411 = vector.broadcast %cst_72 : f32 to vector<32x1xf32>
    %412 = arith.divf %410, %411 : vector<32x1xf32>
    %413 = vector.broadcast %405 : vector<32x1xf32> to vector<32x24xf32>
    %414 = arith.subf %401, %413 : vector<32x24xf32>
    %cst_73 = arith.constant 9.99999974E-6 : f32
    %415 = vector.broadcast %cst_73 : f32 to vector<32x1xf32>
    %416 = arith.addf %412, %415 : vector<32x1xf32>
    %417 = math.rsqrt %416 : vector<32x1xf32>
    %418 = vector.broadcast %417 : vector<32x1xf32> to vector<32x24xf32>
    %419 = arith.mulf %414, %418 : vector<32x24xf32>
    %c0_74 = arith.constant 0 : index
    %c0_75 = arith.constant 0 : index
    %420 = vector.load %arg11[%c0_74, %c0_75] : memref<1x24xf32, #tpu.memory_space<vmem>>, vector<1x24xf32>
    %421 = vector.broadcast %420 : vector<1x24xf32> to vector<32x24xf32>
    %422 = arith.mulf %419, %421 : vector<32x24xf32>
    %c0_76 = arith.constant 0 : index
    %c0_77 = arith.constant 0 : index
    %423 = vector.load %arg12[%c0_76, %c0_77] : memref<1x24xf32, #tpu.memory_space<vmem>>, vector<1x24xf32>
    %424 = vector.broadcast %423 : vector<1x24xf32> to vector<32x24xf32>
    %425 = arith.addf %422, %424 : vector<32x24xf32>
    %cst_78 = arith.constant 0.000000e+00 : f32
    %426 = vector.broadcast %cst_78 : f32 to vector<32x24xf32>
    %427 = arith.maximumf %425, %426 : vector<32x24xf32>
    %428 = vector.extract_strided_slice %427 {offsets = [0, 0], sizes = [1, 24], strides = [1, 1]} : vector<32x24xf32> to vector<1x24xf32>
    %429 = vector.extract_strided_slice %427 {offsets = [0, 0], sizes = [31, 24], strides = [1, 1]} : vector<32x24xf32> to vector<31x24xf32>
    %430 = tpu.concatenate %428, %429 in 0 : vector<1x24xf32>, vector<31x24xf32> -> vector<32x24xf32>
    %cst_79 = arith.constant 0.000000e+00 : f32
    %431 = vector.shape_cast %357 : vector<32x1xi1> to vector<32x1xi1>
    %432 = vector.broadcast %431 : vector<32x1xi1> to vector<32x24xi1>
    %433 = vector.broadcast %cst_79 : f32 to vector<32x24xf32>
    %434 = arith.select %432, %433, %430 : vector<32x24xi1>, vector<32x24xf32>
    %435 = vector.extract_strided_slice %427 {offsets = [1, 0], sizes = [31, 24], strides = [1, 1]} : vector<32x24xf32> to vector<31x24xf32>
    %436 = vector.extract_strided_slice %427 {offsets = [31, 0], sizes = [1, 24], strides = [1, 1]} : vector<32x24xf32> to vector<1x24xf32>
    %437 = tpu.concatenate %435, %436 in 0 : vector<31x24xf32>, vector<1x24xf32> -> vector<32x24xf32>
    %cst_80 = arith.constant 0.000000e+00 : f32
    %438 = vector.shape_cast %359 : vector<32x1xi1> to vector<32x1xi1>
    %439 = vector.broadcast %438 : vector<32x1xi1> to vector<32x24xi1>
    %440 = vector.broadcast %cst_80 : f32 to vector<32x24xf32>
    %441 = arith.select %439, %440, %437 : vector<32x24xi1>, vector<32x24xf32>
    %442 = tpu.concatenate %434, %427, %441 in 1 : vector<32x24xf32>, vector<32x24xf32>, vector<32x24xf32> -> vector<32x72xf32>
    %c0_81 = arith.constant 0 : index
    %c0_82 = arith.constant 0 : index
    %443 = vector.load %arg13[%c0_81, %c0_82] : memref<72x24xf32, #tpu.memory_space<vmem>>, vector<72x24xf32>
    %cst_83 = arith.constant dense<0.000000e+00> : vector<32x24xf32>
    %444 = tpu.matmul %442, %443, %cst_83 {dimension_numbers = #tpu.dot_dimension_numbers<[1], [0], [0], [1], [0, 0, 1, 1], [], []>, precision = #tpu.contract_precision<fp32>} : vector<32x72xf32>, vector<72x24xf32>, vector<32x24xf32> -> vector<32x24xf32>
    %c0_84 = arith.constant 0 : index
    %c0_85 = arith.constant 0 : index
    %445 = vector.load %arg14[%c0_84, %c0_85] : memref<1x24xf32, #tpu.memory_space<vmem>>, vector<1x24xf32>
    %446 = vector.broadcast %445 : vector<1x24xf32> to vector<32x24xf32>
    %447 = arith.addf %444, %446 : vector<32x24xf32>
    %cst_86 = arith.constant dense<0.000000e+00> : vector<32xf32>
    %448 = vector.multi_reduction <add>, %447, %cst_86 [1] : vector<32x24xf32> to vector<32xf32>
    %449 = vector.shape_cast %448 : vector<32xf32> to vector<32x1xf32>
    %cst_87 = arith.constant 2.400000e+01 : f32
    %450 = vector.broadcast %cst_87 : f32 to vector<32x1xf32>
    %451 = arith.divf %449, %450 : vector<32x1xf32>
    %452 = vector.broadcast %451 : vector<32x1xf32> to vector<32x24xf32>
    %453 = arith.subf %447, %452 : vector<32x24xf32>
    %454 = arith.mulf %453, %453 : vector<32x24xf32>
    %cst_88 = arith.constant dense<0.000000e+00> : vector<32xf32>
    %455 = vector.multi_reduction <add>, %454, %cst_88 [1] : vector<32x24xf32> to vector<32xf32>
    %456 = vector.shape_cast %455 : vector<32xf32> to vector<32x1xf32>
    %cst_89 = arith.constant 2.400000e+01 : f32
    %457 = vector.broadcast %cst_89 : f32 to vector<32x1xf32>
    %458 = arith.divf %456, %457 : vector<32x1xf32>
    %459 = vector.broadcast %451 : vector<32x1xf32> to vector<32x24xf32>
    %460 = arith.subf %447, %459 : vector<32x24xf32>
    %cst_90 = arith.constant 9.99999974E-6 : f32
    %461 = vector.broadcast %cst_90 : f32 to vector<32x1xf32>
    %462 = arith.addf %458, %461 : vector<32x1xf32>
    %463 = math.rsqrt %462 : vector<32x1xf32>
    %464 = vector.broadcast %463 : vector<32x1xf32> to vector<32x24xf32>
    %465 = arith.mulf %460, %464 : vector<32x24xf32>
    %c0_91 = arith.constant 0 : index
    %c0_92 = arith.constant 0 : index
    %466 = vector.load %arg15[%c0_91, %c0_92] : memref<1x24xf32, #tpu.memory_space<vmem>>, vector<1x24xf32>
    %467 = vector.broadcast %466 : vector<1x24xf32> to vector<32x24xf32>
    %468 = arith.mulf %465, %467 : vector<32x24xf32>
    %c0_93 = arith.constant 0 : index
    %c0_94 = arith.constant 0 : index
    %469 = vector.load %arg16[%c0_93, %c0_94] : memref<1x24xf32, #tpu.memory_space<vmem>>, vector<1x24xf32>
    %470 = vector.broadcast %469 : vector<1x24xf32> to vector<32x24xf32>
    %471 = arith.addf %468, %470 : vector<32x24xf32>
    %cst_95 = arith.constant 0.000000e+00 : f32
    %472 = vector.broadcast %cst_95 : f32 to vector<32x24xf32>
    %473 = arith.maximumf %471, %472 : vector<32x24xf32>
    %474 = vector.extract_strided_slice %2 {offsets = [0, 0, 8], sizes = [2, 16, 4], strides = [1, 1, 1]} : vector<2x16x12xf32> to vector<2x16x4xf32>
    %475 = vector.shape_cast %474 : vector<2x16x4xf32> to vector<32x4xf32>
    %476 = vector.extract_strided_slice %475 {offsets = [0, 0], sizes = [1, 4], strides = [1, 1]} : vector<32x4xf32> to vector<1x4xf32>
    %477 = vector.extract_strided_slice %475 {offsets = [0, 0], sizes = [31, 4], strides = [1, 1]} : vector<32x4xf32> to vector<31x4xf32>
    %478 = tpu.concatenate %476, %477 in 0 : vector<1x4xf32>, vector<31x4xf32> -> vector<32x4xf32>
    %cst_96 = arith.constant 0.000000e+00 : f32
    %479 = vector.shape_cast %357 : vector<32x1xi1> to vector<32x1xi1>
    %480 = vector.broadcast %479 : vector<32x1xi1> to vector<32x4xi1>
    %481 = vector.broadcast %cst_96 : f32 to vector<32x4xf32>
    %482 = arith.select %480, %481, %478 : vector<32x4xi1>, vector<32x4xf32>
    %483 = vector.extract_strided_slice %475 {offsets = [1, 0], sizes = [31, 4], strides = [1, 1]} : vector<32x4xf32> to vector<31x4xf32>
    %484 = vector.extract_strided_slice %475 {offsets = [31, 0], sizes = [1, 4], strides = [1, 1]} : vector<32x4xf32> to vector<1x4xf32>
    %485 = tpu.concatenate %483, %484 in 0 : vector<31x4xf32>, vector<1x4xf32> -> vector<32x4xf32>
    %cst_97 = arith.constant 0.000000e+00 : f32
    %486 = vector.shape_cast %359 : vector<32x1xi1> to vector<32x1xi1>
    %487 = vector.broadcast %486 : vector<32x1xi1> to vector<32x4xi1>
    %488 = vector.broadcast %cst_97 : f32 to vector<32x4xf32>
    %489 = arith.select %487, %488, %485 : vector<32x4xi1>, vector<32x4xf32>
    %490 = tpu.concatenate %482, %475, %489 in 1 : vector<32x4xf32>, vector<32x4xf32>, vector<32x4xf32> -> vector<32x12xf32>
    %c0_98 = arith.constant 0 : index
    %c0_99 = arith.constant 0 : index
    %491 = vector.load %arg17[%c0_98, %c0_99] : memref<12x24xf32, #tpu.memory_space<vmem>>, vector<12x24xf32>
    %cst_100 = arith.constant dense<0.000000e+00> : vector<32x24xf32>
    %492 = tpu.matmul %490, %491, %cst_100 {dimension_numbers = #tpu.dot_dimension_numbers<[1], [0], [0], [1], [0, 0, 1, 1], [], []>, precision = #tpu.contract_precision<fp32>} : vector<32x12xf32>, vector<12x24xf32>, vector<32x24xf32> -> vector<32x24xf32>
    %c0_101 = arith.constant 0 : index
    %c0_102 = arith.constant 0 : index
    %493 = vector.load %arg18[%c0_101, %c0_102] : memref<1x24xf32, #tpu.memory_space<vmem>>, vector<1x24xf32>
    %494 = vector.broadcast %493 : vector<1x24xf32> to vector<32x24xf32>
    %495 = arith.addf %492, %494 : vector<32x24xf32>
    %496 = vector.extract_strided_slice %495 {offsets = [0, 0], sizes = [1, 24], strides = [1, 1]} : vector<32x24xf32> to vector<1x24xf32>
    %497 = vector.extract_strided_slice %495 {offsets = [0, 0], sizes = [31, 24], strides = [1, 1]} : vector<32x24xf32> to vector<31x24xf32>
    %498 = tpu.concatenate %496, %497 in 0 : vector<1x24xf32>, vector<31x24xf32> -> vector<32x24xf32>
    %cst_103 = arith.constant 0.000000e+00 : f32
    %499 = vector.shape_cast %357 : vector<32x1xi1> to vector<32x1xi1>
    %500 = vector.broadcast %499 : vector<32x1xi1> to vector<32x24xi1>
    %501 = vector.broadcast %cst_103 : f32 to vector<32x24xf32>
    %502 = arith.select %500, %501, %498 : vector<32x24xi1>, vector<32x24xf32>
    %503 = vector.extract_strided_slice %495 {offsets = [1, 0], sizes = [31, 24], strides = [1, 1]} : vector<32x24xf32> to vector<31x24xf32>
    %504 = vector.extract_strided_slice %495 {offsets = [31, 0], sizes = [1, 24], strides = [1, 1]} : vector<32x24xf32> to vector<1x24xf32>
    %505 = tpu.concatenate %503, %504 in 0 : vector<31x24xf32>, vector<1x24xf32> -> vector<32x24xf32>
    %cst_104 = arith.constant 0.000000e+00 : f32
    %506 = vector.shape_cast %359 : vector<32x1xi1> to vector<32x1xi1>
    %507 = vector.broadcast %506 : vector<32x1xi1> to vector<32x24xi1>
    %508 = vector.broadcast %cst_104 : f32 to vector<32x24xf32>
    %509 = arith.select %507, %508, %505 : vector<32x24xi1>, vector<32x24xf32>
    %510 = tpu.concatenate %502, %495, %509 in 1 : vector<32x24xf32>, vector<32x24xf32>, vector<32x24xf32> -> vector<32x72xf32>
    %c0_105 = arith.constant 0 : index
    %c0_106 = arith.constant 0 : index
    %511 = vector.load %arg19[%c0_105, %c0_106] : memref<72x24xf32, #tpu.memory_space<vmem>>, vector<72x24xf32>
    %cst_107 = arith.constant dense<0.000000e+00> : vector<32x24xf32>
    %512 = tpu.matmul %510, %511, %cst_107 {dimension_numbers = #tpu.dot_dimension_numbers<[1], [0], [0], [1], [0, 0, 1, 1], [], []>, precision = #tpu.contract_precision<fp32>} : vector<32x72xf32>, vector<72x24xf32>, vector<32x24xf32> -> vector<32x24xf32>
    %c0_108 = arith.constant 0 : index
    %c0_109 = arith.constant 0 : index
    %513 = vector.load %arg20[%c0_108, %c0_109] : memref<1x24xf32, #tpu.memory_space<vmem>>, vector<1x24xf32>
    %514 = vector.broadcast %513 : vector<1x24xf32> to vector<32x24xf32>
    %515 = arith.addf %512, %514 : vector<32x24xf32>
    %cst_110 = arith.constant dense<0.000000e+00> : vector<32xf32>
    %516 = vector.multi_reduction <add>, %515, %cst_110 [1] : vector<32x24xf32> to vector<32xf32>
    %517 = vector.shape_cast %516 : vector<32xf32> to vector<32x1xf32>
    %cst_111 = arith.constant 2.400000e+01 : f32
    %518 = vector.broadcast %cst_111 : f32 to vector<32x1xf32>
    %519 = arith.divf %517, %518 : vector<32x1xf32>
    %520 = vector.broadcast %519 : vector<32x1xf32> to vector<32x24xf32>
    %521 = arith.subf %515, %520 : vector<32x24xf32>
    %522 = arith.mulf %521, %521 : vector<32x24xf32>
    %cst_112 = arith.constant dense<0.000000e+00> : vector<32xf32>
    %523 = vector.multi_reduction <add>, %522, %cst_112 [1] : vector<32x24xf32> to vector<32xf32>
    %524 = vector.shape_cast %523 : vector<32xf32> to vector<32x1xf32>
    %cst_113 = arith.constant 2.400000e+01 : f32
    %525 = vector.broadcast %cst_113 : f32 to vector<32x1xf32>
    %526 = arith.divf %524, %525 : vector<32x1xf32>
    %527 = vector.broadcast %519 : vector<32x1xf32> to vector<32x24xf32>
    %528 = arith.subf %515, %527 : vector<32x24xf32>
    %cst_114 = arith.constant 9.99999974E-6 : f32
    %529 = vector.broadcast %cst_114 : f32 to vector<32x1xf32>
    %530 = arith.addf %526, %529 : vector<32x1xf32>
    %531 = math.rsqrt %530 : vector<32x1xf32>
    %532 = vector.broadcast %531 : vector<32x1xf32> to vector<32x24xf32>
    %533 = arith.mulf %528, %532 : vector<32x24xf32>
    %c0_115 = arith.constant 0 : index
    %c0_116 = arith.constant 0 : index
    %534 = vector.load %arg21[%c0_115, %c0_116] : memref<1x24xf32, #tpu.memory_space<vmem>>, vector<1x24xf32>
    %535 = vector.broadcast %534 : vector<1x24xf32> to vector<32x24xf32>
    %536 = arith.mulf %533, %535 : vector<32x24xf32>
    %c0_117 = arith.constant 0 : index
    %c0_118 = arith.constant 0 : index
    %537 = vector.load %arg22[%c0_117, %c0_118] : memref<1x24xf32, #tpu.memory_space<vmem>>, vector<1x24xf32>
    %538 = vector.broadcast %537 : vector<1x24xf32> to vector<32x24xf32>
    %539 = arith.addf %536, %538 : vector<32x24xf32>
    %cst_119 = arith.constant 0.000000e+00 : f32
    %540 = vector.broadcast %cst_119 : f32 to vector<32x24xf32>
    %541 = arith.maximumf %539, %540 : vector<32x24xf32>
    %542 = vector.extract_strided_slice %541 {offsets = [0, 0], sizes = [1, 24], strides = [1, 1]} : vector<32x24xf32> to vector<1x24xf32>
    %543 = vector.extract_strided_slice %541 {offsets = [0, 0], sizes = [31, 24], strides = [1, 1]} : vector<32x24xf32> to vector<31x24xf32>
    %544 = tpu.concatenate %542, %543 in 0 : vector<1x24xf32>, vector<31x24xf32> -> vector<32x24xf32>
    %cst_120 = arith.constant 0.000000e+00 : f32
    %545 = vector.shape_cast %357 : vector<32x1xi1> to vector<32x1xi1>
    %546 = vector.broadcast %545 : vector<32x1xi1> to vector<32x24xi1>
    %547 = vector.broadcast %cst_120 : f32 to vector<32x24xf32>
    %548 = arith.select %546, %547, %544 : vector<32x24xi1>, vector<32x24xf32>
    %549 = vector.extract_strided_slice %541 {offsets = [1, 0], sizes = [31, 24], strides = [1, 1]} : vector<32x24xf32> to vector<31x24xf32>
    %550 = vector.extract_strided_slice %541 {offsets = [31, 0], sizes = [1, 24], strides = [1, 1]} : vector<32x24xf32> to vector<1x24xf32>
    %551 = tpu.concatenate %549, %550 in 0 : vector<31x24xf32>, vector<1x24xf32> -> vector<32x24xf32>
    %cst_121 = arith.constant 0.000000e+00 : f32
    %552 = vector.shape_cast %359 : vector<32x1xi1> to vector<32x1xi1>
    %553 = vector.broadcast %552 : vector<32x1xi1> to vector<32x24xi1>
    %554 = vector.broadcast %cst_121 : f32 to vector<32x24xf32>
    %555 = arith.select %553, %554, %551 : vector<32x24xi1>, vector<32x24xf32>
    %556 = tpu.concatenate %548, %541, %555 in 1 : vector<32x24xf32>, vector<32x24xf32>, vector<32x24xf32> -> vector<32x72xf32>
    %c0_122 = arith.constant 0 : index
    %c0_123 = arith.constant 0 : index
    %557 = vector.load %arg23[%c0_122, %c0_123] : memref<72x24xf32, #tpu.memory_space<vmem>>, vector<72x24xf32>
    %cst_124 = arith.constant dense<0.000000e+00> : vector<32x24xf32>
    %558 = tpu.matmul %556, %557, %cst_124 {dimension_numbers = #tpu.dot_dimension_numbers<[1], [0], [0], [1], [0, 0, 1, 1], [], []>, precision = #tpu.contract_precision<fp32>} : vector<32x72xf32>, vector<72x24xf32>, vector<32x24xf32> -> vector<32x24xf32>
    %c0_125 = arith.constant 0 : index
    %c0_126 = arith.constant 0 : index
    %559 = vector.load %arg24[%c0_125, %c0_126] : memref<1x24xf32, #tpu.memory_space<vmem>>, vector<1x24xf32>
    %560 = vector.broadcast %559 : vector<1x24xf32> to vector<32x24xf32>
    %561 = arith.addf %558, %560 : vector<32x24xf32>
    %cst_127 = arith.constant dense<0.000000e+00> : vector<32xf32>
    %562 = vector.multi_reduction <add>, %561, %cst_127 [1] : vector<32x24xf32> to vector<32xf32>
    %563 = vector.shape_cast %562 : vector<32xf32> to vector<32x1xf32>
    %cst_128 = arith.constant 2.400000e+01 : f32
    %564 = vector.broadcast %cst_128 : f32 to vector<32x1xf32>
    %565 = arith.divf %563, %564 : vector<32x1xf32>
    %566 = vector.broadcast %565 : vector<32x1xf32> to vector<32x24xf32>
    %567 = arith.subf %561, %566 : vector<32x24xf32>
    %568 = arith.mulf %567, %567 : vector<32x24xf32>
    %cst_129 = arith.constant dense<0.000000e+00> : vector<32xf32>
    %569 = vector.multi_reduction <add>, %568, %cst_129 [1] : vector<32x24xf32> to vector<32xf32>
    %570 = vector.shape_cast %569 : vector<32xf32> to vector<32x1xf32>
    %cst_130 = arith.constant 2.400000e+01 : f32
    %571 = vector.broadcast %cst_130 : f32 to vector<32x1xf32>
    %572 = arith.divf %570, %571 : vector<32x1xf32>
    %573 = vector.broadcast %565 : vector<32x1xf32> to vector<32x24xf32>
    %574 = arith.subf %561, %573 : vector<32x24xf32>
    %cst_131 = arith.constant 9.99999974E-6 : f32
    %575 = vector.broadcast %cst_131 : f32 to vector<32x1xf32>
    %576 = arith.addf %572, %575 : vector<32x1xf32>
    %577 = math.rsqrt %576 : vector<32x1xf32>
    %578 = vector.broadcast %577 : vector<32x1xf32> to vector<32x24xf32>
    %579 = arith.mulf %574, %578 : vector<32x24xf32>
    %c0_132 = arith.constant 0 : index
    %c0_133 = arith.constant 0 : index
    %580 = vector.load %arg25[%c0_132, %c0_133] : memref<1x24xf32, #tpu.memory_space<vmem>>, vector<1x24xf32>
    %581 = vector.broadcast %580 : vector<1x24xf32> to vector<32x24xf32>
    %582 = arith.mulf %579, %581 : vector<32x24xf32>
    %c0_134 = arith.constant 0 : index
    %c0_135 = arith.constant 0 : index
    %583 = vector.load %arg26[%c0_134, %c0_135] : memref<1x24xf32, #tpu.memory_space<vmem>>, vector<1x24xf32>
    %584 = vector.broadcast %583 : vector<1x24xf32> to vector<32x24xf32>
    %585 = arith.addf %582, %584 : vector<32x24xf32>
    %cst_136 = arith.constant 0.000000e+00 : f32
    %586 = vector.broadcast %cst_136 : f32 to vector<32x24xf32>
    %587 = arith.maximumf %585, %586 : vector<32x24xf32>
    %588 = tpu.concatenate %338, %473, %587 in 1 : vector<32x16xf32>, vector<32x24xf32>, vector<32x24xf32> -> vector<32x64xf32>
    %c0_137 = arith.constant 0 : index
    %c0_138 = arith.constant 0 : index
    %589 = vector.load %arg27[%c0_137, %c0_138] : memref<64x8xf32, #tpu.memory_space<vmem>>, vector<64x8xf32>
    %cst_139 = arith.constant dense<0.000000e+00> : vector<32x8xf32>
    %590 = tpu.matmul %588, %589, %cst_139 {dimension_numbers = #tpu.dot_dimension_numbers<[1], [0], [0], [1], [0, 0, 1, 1], [], []>, precision = #tpu.contract_precision<fp32>} : vector<32x64xf32>, vector<64x8xf32>, vector<32x8xf32> -> vector<32x8xf32>
    %c0_140 = arith.constant 0 : index
    %c0_141 = arith.constant 0 : index
    %591 = vector.load %arg28[%c0_140, %c0_141] : memref<1x8xf32, #tpu.memory_space<vmem>>, vector<1x8xf32>
    %592 = vector.broadcast %591 : vector<1x8xf32> to vector<32x8xf32>
    %593 = arith.addf %590, %592 : vector<32x8xf32>
    %594 = vector.shape_cast %593 : vector<32x8xf32> to vector<2x16x8xf32>
    %c0_142 = arith.constant 0 : index
    %c0_143 = arith.constant 0 : index
    %c0_144 = arith.constant 0 : index
    %595 = vector.load %arg29[%c0_142, %c0_143, %c0_144] : memref<2x16x8xf32, #tpu.memory_space<vmem>>, vector<2x16x8xf32>
    tpu.vector_store %arg29[%c0_142, %c0_143, %c0_144], %594 {strides = array<i32>} : memref<2x16x8xf32, #tpu.memory_space<vmem>>, vector<2x16x8xf32>,
    return
  }
}

</mosaic_0001>

<bundles_post_ra>
// kernel: model_forward.1
= control target key start
LH: loop header
LB: loop body
LE: loop exit
PB: predicated region body
PF: predicated region fallthrough
CT: control target
= control target key end

     0   :  { %s18901_s3 = smov 2   ;;  %s18902_s7 = smov 1   ;;  %v18904_v0 = vmov 0.0|0.0   ;;  %vm18908_vm0 = vmmov 0   ;;  %v18909_v2 = vmov 0.0   ;;  %vm186_vm1 = vcmask 64512   ;;  %s21552_s0 = inlined_call_operand.smem [shape: u32[30], index: -1, kind: input, shape index: {}] }
   0x1   :  { %s18948_s6 = sld [smem:[%s21552_s0 + %s18901_s3]]   ;;  %s18903_s11 = smov 3   ;;  %17402 = vmatprep.subr.bf16.mxu1 %v18904_v0  ;;  %15886 = vmatprep.mubr.msk.f32.mxu1 %vm18908_vm0, %v18909_v2  ;;  %vm196_vm2 = vcmask 162816   ;;  %vm191_vm3 = vcmask 97280   ;;  %vm211_vm4 = vcmask 195584   ;;  %vm1347_vm5 = vcmask 1041409  }
   0x2   :  { %s18953_s10 = sld [smem:[%s21552_s0 + %s18902_s7]]   ;;  %s18905_s15 = smov 5   ;;  %vm827_vm6 = vcmask 130048   ;;  %vm9273_vm7 = vcmask 1040384   ;;  %vm9276_vm8 = vcmask 1041408   ;;  %vm9279_vm9 = vcmask 1042432  }
   0x3   :  { %s18958_s14 = sld [smem:[%s21552_s0 + %s18903_s11]]   ;;  %s18906_s19 = smov 4   ;;  %vm9282_vm10 = vcmask 1043456   ;;  %vm9285_vm11 = vcmask 1044480   ;;  %vm9288_vm12 = vcmask 1045504   ;;  %vm9291_vm13 = vcmask 1046528  }
   0x4   :  { %s14944_s18 = sld [smem:[%s21552_s0 + %s18905_s15]]   ;;  %s18907_s23 = smov 12  }
   0x5   :  { %s14943_s22 = sld [smem:[%s21552_s0 + %s18906_s19]]   ;;  %s18910_s24 = smov 8  }
   0x6   :  { %s18911_s25 = smov 20   ;;  %s19049_s28 = sld [smem:[%s21552_s0]]  }
   0x7   :  { %v130_v1 = vld [vmem:[%s18948_s6] sm:$0xff]  ;;  %v131_v4 = vld [vmem:[%s18948_s6 + $0x8] sm:$0xff]  ;;  %v133_v31 = vld [vmem:[%s18948_s6 + $0x18] sm:$0xff]  ;;  %s18912_s29 = smov 6   ;;  %s18913_s3 = smov 96  }
   0x8   :  { %158 = vrot.lane.b32.xlu1 %v130_v1, %s18907_s23  ;;  %v126_v3 = vld [vmem:[%s18953_s10] sm:$0xff]  ;;  %v127_v5 = vld [vmem:[%s18953_s10 + $0x8] sm:$0xff]  ;;  %v129_v19 = vld [vmem:[%s18953_s10 + $0x18] sm:$0xff]  ;;  %s14945_s2 = sld [smem:[%s21552_s0 + %s18912_s29]]   ;;  %s18914_s4 = smov 16  }
   0x9   :  { %142 = vrot.lane.b32.xlu0 %v126_v3, %s18910_s24  ;;  %v135_v8 = vld [vmem:[%s18958_s14 + $0x8] sm:$0xff]  ;;  %v134_v15 = vld [vmem:[%s18958_s14] sm:$0xff]  ;;  %v128_v26 = vld [vmem:[%s18953_s10 + $0x10] sm:$0xff]  ;;  %s18915_s5 = smov 32   ;;  %s18916_s7 = smov 80  }
   0xa   :  { %v825_v6 = vld [vmem:[%s14944_s18] sm:$0xff]  ;;  %v826_v7 = vld [vmem:[%s14944_s18 + $0x8] sm:$0xff]  ;;  %v132_v36 = vld [vmem:[%s18948_s6 + $0x10] sm:$0xff]  ;;  %s18917_s8 = smov 120   ;;  %s18918_s9 = smov 7  }
   0xb   :  { %v832_v9 = vand.u32 4294901760, %v825_v6  ;;  %v835_v10 = vand.u32 4294901760, %v826_v7  ;;  %v201_v11 = vld [vmem:[%s14943_s22] sm:$0xff]  ;;  %v202_v12 = vld [vmem:[%s14943_s22 + $0x8] sm:$0xff]  ;;  %v18978_v14 = vld [vmem:[%s14943_s22 + $0x10] sm:$0xff]  ;;  %s14946_s12 = sld [smem:[%s21552_s0 + %s18918_s9]]   ;;  %s18919_s13 = smov 124  }
   0xc   :  { %160 = vrot.lane.b32.xlu1 %v131_v4, %s18907_s23  ;;  %v225_v13 = vand.u32 4294901760, %v201_v11  ;;  %v228_v18 = vand.u32 4294901760, %v202_v12  ;;  %v18986_v23 = vand.u32 4294901760, %v18978_v14  ;;  %v137_v40 = vld [vmem:[%s18958_s14 + $0x18] sm:$0xff]  ;;  %v136_v42 = vld [vmem:[%s18958_s14 + $0x10] sm:$0xff]  ;;  %v122_v50 = vld [vmem:[%s19049_s28] sm:$0xff]  ;;  %s14947_s20 = sld [smem:[%s21552_s0 + %s18910_s24]]  }
   0xd   :  { %144 = vrot.lane.b32.xlu0 %v127_v5, %s18910_s24  ;;  %v910_v16 = vsub.f32 %v825_v6, %v832_v9  ;;  %v917_v17 = vsub.f32 %v826_v7, %v835_v10  ;;  %v19018_v44 = vpack.c.bf16 %v835_v10, %v832_v9  ;;  %v123_v52 = vld [vmem:[%s19049_s28 + $0x8] sm:$0xff]  ;;  %s18920_s14 = smov 9   ;;  %s18921_s21 = smov 24  }
   0xe   :  { %v18983_v22 = vpack.c.bf16 %v228_v18, %v225_v13  ;;  %v334_v24 = vsub.f32 %v201_v11, %v225_v13  ;;  %v341_v25 = vsub.f32 %v202_v12, %v228_v18  ;;  %v348_v62 = vsub.f32 %v18978_v14, %v18986_v23  ;;  %v125_v11 = vld [vmem:[%s19049_s28 + $0x18] sm:$0xff]  ;;  %s20007_s17 = sld [smem:[%s21552_s0 + %s18920_s14]]   ;;  %s18922_s22 = smov 48  }
   0xf   :  { %v911_v20 = vand.u32 4294901760, %v910_v16  ;;  %v918_v21 = vand.u32 4294901760, %v917_v17  ;;  %v19003_v41 = vpack.c.bf16 %v917_v17, %v910_v16  ;;  %s18924_s29 = smov 13   ;;  %s18925_s9 = smov 11  }
  0x10   :  { %176 = vrot.lane.b32.xlu1 %v135_v8, %s18911_s25  ;;  %17376 = vmatprep.subr.bf16.mxu0 %v18983_v22  ;;  %v335_v29 = vand.u32 4294901760, %v334_v24  ;;  %v342_v30 = vand.u32 4294901760, %v341_v25  ;;  %v19020_v45 = vpack.c.bf16 %v341_v25, %v334_v24  ;;  %v19068_v8 = vand.u32 4294901760, %v348_v62  ;;  %s14951_s16 = sld [smem:[%s21552_s0 + %s18907_s23]]   ;;  %s18935_s10 = smov 25  }
  0x11   :  { %174 = vrot.lane.b32.xlu0 %v134_v15, %s18911_s25  ;;  %v912_v27 = vsub.f32 %v910_v16, %v911_v20  ;;  %v919_v28 = vsub.f32 %v917_v17, %v918_v21  ;;  %17378 = vmatpush3.bf16.msra.mxu0 %v18983_v22  ;;  %v19027_v46 = vpack.c.bf16 %v918_v21, %v911_v20  ;;  %v124_v15 = vld [vmem:[%s19049_s28 + $0x10] sm:$0xff]  ;;  %s14959_s11 = sld [smem:[%s21552_s0 + %s18911_s25]]   ;;  %s18936_s14 = smov 26  }
  0x12   :  { %15807 = vmatprep.subr.mxu0 %v18986_v23  ;;  %v336_v34 = vsub.f32 %v334_v24, %v335_v29  ;;  %v343_v35 = vsub.f32 %v341_v25, %v342_v30  ;;  %v19034_v47 = vpack.c.bf16 %v342_v30, %v335_v29  ;;  %v350_v17 = vsub.f32 %v348_v62, %v19068_v8  ;;  %s14955_s30 = sld [smem:[%s21552_s0 + %s18914_s4]]  }
  0x13   :  { %v913_v32 = vand.u32 4294901760, %v912_v27  ;;  %v920_v33 = vand.u32 4294901760, %v919_v28 }
  0x14   :  { %148 = vrot.lane.b32.xlu1 %v129_v19, %s18910_s24  ;;  %v337_v38 = vand.u32 4294901760, %v336_v34  ;;  %v344_v39 = vand.u32 4294901760, %v343_v35 }
  0x15   :  { %146 = vrot.lane.b32.xlu0 %v128_v26, %s18910_s24  ;;  %v18997_v37 = vpack.c.bf16 %v920_v33, %v913_v32  ;;  %15808 = vmatpush3.msra.mxu0 %v18986_v23  ;;  %s18923_s24 = smov 10  }
  0x16   :  { %v19008_v43 = vpack.c.bf16 %v344_v39, %v337_v38 }
  0x17   :  { %17404 = vmatpush3.bf16.msra.mxu1 %v18997_v37 }
  0x18   :  { %164 = vrot.lane.b32.xlu1 %v133_v31, %s18907_s23  ;;  %17405 = vmatprep.subr.bf16.mxu1 %v18904_v0  ;;  %v351_v31 = vand.u32 4294901760, %v350_v17 }
  0x19   :  { %162 = vrot.lane.b32.xlu0 %v132_v36, %s18907_s23  ;;  %17380 = vmatprep.subr.bf16.mxu0 %v19008_v43  ;;  %s18937_s23 = smov 40  }
  0x1a   :  { %15887 = vmatmul.mubr.f32.vlgmr.msra.gmra.mrb[0].mxu1 %v18909_v2 }
  0x1b   :  { %17407 = vmatpush3.bf16.msra.mxu1 %v19003_v41  ;;  %15893 = vmatprep.mubr.msk.f32.mxu1 %vm18908_vm0, %v18909_v2 }
  0x1c   :  { %180 = vrot.lane.b32.xlu1 %v137_v40, %s18911_s25  ;;  %17408 = vmatprep.subr.bf16.mxu1 %v18904_v0 }
  0x1d   :  { %178 = vrot.lane.b32.xlu0 %v136_v42, %s18911_s25  ;;  %s18930_s25 = smov 23  }
  0x1e   :  { %s20968_s15 = sld [smem:[%s21552_s0 + %s18930_s25]]  }
  0x22   :  { %15894 = vmatmul.mubr.f32.vlgmr.msra.gmra.mrb[0].mxu1 %v18909_v2 }
  0x23   :  { %17410 = vmatpush3.bf16.msra.mxu1 %v19018_v44  ;;  %15900 = vmatprep.mubr.msk.f32.mxu1 %vm18908_vm0, %v18909_v2 }
  0x24   :  { %17411 = vmatprep.subr.bf16.mxu1 %v18904_v0 }
  0x2a   :  { %15901 = vmatmul.mubr.f32.vlgmr.msra.gmra.mrb[0].mxu1 %v18909_v2 }
  0x2b   :  { %17413 = vmatpush3.bf16.msra.mxu1 %v19027_v46  ;;  %15907 = vmatprep.mubr.msk.f32.mxu1 %vm18908_vm0, %v18909_v2 }
  0x2c   :  { %17414 = vmatprep.subr.bf16.mxu1 %v18904_v0 }
  0x32   :  { %15908 = vmatmul.mubr.f32.vlgmr.msra.gmra.mrb[0].mxu1 %v18909_v2 }
  0x33   :  { %17416 = vmatpush3.bf16.msra.mxu1 %v19018_v44  ;;  %15914 = vmatprep.mubr.msk.f32.mxu1 %vm18908_vm0, %v18909_v2 }
  0x34   :  { %17417 = vmatprep.subr.bf16.mxu1 %v18904_v0 }
  0x3a   :  { %15915 = vmatmul.mubr.f32.vlgmr.msra.gmra.mrb[0].mxu1 %v18909_v2 }
  0x3b   :  { %17419 = vmatpush3.bf16.msra.mxu1 %v19018_v44  ;;  %15921 = vmatprep.mubr.msk.f32.mxu1 %vm18908_vm0, %v18909_v2 }
  0x3c   :  { %17420 = vmatprep.subr.bf16.mxu1 %v18904_v0 }
  0x7a   :  { %v159_v48 = vpop.permute.xlu1 %158 }
  0x7b   :  { %v143_v49 = vpop.permute.xlu0 %142 }
  0x7c   :  { %v187_v54 = vsel %vm186_vm1, %v122_v50, %v143_v49 }
  0x7d   :  { %v192_v61 = vsel %vm191_vm3, %v187_v54, %v159_v48 }
  0x7e   :  { %v161_v51 = vpop.permute.xlu1 %160 }
  0x7f   :  { %v145_v53 = vpop.permute.xlu0 %144 }
  0x80   :  { %v188_v55 = vsel %vm186_vm1, %v123_v52, %v145_v53 }
  0x81   :  { %v193_v57 = vsel %vm191_vm3, %v188_v55, %v161_v51 }
  0x82   :  { %v177_v56 = vpop.permute.xlu1 %176 }
  0x83   :  { %v198_v58 = vsel %vm196_vm2, %v193_v57, %v177_v56  ;;  %v175_v60 = vpop.permute.xlu0 %174 }
  0x84   :  { %v216_v59 = vsel %vm211_vm4, %v198_v58, 0  ;;  %v197_v1 = vsel %vm196_vm2, %v192_v61, %v175_v60 }
  0x85   :  { %v19061_v63 = vand.u32 4294901760, %v216_v59  ;;  %v213_v3 = vsel %vm211_vm4, %v197_v1, 0 }
  0x86   :  { %v149_v4 = vpop.permute.xlu1 %148  ;;  %v19066_v6 = vand.u32 4294901760, %v213_v3 }
  0x87   :  { %v303_v5 = vsub.f32 %v216_v59, %v19061_v63  ;;  %v147_v7 = vpop.permute.xlu0 %146  ;;  %v190_v18 = vsel %vm186_vm1, %v125_v11, %v149_v4 }
  0x88   :  { %v293_v9 = vsub.f32 %v213_v3, %v19066_v6  ;;  %v189_v25 = vsel %vm186_vm1, %v124_v15, %v147_v7 }
  0x89   :  { %v304_v10 = vand.u32 4294901760, %v303_v5 }
  0x8a   :  { %v165_v12 = vpop.permute.xlu1 %164  ;;  %v294_v13 = vand.u32 4294901760, %v293_v9 }
  0x8b   :  { %v305_v14 = vsub.f32 %v303_v5, %v304_v10  ;;  %v163_v16 = vpop.permute.xlu0 %162  ;;  %v195_v20 = vsel %vm191_vm3, %v190_v18, %v165_v12 }
  0x8c   :  { %v295_v19 = vsub.f32 %v293_v9, %v294_v13  ;;  %v194_v28 = vsel %vm191_vm3, %v189_v25, %v163_v16 }
  0x8d   :  { %v306_v24 = vand.u32 4294901760, %v305_v14 }
  0x8e   :  { %v181_v21 = vpop.permute.xlu1 %180  ;;  %v296_v27 = vand.u32 4294901760, %v295_v19 }
  0x8f   :  { %v200_v26 = vsel %vm196_vm2, %v195_v20, %v181_v21  ;;  %v179_v30 = vpop.permute.xlu0 %178 }
  0x90   :  { %v222_v29 = vsel %vm211_vm4, %v200_v26, 0  ;;  %v199_v33 = vsel %vm196_vm2, %v194_v28, %v179_v30  ;;  %15809 = vmatprep.mubr.f32.mxu0 %v296_v27  ;;  %vm9449_vm2 = vcmask 31744  }
  0x91   :  { %v322_v32 = vand.u32 4294901760, %v222_v29  ;;  %v219_v34 = vsel %vm211_vm4, %v199_v33, 0  ;;  %15810 = vmatmul.mubr.f32.vlgmr.msra.gmra.mrb[0].mxu0 %v306_v24 }
  0x92   :  { %v312_v36 = vand.u32 4294901760, %v219_v34  ;;  %17382 = vmatpush3.bf16.msra.mxu0 %v19008_v43  ;;  %v14969_v43 = vld [vmem:[%s14945_s2] ss:$0 sm:$0xff]  ;;  %s20288_s2 = sld [smem:[%s21552_s0 + %s18924_s29]]   ;;  %s18929_s29 = smov 18  }
  0x93   :  { %v323_v35 = vsub.f32 %v222_v29, %v322_v32  ;;  %15819 = vmatprep.subr.mxu0 %v351_v31 }
  0x94   :  { %v313_v38 = vsub.f32 %v219_v34, %v312_v36 }
  0x95   :  { %v324_v39 = vand.u32 4294901760, %v323_v35 }
  0x96   :  { %v314_v40 = vand.u32 4294901760, %v313_v38  ;;  %15820 = vmatpush3.msra.mxu0 %v351_v31 }
  0x97   :  { %v325_v42 = vsub.f32 %v323_v35, %v324_v39  ;;  %17384 = vmatprep.subr.bf16.mxu0 %v19020_v45 }
  0x98   :  { %v315_v48 = vsub.f32 %v313_v38, %v314_v40 }
  0x99   :  { %v326_v49 = vand.u32 4294901760, %v325_v42 }
  0x9a   :  { %v316_v50 = vand.u32 4294901760, %v315_v48 }
  0x9c   :  { %15812 = vmatprep.mubr.f32.mxu0 %v316_v50 }
  0x9d   :  { %15813 = vmatmul.mubr.f32.gmra.mrb[2].mxu0 %v326_v49 }
  0x9e   :  { %15821 = vmatprep.mubr.f32.mxu0 %v19066_v6 }
  0xa1   :  { %15822 = vmatmul.mubr.f32.vlgmr.msra.gmra.mrb[0].mxu0 %v19061_v63 }
  0xa2   :  { %15824 = vmatprep.mubr.f32.mxu0 %v312_v36  ;;  %17386 = vmatpush3.bf16.msra.mxu0 %v19020_v45 }
  0xa3   :  { %15831 = vmatprep.subr.mxu0 %v348_v62 }
  0xa5   :  { %15825 = vmatmul.mubr.f32.gmra.mrb[2].mxu0 %v322_v32 }
  0xa6   :  { %15832 = vmatpush3.msra.mxu0 %v348_v62  ;;  %15833 = vmatprep.mubr.f32.mxu0 %v293_v9 }
  0xa7   :  { %17388 = vmatprep.subr.bf16.mxu0 %v18983_v22 }
  0xa9   :  { %15834 = vmatmul.mubr.f32.vlgmr.msra.gmra.mrb[0].mxu0 %v303_v5 }
  0xaa   :  { %15836 = vmatprep.mubr.f32.mxu0 %v313_v38  ;;  %17390 = vmatpush3.bf16.msra.mxu0 %v18983_v22 }
  0xab   :  { %15843 = vmatprep.subr.mxu0 %v18986_v23 }
  0xad   :  { %15837 = vmatmul.mubr.f32.gmra.mrb[2].mxu0 %v323_v35 }
  0xae   :  { %15844 = vmatpush3.msra.mxu0 %v18986_v23  ;;  %15845 = vmatprep.mubr.f32.mxu0 %v294_v13 }
  0xaf   :  { %17392 = vmatprep.subr.bf16.mxu0 %v19034_v47 }
  0xb1   :  { %15846 = vmatmul.mubr.f32.vlgmr.msra.gmra.mrb[0].mxu0 %v304_v10 }
  0xb2   :  { %15848 = vmatprep.mubr.f32.mxu0 %v314_v40  ;;  %17394 = vmatpush3.bf16.msra.mxu0 %v19034_v47 }
  0xb3   :  { %15855 = vmatprep.subr.mxu0 %v19068_v8 }
  0xb5   :  { %15849 = vmatmul.mubr.f32.gmra.mrb[2].mxu0 %v324_v39 }
  0xb6   :  { %15856 = vmatpush3.msra.mxu0 %v19068_v8  ;;  %15857 = vmatprep.mubr.f32.mxu0 %v19066_v6 }
  0xb7   :  { %17396 = vmatprep.subr.bf16.mxu0 %v18983_v22 }
  0xb9   :  { %15858 = vmatmul.mubr.f32.vlgmr.msra.gmra.mrb[0].mxu0 %v19061_v63 }
  0xba   :  { %15860 = vmatprep.mubr.f32.mxu0 %v312_v36  ;;  %17398 = vmatpush3.bf16.msra.mxu0 %v18983_v22 }
  0xbb   :  { %15867 = vmatprep.subr.mxu0 %v18986_v23 }
  0xbd   :  { %15861 = vmatmul.mubr.f32.gmra.mrb[2].mxu0 %v322_v32 }
  0xbe   :  { %15868 = vmatpush3.msra.mxu0 %v18986_v23  ;;  %15869 = vmatprep.mubr.f32.mxu0 %v19066_v6 }
  0xbf   :  { %17399 = vmatprep.subr.bf16.mxu0 %v18904_v0 }
  0xc1   :  { %15870 = vmatmul.mubr.f32.vlgmr.msra.gmra.mrb[0].mxu0 %v19061_v63 }
  0xc2   :  { %15872 = vmatprep.mubr.f32.mxu0 %v312_v36  ;;  %17401 = vmatpush3.bf16.msra.mxu0 %v19018_v44 }
  0xc3   :  { %17453 = vmatprep.subr.bf16.mxu0 %v18904_v0 }
  0xc5   :  { %15873 = vmatmul.mubr.f32.gmra.mrb[2].mxu0 %v322_v32 }
  0xc6   :  { %15879 = vmatprep.mubr.msk.f32.mxu0 %vm18908_vm0, %v18909_v2 }
  0xc9   :  { %15880 = vmatmul.mubr.f32.vlgmr.msra.gmra.mrb[4].mxu0 %v18909_v2 }
  0xca   :  { %17455 = vmatpush3.bf16.msra.mxu0 %v19018_v44  ;;  %16005 = vmatprep.mubr.msk.f32.mxu0 %vm18908_vm0, %v18909_v2 }
  0xcb   :  { %17456 = vmatprep.subr.bf16.mxu0 %v18904_v0 }
 0x10d   :  { %v1286_v22 = vpop.f32.mrb[0].mxu1 }
 0x10e   :  { %v15916_v23 = vpop.f32.mrb[1].mxu1 }
 0x194   :  { %v15871_v45 = vpop.f32.mrb[0].mxu0 }
 0x195   :  { %v19116_v47 = vadd.f32 %v15871_v45, %v14969_v43  ;;  %v803_v51 = vpop.f32.mrb[1].mxu0 }
 0x196   :  { %v19120_v56 = vadd.f32 %v14969_v43, %v803_v51 }
 0x198   :  { %v15874_v52 = vpop.f32.mrb[2].mxu0 }
 0x199   :  { %v19118_v53 = vadd.f32 %v15874_v52, %v14969_v43  ;;  %v815_v54 = vpop.f32.mrb[3].mxu0 }
 0x19a   :  { %v19122_v59 = vadd.f32 %v14969_v43, %v815_v54 }
 0x19c   :  { %v904_v55 = vpop.f32.mrb[4].mxu0 }
 0x19d   :  { %v18219_v57 = vadd.f32 %v1286_v22, %v904_v55  ;;  %v15881_v58 = vpop.f32.mrb[5].mxu0 }
 0x19f   :  { %v1291_v60 = vrot.slane %v18219_v57, 1  ;;  %v1294_v61 = vadd.f32 %v18219_v57, %v19120_v56 }
 0x1a1   :  { %v1295_v62 = vadd.f32 %v19122_v59, %v1291_v60  ;;  %18605 = vtanh.f32 %v1294_v61  ;;  %v14970_v3 = vmul.f32 -1.442695, %v1294_v61 }
 0x1a3   :  { %18607 = vtanh.f32 %v1295_v62  ;;  %v14971_v4 = vmul.f32 -1.442695, %v1295_v62 }
 0x1a4   :  { %18609 = vpow2.f32 %v14970_v3 }
 0x1a5   :  { %18611 = vpow2.f32 %v14971_v4 }
 0x1ab   :  { %v18606_v63 = vpop.eup %18605 }
 0x1ac   :  { %1314 = vrot.lane.b32.xlu1 %v18606_v63, %s18913_s3 }
 0x1ad   :  { %v18608_v1 = vpop.eup %18607 }
 0x1ae   :  { %1316 = vrot.lane.b32.xlu0 %v18608_v1, %s18913_s3  ;;  %v18610_v5 = vpop.eup %18609 }
 0x1af   :  { %v18612_v6 = vpop.eup %18611  ;;  %v1302_v7 = vadd.f32 1.0, %v18610_v5 }
 0x1b0   :  { %v1303_v8 = vadd.f32 1.0, %v18612_v6 }
 0x1b1   :  { %18613 = vrcp.f32 %v1302_v7 }
 0x1b2   :  { %18615 = vrcp.f32 %v1303_v8 }
 0x1bb   :  { %v18614_v9 = vpop.eup %18613 }
 0x1bc   :  { %v18616_v12 = vpop.eup %18615  ;;  %v1310_v15 = vmul.f32 0.0, %v18614_v9 }
 0x1bd   :  { %v1311_v18 = vmul.f32 0.0, %v18616_v12 }
 0x21e   :  { %v1315_v10 = vpop.permute.xlu1 %1314 }
 0x21f   :  { %v1320_v11 = vmul.f32 %v18614_v9, %v1315_v10 }
 0x220   :  { %v1317_v13 = vpop.permute.xlu0 %1316 }
 0x221   :  { %1324 = vrot.lane.b32.xlu1 %v1320_v11, %s18914_s4  ;;  %v1321_v14 = vmul.f32 %v18616_v12, %v1317_v13 }
 0x223   :  { %1326 = vrot.lane.b32.xlu0 %v1321_v14, %s18914_s4 }
 0x293   :  { %v1325_v16 = vpop.permute.xlu1 %1324 }
 0x294   :  { %v19130_v17 = vadd.f32 %v1325_v16, %v1310_v15 }
 0x295   :  { %v1327_v19 = vpop.permute.xlu0 %1326 }
 0x296   :  { %18617 = vtanh.f32 %v19130_v17  ;;  %v19133_v20 = vadd.f32 %v1327_v19, %v1311_v18  ;;  %v1834_v3 = vrot.slane %v19130_v17, 7 }
 0x298   :  { %18619 = vtanh.f32 %v19133_v20  ;;  %v1835_v63 = vrot.slane %v19133_v20, 7 }
 0x2a0   :  { %v18618_v21 = vpop.eup %18617 }
 0x2a1   :  { %1336 = vrot.lane.b32.xlu1 %v18618_v21, %s18915_s5 }
 0x2a2   :  { %v18620_v24 = vpop.eup %18619 }
 0x2a3   :  { %1338 = vrot.lane.b32.xlu0 %v18620_v24, %s18915_s5 }
 0x313   :  { %v1337_v25 = vpop.permute.xlu1 %1336 }
 0x314   :  { %v19140_v28 = vmul.f32 %v18614_v9, %v1337_v25 }
 0x315   :  { %v1339_v26 = vpop.permute.xlu0 %1338 }
 0x316   :  { %v19138_v27 = vmul.f32 %v18616_v12, %v1339_v26 }
 0x318   :  { %v1346_v29 = vrot.slane %v19138_v27, 7 }
 0x31a   :  { %v1348_v30 = vsel %vm1347_vm5, %v1346_v29, %v19140_v28 }
 0x31b   :  { %1349 = vrot.lane.b32.xlu0 %v1348_v30, %s18916_s7 }
 0x38d   :  { %v1350_v31 = vpop.permute.xlu0 %1349 }
 0x38e   :  { %v1351_v32 = vsel %vm827_vm6, %v1350_v31, 0 }
 0x38f   :  { %v1420_v33 = vand.u32 4294901760, %v1351_v32 }
 0x391   :  { %v1421_v34 = vsub.f32 %v1351_v32, %v1420_v33 }
 0x393   :  { %v1422_v35 = vand.u32 4294901760, %v1421_v34 }
 0x395   :  { %v1423_v36 = vsub.f32 %v1421_v34, %v1422_v35 }
 0x397   :  { %v1424_v38 = vand.u32 4294901760, %v1423_v36 }
 0x399   :  { %15922 = vmatmul.mubr.f32.vlgmr.msra.gmra.mrb[2].mxu1 %v1424_v38 }
 0x39a   :  { %17422 = vmatpush3.bf16.msra.mxu1 %v18997_v37  ;;  %15928 = vmatprep.mubr.msk.f32.mxu1 %vm18908_vm0, %v18909_v2 }
 0x39b   :  { %17423 = vmatprep.subr.bf16.mxu1 %v18904_v0 }
 0x3a1   :  { %15929 = vmatmul.mubr.f32.vlgmr.msra.gmra.mrb[2].mxu1 %v1420_v33 }
 0x3a2   :  { %17425 = vmatpush3.bf16.msra.mxu1 %v19003_v41  ;;  %15935 = vmatprep.mubr.msk.f32.mxu1 %vm18908_vm0, %v18909_v2 }
 0x3a3   :  { %17426 = vmatprep.subr.bf16.mxu1 %v18904_v0 }
 0x3a9   :  { %15936 = vmatmul.mubr.f32.vlgmr.msra.gmra.mrb[2].mxu1 %v1421_v34 }
 0x3aa   :  { %17428 = vmatpush3.bf16.msra.mxu1 %v19018_v44  ;;  %15942 = vmatprep.mubr.msk.f32.mxu1 %vm18908_vm0, %v18909_v2 }
 0x3ab   :  { %17429 = vmatprep.subr.bf16.mxu1 %v18904_v0 }
 0x3b1   :  { %15943 = vmatmul.mubr.f32.vlgmr.msra.gmra.mrb[2].mxu1 %v1422_v35 }
 0x3b2   :  { %17431 = vmatpush3.bf16.msra.mxu1 %v19027_v46  ;;  %15949 = vmatprep.mubr.msk.f32.mxu1 %vm18908_vm0, %v18909_v2 }
 0x3b3   :  { %17432 = vmatprep.subr.bf16.mxu1 %v18904_v0 }
 0x3b9   :  { %15950 = vmatmul.mubr.f32.vlgmr.msra.gmra.mrb[2].mxu1 %v1420_v33 }
 0x3ba   :  { %17434 = vmatpush3.bf16.msra.mxu1 %v19018_v44  ;;  %15956 = vmatprep.mubr.msk.f32.mxu1 %vm18908_vm0, %v18909_v2 }
 0x3bb   :  { %17435 = vmatprep.subr.bf16.mxu1 %v18904_v0 }
 0x3c1   :  { %15957 = vmatmul.mubr.f32.vlgmr.msra.gmra.mrb[2].mxu1 %v1420_v33 }
 0x3c2   :  { %17437 = vmatpush3.bf16.msra.mxu1 %v19018_v44  ;;  %15963 = vmatprep.mubr.msk.f32.mxu1 %vm18908_vm0, %v18909_v2 }
 0x3c3   :  { %17438 = vmatprep.subr.bf16.mxu1 %v18904_v0 }
 0x494   :  { %v1808_v39 = vpop.f32.mrb[2].mxu1 }
 0x495   :  { %v1813_v40 = vrot.slane %v1808_v39, 7  ;;  %v1817_v42 = vadd.f32 %v19122_v59, %v1808_v39  ;;  %v15958_v48 = vpop.f32.mrb[3].mxu1 }
 0x497   :  { %v1816_v49 = vadd.f32 %v19120_v56, %v1813_v40  ;;  %18621 = vtanh.f32 %v1817_v42  ;;  %v14973_v23 = vmul.f32 -1.442695, %v1817_v42 }
 0x499   :  { %18623 = vtanh.f32 %v1816_v49  ;;  %v14972_v43 = vmul.f32 -1.442695, %v1816_v49 }
 0x49a   :  { %18625 = vpow2.f32 %v14973_v23 }
 0x49b   :  { %18627 = vpow2.f32 %v14972_v43 }
 0x4a1   :  { %v18622_v50 = vpop.eup %18621 }
 0x4a2   :  { %1844 = vrot.lane.b32.xlu0 %v18622_v50, %s18913_s3 }
 0x4a3   :  { %v18624_v22 = vpop.eup %18623 }
 0x4a4   :  { %1842 = vrot.lane.b32.xlu1 %v18624_v22, %s18913_s3  ;;  %v18626_v45 = vpop.eup %18625 }
 0x4a5   :  { %v18628_v51 = vpop.eup %18627  ;;  %v1825_v52 = vadd.f32 1.0, %v18626_v45 }
 0x4a6   :  { %v1824_v54 = vadd.f32 1.0, %v18628_v51 }
 0x4a7   :  { %18629 = vrcp.f32 %v1825_v52 }
 0x4a8   :  { %18631 = vrcp.f32 %v1824_v54 }
 0x4b1   :  { %v18630_v55 = vpop.eup %18629 }
 0x4b2   :  { %v18632_v60 = vpop.eup %18631  ;;  %v1839_v1 = vmul.f32 %v18630_v55, %v1835_v63 }
 0x4b3   :  { %v1838_v6 = vmul.f32 %v18632_v60, %v1834_v3 }
 0x514   :  { %v1845_v57 = vpop.permute.xlu0 %1844 }
 0x515   :  { %v1849_v58 = vmul.f32 %v18630_v55, %v1845_v57 }
 0x516   :  { %v1843_v61 = vpop.permute.xlu1 %1842 }
 0x517   :  { %1854 = vrot.lane.b32.xlu0 %v1849_v58, %s18914_s4  ;;  %v1848_v62 = vmul.f32 %v18632_v60, %v1843_v61 }
 0x519   :  { %1852 = vrot.lane.b32.xlu1 %v1848_v62, %s18914_s4 }
 0x589   :  { %v1855_v4 = vpop.permute.xlu0 %1854 }
 0x58a   :  { %v19179_v5 = vadd.f32 %v1855_v4, %v1839_v1 }
 0x58b   :  { %v1853_v7 = vpop.permute.xlu1 %1852 }
 0x58c   :  { %18633 = vtanh.f32 %v19179_v5  ;;  %v19182_v8 = vadd.f32 %v1853_v7, %v1838_v6  ;;  %v2363_v52 = vrot.slane %v19179_v5, 7 }
 0x58e   :  { %18635 = vtanh.f32 %v19182_v8  ;;  %v2362_v51 = vrot.slane %v19182_v8, 7 }
 0x596   :  { %v18634_v9 = vpop.eup %18633 }
 0x597   :  { %1866 = vrot.lane.b32.xlu0 %v18634_v9, %s18915_s5 }
 0x598   :  { %v18636_v10 = vpop.eup %18635 }
 0x599   :  { %1864 = vrot.lane.b32.xlu1 %v18636_v10, %s18915_s5 }
 0x609   :  { %v1867_v11 = vpop.permute.xlu0 %1866 }
 0x60a   :  { %v19189_v14 = vmul.f32 %v18630_v55, %v1867_v11 }
 0x60b   :  { %v1865_v12 = vpop.permute.xlu1 %1864 }
 0x60c   :  { %v19187_v13 = vmul.f32 %v18632_v60, %v1865_v12  ;;  %v9275_v7 = vsel %vm9273_vm7, %v19138_v27, %v19189_v14 }
 0x60e   :  { %v1874_v15 = vrot.slane %v19187_v13, 1  ;;  %v9274_v5 = vsel %vm9273_vm7, %v19140_v28, %v19187_v13 }
 0x610   :  { %v1875_v16 = vsel %vm1347_vm5, %v19189_v14, %v1874_v15 }
 0x611   :  { %1876 = vrot.lane.b32.xlu1 %v1875_v16, %s18916_s7 }
 0x683   :  { %v1877_v17 = vpop.permute.xlu1 %1876 }
 0x684   :  { %v1878_v18 = vsel %vm827_vm6, %v1877_v17, 0 }
 0x685   :  { %v1947_v19 = vand.u32 4294901760, %v1878_v18 }
 0x687   :  { %v1948_v20 = vsub.f32 %v1878_v18, %v1947_v19 }
 0x689   :  { %v1949_v21 = vand.u32 4294901760, %v1948_v20 }
 0x68b   :  { %v1950_v24 = vsub.f32 %v1948_v20, %v1949_v21 }
 0x68d   :  { %v1951_v25 = vand.u32 4294901760, %v1950_v24 }
 0x68f   :  { %15964 = vmatmul.mubr.f32.vlgmr.msra.gmra.mrb[4].mxu1 %v1951_v25 }
 0x690   :  { %17440 = vmatpush3.bf16.msra.mxu1 %v18997_v37  ;;  %15970 = vmatprep.mubr.msk.f32.mxu1 %vm18908_vm0, %v18909_v2 }
 0x691   :  { %17441 = vmatprep.subr.bf16.mxu1 %v18904_v0 }
 0x697   :  { %15971 = vmatmul.mubr.f32.vlgmr.msra.gmra.mrb[4].mxu1 %v1947_v19 }
 0x698   :  { %17443 = vmatpush3.bf16.msra.mxu1 %v19003_v41  ;;  %15977 = vmatprep.mubr.msk.f32.mxu1 %vm18908_vm0, %v18909_v2 }
 0x699   :  { %17444 = vmatprep.subr.bf16.mxu1 %v18904_v0 }
 0x69f   :  { %15978 = vmatmul.mubr.f32.vlgmr.msra.gmra.mrb[4].mxu1 %v1948_v20 }
 0x6a0   :  { %17446 = vmatpush3.bf16.msra.mxu1 %v19018_v44  ;;  %15984 = vmatprep.mubr.msk.f32.mxu1 %vm18908_vm0, %v18909_v2 }
 0x6a1   :  { %17447 = vmatprep.subr.bf16.mxu1 %v18904_v0 }
 0x6a7   :  { %15985 = vmatmul.mubr.f32.vlgmr.msra.gmra.mrb[4].mxu1 %v1949_v21 }
 0x6a8   :  { %17449 = vmatpush3.bf16.msra.mxu1 %v19027_v46  ;;  %15991 = vmatprep.mubr.msk.f32.mxu1 %vm18908_vm0, %v18909_v2 }
 0x6a9   :  { %17450 = vmatprep.subr.bf16.mxu1 %v18904_v0 }
 0x6af   :  { %15992 = vmatmul.mubr.f32.vlgmr.msra.gmra.mrb[4].mxu1 %v1947_v19 }
 0x6b0   :  { %17452 = vmatpush3.bf16.msra.mxu1 %v19018_v44  ;;  %15998 = vmatprep.mubr.msk.f32.mxu1 %vm18908_vm0, %v18909_v2 }
 0x6b1   :  { %17471 = vmatprep.subr.bf16.mxu1 %v18904_v0 }
 0x6b7   :  { %15999 = vmatmul.mubr.f32.vlgmr.msra.gmra.mrb[4].mxu1 %v1947_v19 }
 0x6b8   :  { %17473 = vmatpush3.bf16.msra.mxu1 %v19018_v44  ;;  %16047 = vmatprep.mubr.msk.f32.mxu1 %vm18908_vm0, %v18909_v2 }
 0x6b9   :  { %17474 = vmatprep.subr.bf16.mxu1 %v18904_v0 }
 0x78a   :  { %v2335_v26 = vpop.f32.mrb[4].mxu1 }
 0x78b   :  { %v2340_v29 = vrot.slane %v2335_v26, 6  ;;  %v2341_v30 = vrot.slane %v2335_v26, 7  ;;  %v16000_v31 = vpop.f32.mrb[5].mxu1 }
 0x78d   :  { %v2344_v32 = vadd.f32 %v19120_v56, %v2340_v29  ;;  %v2345_v33 = vadd.f32 %v19122_v59, %v2341_v30 }
 0x78f   :  { %18637 = vtanh.f32 %v2344_v32  ;;  %v14974_v36 = vmul.f32 -1.442695, %v2344_v32  ;;  %v14975_v38 = vmul.f32 -1.442695, %v2345_v33 }
 0x790   :  { %18639 = vtanh.f32 %v2345_v33 }
 0x791   :  { %18641 = vpow2.f32 %v14974_v36 }
 0x792   :  { %18643 = vpow2.f32 %v14975_v38 }
 0x799   :  { %v18638_v34 = vpop.eup %18637 }
 0x79a   :  { %v18640_v35 = vpop.eup %18639  ;;  %2370 = vrot.lane.b32.xlu0 %v18638_v34, %s18913_s3 }
 0x79b   :  { %2372 = vrot.lane.b32.xlu1 %v18640_v35, %s18913_s3  ;;  %v18642_v39 = vpop.eup %18641 }
 0x79c   :  { %v18644_v40 = vpop.eup %18643  ;;  %v2352_v42 = vadd.f32 1.0, %v18642_v39 }
 0x79d   :  { %v2353_v48 = vadd.f32 1.0, %v18644_v40 }
 0x79e   :  { %18645 = vrcp.f32 %v2352_v42 }
 0x79f   :  { %18647 = vrcp.f32 %v2353_v48 }
 0x7a8   :  { %v18646_v49 = vpop.eup %18645 }
 0x7a9   :  { %v18648_v22 = vpop.eup %18647  ;;  %v2366_v54 = vmul.f32 %v18646_v49, %v2362_v51 }
 0x7aa   :  { %v2367_v55 = vmul.f32 %v18648_v22, %v2363_v52 }
 0x80c   :  { %v2371_v50 = vpop.permute.xlu0 %2370 }
 0x80d   :  { %v2373_v23 = vpop.permute.xlu1 %2372  ;;  %v2376_v43 = vmul.f32 %v18646_v49, %v2371_v50 }
 0x80e   :  { %v2377_v45 = vmul.f32 %v18648_v22, %v2373_v23 }
 0x80f   :  { %2380 = vrot.lane.b32.xlu0 %v2376_v43, %s18914_s4 }
 0x810   :  { %2382 = vrot.lane.b32.xlu1 %v2377_v45, %s18914_s4 }
 0x881   :  { %v2381_v57 = vpop.permute.xlu0 %2380 }
 0x882   :  { %v2383_v58 = vpop.permute.xlu1 %2382  ;;  %v19228_v60 = vadd.f32 %v2381_v57, %v2366_v54 }
 0x883   :  { %v19230_v61 = vadd.f32 %v2383_v58, %v2367_v55 }
 0x884   :  { %18649 = vtanh.f32 %v19228_v60 }
 0x885   :  { %18651 = vtanh.f32 %v19230_v61  ;;  %v2892_v50 = vrot.slane %v19230_v61, 7 }
 0x88e   :  { %v18650_v62 = vpop.eup %18649 }
 0x88f   :  { %v18652_v63 = vpop.eup %18651  ;;  %2392 = vrot.lane.b32.xlu0 %v18650_v62, %s18915_s5 }
 0x890   :  { %2394 = vrot.lane.b32.xlu1 %v18652_v63, %s18915_s5 }
 0x901   :  { %v2393_v1 = vpop.permute.xlu0 %2392 }
 0x902   :  { %v2395_v3 = vpop.permute.xlu1 %2394  ;;  %v2398_v4 = vmul.f32 %v18646_v49, %v2393_v1  ;;  %v2891_v49 = vrot.slane %v19228_v60, 7 }
 0x903   :  { %v2399_v6 = vmul.f32 %v18648_v22, %v2395_v3 }
 0x904   :  { %v2402_v8 = vrot.slane %v2398_v4, 2  ;;  %v19243_v9 = vsel %vm9276_vm8, %v9274_v5, %v2398_v4 }
 0x905   :  { %v2403_v10 = vrot.slane %v2399_v6, 1  ;;  %v19246_v11 = vsel %vm9276_vm8, %v9275_v7, %v2399_v6 }
 0x907   :  { %v2404_v12 = vsel %vm1347_vm5, %v2403_v10, %v2402_v8 }
 0x908   :  { %2405 = vrot.lane.b32.xlu0 %v2404_v12, %s18916_s7 }
 0x97a   :  { %v2406_v15 = vpop.permute.xlu0 %2405 }
 0x97b   :  { %v2407_v28 = vsel %vm827_vm6, %v2406_v15, 0 }
 0x97c   :  { %v2476_v13 = vand.u32 4294901760, %v2407_v28 }
 0x97e   :  { %v2477_v16 = vsub.f32 %v2407_v28, %v2476_v13 }
 0x980   :  { %v2478_v17 = vand.u32 4294901760, %v2477_v16 }
 0x982   :  { %v2479_v18 = vsub.f32 %v2477_v16, %v2478_v17 }
 0x984   :  { %v2480_v27 = vand.u32 4294901760, %v2479_v18 }
 0x986   :  { %16006 = vmatmul.mubr.f32.vlgmr.msra.gmra.mrb[6].mxu0 %v2480_v27 }
 0x987   :  { %17458 = vmatpush3.bf16.msra.mxu0 %v18997_v37  ;;  %16012 = vmatprep.mubr.msk.f32.mxu0 %vm18908_vm0, %v18909_v2 }
 0x988   :  { %17459 = vmatprep.subr.bf16.mxu0 %v18904_v0 }
 0x98e   :  { %16013 = vmatmul.mubr.f32.vlgmr.msra.gmra.mrb[6].mxu0 %v2476_v13 }
 0x98f   :  { %17461 = vmatpush3.bf16.msra.mxu0 %v19003_v41  ;;  %16019 = vmatprep.mubr.msk.f32.mxu0 %vm18908_vm0, %v18909_v2 }
 0x990   :  { %17462 = vmatprep.subr.bf16.mxu0 %v18904_v0 }
 0x996   :  { %16020 = vmatmul.mubr.f32.vlgmr.msra.gmra.mrb[6].mxu0 %v2477_v16 }
 0x997   :  { %17464 = vmatpush3.bf16.msra.mxu0 %v19018_v44  ;;  %16026 = vmatprep.mubr.msk.f32.mxu0 %vm18908_vm0, %v18909_v2 }
 0x998   :  { %17465 = vmatprep.subr.bf16.mxu0 %v18904_v0 }
 0x99e   :  { %16027 = vmatmul.mubr.f32.vlgmr.msra.gmra.mrb[6].mxu0 %v2478_v17 }
 0x99f   :  { %17467 = vmatpush3.bf16.msra.mxu0 %v19027_v46  ;;  %16033 = vmatprep.mubr.msk.f32.mxu0 %vm18908_vm0, %v18909_v2 }
 0x9a0   :  { %17468 = vmatprep.subr.bf16.mxu0 %v18904_v0 }
 0x9a6   :  { %16034 = vmatmul.mubr.f32.vlgmr.msra.gmra.mrb[6].mxu0 %v2476_v13 }
 0x9a7   :  { %17470 = vmatpush3.bf16.msra.mxu0 %v19018_v44  ;;  %16040 = vmatprep.mubr.msk.f32.mxu0 %vm18908_vm0, %v18909_v2 }
 0x9a8   :  { %17489 = vmatprep.subr.bf16.mxu0 %v18904_v0 }
 0x9ae   :  { %16041 = vmatmul.mubr.f32.vlgmr.msra.gmra.mrb[6].mxu0 %v2476_v13 }
 0x9af   :  { %17491 = vmatpush3.bf16.msra.mxu0 %v19018_v44  ;;  %16089 = vmatprep.mubr.msk.f32.mxu0 %vm18908_vm0, %v18909_v2 }
 0x9b0   :  { %17492 = vmatprep.subr.bf16.mxu0 %v18904_v0 }
 0xa81   :  { %v2864_v14 = vpop.f32.mrb[6].mxu0 }
 0xa82   :  { %v2869_v19 = vrot.slane %v2864_v14, 5  ;;  %v2870_v20 = vrot.slane %v2864_v14, 6  ;;  %v16042_v21 = vpop.f32.mrb[7].mxu0 }
 0xa84   :  { %v2873_v24 = vadd.f32 %v19120_v56, %v2869_v19  ;;  %v2874_v25 = vadd.f32 %v19122_v59, %v2870_v20 }
 0xa86   :  { %18653 = vtanh.f32 %v2873_v24  ;;  %v14976_v30 = vmul.f32 -1.442695, %v2873_v24  ;;  %v14977_v31 = vmul.f32 -1.442695, %v2874_v25 }
 0xa87   :  { %18655 = vtanh.f32 %v2874_v25 }
 0xa88   :  { %18657 = vpow2.f32 %v14976_v30 }
 0xa89   :  { %18659 = vpow2.f32 %v14977_v31 }
 0xa90   :  { %v18654_v26 = vpop.eup %18653 }
 0xa91   :  { %v18656_v29 = vpop.eup %18655  ;;  %2899 = vrot.lane.b32.xlu1 %v18654_v26, %s18913_s3 }
 0xa92   :  { %2901 = vrot.lane.b32.xlu0 %v18656_v29, %s18913_s3  ;;  %v18658_v32 = vpop.eup %18657 }
 0xa93   :  { %v18660_v33 = vpop.eup %18659  ;;  %v2881_v34 = vadd.f32 1.0, %v18658_v32 }
 0xa94   :  { %v2882_v35 = vadd.f32 1.0, %v18660_v33 }
 0xa95   :  { %18661 = vrcp.f32 %v2881_v34 }
 0xa96   :  { %18663 = vrcp.f32 %v2882_v35 }
 0xa9f   :  { %v18662_v36 = vpop.eup %18661 }
 0xaa0   :  { %v18664_v39 = vpop.eup %18663  ;;  %v2895_v22 = vmul.f32 %v18662_v36, %v2891_v49 }
 0xaa1   :  { %v2896_v23 = vmul.f32 %v18664_v39, %v2892_v50 }
 0xb03   :  { %v2900_v38 = vpop.permute.xlu1 %2899 }
 0xb04   :  { %v2902_v40 = vpop.permute.xlu0 %2901  ;;  %v2905_v42 = vmul.f32 %v18662_v36, %v2900_v38 }
 0xb05   :  { %v2906_v48 = vmul.f32 %v18664_v39, %v2902_v40 }
 0xb06   :  { %2909 = vrot.lane.b32.xlu1 %v2905_v42, %s18914_s4 }
 0xb07   :  { %2911 = vrot.lane.b32.xlu0 %v2906_v48, %s18914_s4 }
 0xb78   :  { %v2910_v43 = vpop.permute.xlu1 %2909 }
 0xb79   :  { %v2912_v45 = vpop.permute.xlu0 %2911  ;;  %v19283_v51 = vadd.f32 %v2910_v43, %v2895_v22 }
 0xb7a   :  { %v19285_v52 = vadd.f32 %v2912_v45, %v2896_v23 }
 0xb7b   :  { %18665 = vtanh.f32 %v19283_v51  ;;  %v3420_v34 = vrot.slane %v19283_v51, 7 }
 0xb7c   :  { %18667 = vtanh.f32 %v19285_v52  ;;  %v3421_v35 = vrot.slane %v19285_v52, 7 }
 0xb85   :  { %v18666_v54 = vpop.eup %18665 }
 0xb86   :  { %v18668_v55 = vpop.eup %18667  ;;  %2921 = vrot.lane.b32.xlu1 %v18666_v54, %s18915_s5 }
 0xb87   :  { %2923 = vrot.lane.b32.xlu0 %v18668_v55, %s18915_s5 }
 0xbf8   :  { %v2922_v57 = vpop.permute.xlu1 %2921 }
 0xbf9   :  { %v2924_v58 = vpop.permute.xlu0 %2923  ;;  %v2927_v60 = vmul.f32 %v18662_v36, %v2922_v57 }
 0xbfa   :  { %v2928_v61 = vmul.f32 %v18664_v39, %v2924_v58 }
 0xbfb   :  { %v2931_v62 = vrot.slane %v2927_v60, 3  ;;  %v19293_v63 = vsel %vm9279_vm9, %v19243_v9, %v2927_v60 }
 0xbfc   :  { %v2932_v1 = vrot.slane %v2928_v61, 2  ;;  %v19297_v3 = vsel %vm9279_vm9, %v19246_v11, %v2928_v61 }
 0xbfe   :  { %v2933_v4 = vsel %vm1347_vm5, %v2932_v1, %v2931_v62 }
 0xbff   :  { %2934 = vrot.lane.b32.xlu1 %v2933_v4, %s18916_s7 }
 0xc71   :  { %v2935_v5 = vpop.permute.xlu1 %2934 }
 0xc72   :  { %v2936_v6 = vsel %vm827_vm6, %v2935_v5, 0 }
 0xc73   :  { %v3005_v7 = vand.u32 4294901760, %v2936_v6 }
 0xc75   :  { %v3006_v8 = vsub.f32 %v2936_v6, %v3005_v7 }
 0xc77   :  { %v3007_v10 = vand.u32 4294901760, %v3006_v8 }
 0xc79   :  { %v3008_v12 = vsub.f32 %v3006_v8, %v3007_v10 }
 0xc7b   :  { %v3009_v15 = vand.u32 4294901760, %v3008_v12 }
 0xc7d   :  { %16048 = vmatmul.mubr.f32.vlgmr.msra.gmra.mrb[6].mxu1 %v3009_v15 }
 0xc7e   :  { %17476 = vmatpush3.bf16.msra.mxu1 %v18997_v37  ;;  %16054 = vmatprep.mubr.msk.f32.mxu1 %vm18908_vm0, %v18909_v2 }
 0xc7f   :  { %17477 = vmatprep.subr.bf16.mxu1 %v18904_v0 }
 0xc85   :  { %16055 = vmatmul.mubr.f32.vlgmr.msra.gmra.mrb[6].mxu1 %v3005_v7 }
 0xc86   :  { %17479 = vmatpush3.bf16.msra.mxu1 %v19003_v41  ;;  %16061 = vmatprep.mubr.msk.f32.mxu1 %vm18908_vm0, %v18909_v2 }
 0xc87   :  { %17480 = vmatprep.subr.bf16.mxu1 %v18904_v0 }
 0xc8d   :  { %16062 = vmatmul.mubr.f32.vlgmr.msra.gmra.mrb[6].mxu1 %v3006_v8 }
 0xc8e   :  { %17482 = vmatpush3.bf16.msra.mxu1 %v19018_v44  ;;  %16068 = vmatprep.mubr.msk.f32.mxu1 %vm18908_vm0, %v18909_v2 }
 0xc8f   :  { %17483 = vmatprep.subr.bf16.mxu1 %v18904_v0 }
 0xc95   :  { %16069 = vmatmul.mubr.f32.vlgmr.msra.gmra.mrb[6].mxu1 %v3007_v10 }
 0xc96   :  { %17485 = vmatpush3.bf16.msra.mxu1 %v19027_v46  ;;  %16075 = vmatprep.mubr.msk.f32.mxu1 %vm18908_vm0, %v18909_v2 }
 0xc97   :  { %17486 = vmatprep.subr.bf16.mxu1 %v18904_v0 }
 0xc9d   :  { %16076 = vmatmul.mubr.f32.vlgmr.msra.gmra.mrb[6].mxu1 %v3005_v7 }
 0xc9e   :  { %17488 = vmatpush3.bf16.msra.mxu1 %v19018_v44  ;;  %16082 = vmatprep.mubr.msk.f32.mxu1 %vm18908_vm0, %v18909_v2 }
 0xc9f   :  { %17507 = vmatprep.subr.bf16.mxu1 %v18904_v0 }
 0xca5   :  { %16083 = vmatmul.mubr.f32.vlgmr.msra.gmra.mrb[6].mxu1 %v3005_v7 }
 0xca6   :  { %17509 = vmatpush3.bf16.msra.mxu1 %v19018_v44  ;;  %16131 = vmatprep.mubr.msk.f32.mxu1 %vm18908_vm0, %v18909_v2 }
 0xca7   :  { %17510 = vmatprep.subr.bf16.mxu1 %v18904_v0 }
 0xd78   :  { %v3393_v9 = vpop.f32.mrb[6].mxu1 }
 0xd79   :  { %v3398_v11 = vrot.slane %v3393_v9, 4  ;;  %v3399_v28 = vrot.slane %v3393_v9, 5  ;;  %v16084_v13 = vpop.f32.mrb[7].mxu1 }
 0xd7b   :  { %v3402_v16 = vadd.f32 %v19120_v56, %v3398_v11  ;;  %v3403_v17 = vadd.f32 %v19122_v59, %v3399_v28 }
 0xd7d   :  { %18669 = vtanh.f32 %v3402_v16  ;;  %v14978_v14 = vmul.f32 -1.442695, %v3402_v16  ;;  %v14979_v19 = vmul.f32 -1.442695, %v3403_v17 }
 0xd7e   :  { %18671 = vtanh.f32 %v3403_v17 }
 0xd7f   :  { %18673 = vpow2.f32 %v14978_v14 }
 0xd80   :  { %18675 = vpow2.f32 %v14979_v19 }
 0xd87   :  { %v18670_v18 = vpop.eup %18669 }
 0xd88   :  { %v18672_v27 = vpop.eup %18671  ;;  %3428 = vrot.lane.b32.xlu0 %v18670_v18, %s18913_s3 }
 0xd89   :  { %3430 = vrot.lane.b32.xlu1 %v18672_v27, %s18913_s3  ;;  %v18674_v20 = vpop.eup %18673 }
 0xd8a   :  { %v18676_v21 = vpop.eup %18675  ;;  %v3410_v24 = vadd.f32 1.0, %v18674_v20 }
 0xd8b   :  { %v3411_v25 = vadd.f32 1.0, %v18676_v21 }
 0xd8c   :  { %18677 = vrcp.f32 %v3410_v24 }
 0xd8d   :  { %18679 = vrcp.f32 %v3411_v25 }
 0xd96   :  { %v18678_v26 = vpop.eup %18677 }
 0xd97   :  { %v18680_v30 = vpop.eup %18679  ;;  %v3424_v36 = vmul.f32 %v18678_v26, %v3420_v34 }
 0xd98   :  { %v3425_v38 = vmul.f32 %v18680_v30, %v3421_v35 }
 0xdfa   :  { %v3429_v29 = vpop.permute.xlu0 %3428 }
 0xdfb   :  { %v3431_v31 = vpop.permute.xlu1 %3430  ;;  %v3434_v32 = vmul.f32 %v18678_v26, %v3429_v29 }
 0xdfc   :  { %v3435_v33 = vmul.f32 %v18680_v30, %v3431_v31 }
 0xdfd   :  { %3438 = vrot.lane.b32.xlu0 %v3434_v32, %s18914_s4 }
 0xdfe   :  { %3440 = vrot.lane.b32.xlu1 %v3435_v33, %s18914_s4 }
 0xe6f   :  { %v3439_v39 = vpop.permute.xlu0 %3438 }
 0xe70   :  { %v3441_v40 = vpop.permute.xlu1 %3440  ;;  %v19334_v42 = vadd.f32 %v3439_v39, %v3424_v36 }
 0xe71   :  { %v19336_v48 = vadd.f32 %v3441_v40, %v3425_v38 }
 0xe72   :  { %18681 = vtanh.f32 %v19334_v42  ;;  %v3949_v24 = vrot.slane %v19334_v42, 7 }
 0xe73   :  { %18683 = vtanh.f32 %v19336_v48  ;;  %v3950_v25 = vrot.slane %v19336_v48, 7 }
 0xe7c   :  { %v18682_v49 = vpop.eup %18681 }
 0xe7d   :  { %v18684_v50 = vpop.eup %18683  ;;  %3450 = vrot.lane.b32.xlu0 %v18682_v49, %s18915_s5 }
 0xe7e   :  { %3452 = vrot.lane.b32.xlu1 %v18684_v50, %s18915_s5 }
 0xeef   :  { %v3451_v22 = vpop.permute.xlu0 %3450 }
 0xef0   :  { %v3453_v23 = vpop.permute.xlu1 %3452  ;;  %v3456_v43 = vmul.f32 %v18678_v26, %v3451_v22 }
 0xef1   :  { %v3457_v45 = vmul.f32 %v18680_v30, %v3453_v23 }
 0xef2   :  { %v3460_v51 = vrot.slane %v3456_v43, 4  ;;  %v19344_v52 = vsel %vm9282_vm10, %v19293_v63, %v3456_v43 }
 0xef3   :  { %v3461_v54 = vrot.slane %v3457_v45, 3  ;;  %v19348_v55 = vsel %vm9282_vm10, %v19297_v3, %v3457_v45 }
 0xef5   :  { %v3462_v57 = vsel %vm1347_vm5, %v3461_v54, %v3460_v51 }
 0xef6   :  { %3463 = vrot.lane.b32.xlu0 %v3462_v57, %s18916_s7 }
 0xf68   :  { %v3464_v58 = vpop.permute.xlu0 %3463 }
 0xf69   :  { %v3465_v60 = vsel %vm827_vm6, %v3464_v58, 0 }
 0xf6a   :  { %v3534_v61 = vand.u32 4294901760, %v3465_v60 }
 0xf6c   :  { %v3535_v62 = vsub.f32 %v3465_v60, %v3534_v61 }
 0xf6e   :  { %v3536_v1 = vand.u32 4294901760, %v3535_v62 }
 0xf70   :  { %v3537_v4 = vsub.f32 %v3535_v62, %v3536_v1 }
 0xf72   :  { %v3538_v5 = vand.u32 4294901760, %v3537_v4 }
 0xf74   :  { %16090 = vmatmul.mubr.f32.vlgmr.msra.gmra.mrb[8].mxu0 %v3538_v5 }
 0xf75   :  { %17494 = vmatpush3.bf16.msra.mxu0 %v18997_v37  ;;  %16096 = vmatprep.mubr.msk.f32.mxu0 %vm18908_vm0, %v18909_v2 }
 0xf76   :  { %17495 = vmatprep.subr.bf16.mxu0 %v18904_v0 }
 0xf7c   :  { %16097 = vmatmul.mubr.f32.vlgmr.msra.gmra.mrb[8].mxu0 %v3534_v61 }
 0xf7d   :  { %17497 = vmatpush3.bf16.msra.mxu0 %v19003_v41  ;;  %16103 = vmatprep.mubr.msk.f32.mxu0 %vm18908_vm0, %v18909_v2 }
 0xf7e   :  { %17498 = vmatprep.subr.bf16.mxu0 %v18904_v0 }
 0xf84   :  { %16104 = vmatmul.mubr.f32.vlgmr.msra.gmra.mrb[8].mxu0 %v3535_v62 }
 0xf85   :  { %17500 = vmatpush3.bf16.msra.mxu0 %v19018_v44  ;;  %16110 = vmatprep.mubr.msk.f32.mxu0 %vm18908_vm0, %v18909_v2 }
 0xf86   :  { %17501 = vmatprep.subr.bf16.mxu0 %v18904_v0 }
 0xf8c   :  { %16111 = vmatmul.mubr.f32.vlgmr.msra.gmra.mrb[8].mxu0 %v3536_v1 }
 0xf8d   :  { %17503 = vmatpush3.bf16.msra.mxu0 %v19027_v46  ;;  %16117 = vmatprep.mubr.msk.f32.mxu0 %vm18908_vm0, %v18909_v2 }
 0xf8e   :  { %17504 = vmatprep.subr.bf16.mxu0 %v18904_v0 }
 0xf94   :  { %16118 = vmatmul.mubr.f32.vlgmr.msra.gmra.mrb[8].mxu0 %v3534_v61 }
 0xf95   :  { %17506 = vmatpush3.bf16.msra.mxu0 %v19018_v44  ;;  %16124 = vmatprep.mubr.msk.f32.mxu0 %vm18908_vm0, %v18909_v2 }
 0xf96   :  { %17525 = vmatprep.subr.bf16.mxu0 %v18904_v0 }
 0xf9c   :  { %16125 = vmatmul.mubr.f32.vlgmr.msra.gmra.mrb[8].mxu0 %v3534_v61 }
 0xf9d   :  { %17527 = vmatpush3.bf16.msra.mxu0 %v19018_v44  ;;  %16173 = vmatprep.mubr.msk.f32.mxu0 %vm18908_vm0, %v18909_v2 }
 0xf9e   :  { %17528 = vmatprep.subr.bf16.mxu0 %v18904_v0 }
0x106f   :  { %v3922_v63 = vpop.f32.mrb[8].mxu0 }
0x1070   :  { %v3927_v3 = vrot.slane %v3922_v63, 3  ;;  %v3928_v6 = vrot.slane %v3922_v63, 4  ;;  %v16126_v7 = vpop.f32.mrb[9].mxu0 }
0x1072   :  { %v3931_v8 = vadd.f32 %v19120_v56, %v3927_v3  ;;  %v3932_v10 = vadd.f32 %v19122_v59, %v3928_v6 }
0x1074   :  { %18685 = vtanh.f32 %v3931_v8  ;;  %v14980_v9 = vmul.f32 -1.442695, %v3931_v8  ;;  %v14981_v11 = vmul.f32 -1.442695, %v3932_v10 }
0x1075   :  { %18687 = vtanh.f32 %v3932_v10 }
0x1076   :  { %18689 = vpow2.f32 %v14980_v9 }
0x1077   :  { %18691 = vpow2.f32 %v14981_v11 }
0x107e   :  { %v18686_v12 = vpop.eup %18685 }
0x107f   :  { %v18688_v15 = vpop.eup %18687  ;;  %3957 = vrot.lane.b32.xlu1 %v18686_v12, %s18913_s3 }
0x1080   :  { %3959 = vrot.lane.b32.xlu0 %v18688_v15, %s18913_s3  ;;  %v18690_v28 = vpop.eup %18689 }
0x1081   :  { %v18692_v13 = vpop.eup %18691  ;;  %v3939_v16 = vadd.f32 1.0, %v18690_v28 }
0x1082   :  { %v3940_v17 = vadd.f32 1.0, %v18692_v13 }
0x1083   :  { %18693 = vrcp.f32 %v3939_v16 }
0x1084   :  { %18695 = vrcp.f32 %v3940_v17 }
0x108d   :  { %v18694_v18 = vpop.eup %18693 }
0x108e   :  { %v18696_v14 = vpop.eup %18695  ;;  %v3953_v26 = vmul.f32 %v18694_v18, %v3949_v24 }
0x108f   :  { %v3954_v29 = vmul.f32 %v18696_v14, %v3950_v25 }
0x10f1   :  { %v3958_v27 = vpop.permute.xlu1 %3957 }
0x10f2   :  { %v3960_v19 = vpop.permute.xlu0 %3959  ;;  %v3963_v20 = vmul.f32 %v18694_v18, %v3958_v27 }
0x10f3   :  { %v3964_v21 = vmul.f32 %v18696_v14, %v3960_v19 }
0x10f4   :  { %3967 = vrot.lane.b32.xlu1 %v3963_v20, %s18914_s4 }
0x10f5   :  { %3969 = vrot.lane.b32.xlu0 %v3964_v21, %s18914_s4 }
0x1166   :  { %v3968_v30 = vpop.permute.xlu1 %3967 }
0x1167   :  { %v3970_v31 = vpop.permute.xlu0 %3969  ;;  %v19385_v32 = vadd.f32 %v3968_v30, %v3953_v26 }
0x1168   :  { %v19387_v33 = vadd.f32 %v3970_v31, %v3954_v29 }
0x1169   :  { %18697 = vtanh.f32 %v19385_v32  ;;  %v4478_v16 = vrot.slane %v19385_v32, 7 }
0x116a   :  { %18699 = vtanh.f32 %v19387_v33  ;;  %v4479_v17 = vrot.slane %v19387_v33, 7 }
0x1173   :  { %v18698_v34 = vpop.eup %18697 }
0x1174   :  { %v18700_v35 = vpop.eup %18699  ;;  %3979 = vrot.lane.b32.xlu1 %v18698_v34, %s18915_s5 }
0x1175   :  { %3981 = vrot.lane.b32.xlu0 %v18700_v35, %s18915_s5 }
0x11e6   :  { %v3980_v36 = vpop.permute.xlu1 %3979 }
0x11e7   :  { %v3982_v38 = vpop.permute.xlu0 %3981  ;;  %v3985_v39 = vmul.f32 %v18694_v18, %v3980_v36 }
0x11e8   :  { %v3986_v40 = vmul.f32 %v18696_v14, %v3982_v38 }
0x11e9   :  { %v3989_v42 = vrot.slane %v3985_v39, 5  ;;  %v19395_v48 = vsel %vm9285_vm11, %v19344_v52, %v3985_v39 }
0x11ea   :  { %v3990_v49 = vrot.slane %v3986_v40, 4  ;;  %v19399_v50 = vsel %vm9285_vm11, %v19348_v55, %v3986_v40 }
0x11ec   :  { %v3991_v22 = vsel %vm1347_vm5, %v3990_v49, %v3989_v42 }
0x11ed   :  { %3992 = vrot.lane.b32.xlu1 %v3991_v22, %s18916_s7 }
0x125f   :  { %v3993_v23 = vpop.permute.xlu1 %3992 }
0x1260   :  { %v3994_v43 = vsel %vm827_vm6, %v3993_v23, 0 }
0x1261   :  { %v4063_v45 = vand.u32 4294901760, %v3994_v43 }
0x1263   :  { %v4064_v51 = vsub.f32 %v3994_v43, %v4063_v45 }
0x1265   :  { %v4065_v54 = vand.u32 4294901760, %v4064_v51 }
0x1267   :  { %v4066_v57 = vsub.f32 %v4064_v51, %v4065_v54 }
0x1269   :  { %v4067_v58 = vand.u32 4294901760, %v4066_v57 }
0x126b   :  { %16132 = vmatmul.mubr.f32.vlgmr.msra.gmra.mrb[8].mxu1 %v4067_v58 }
0x126c   :  { %17512 = vmatpush3.bf16.msra.mxu1 %v18997_v37  ;;  %16138 = vmatprep.mubr.msk.f32.mxu1 %vm18908_vm0, %v18909_v2 }
0x126d   :  { %17513 = vmatprep.subr.bf16.mxu1 %v18904_v0 }
0x1273   :  { %16139 = vmatmul.mubr.f32.vlgmr.msra.gmra.mrb[8].mxu1 %v4063_v45 }
0x1274   :  { %17515 = vmatpush3.bf16.msra.mxu1 %v19003_v41  ;;  %16145 = vmatprep.mubr.msk.f32.mxu1 %vm18908_vm0, %v18909_v2 }
0x1275   :  { %17516 = vmatprep.subr.bf16.mxu1 %v18904_v0 }
0x127b   :  { %16146 = vmatmul.mubr.f32.vlgmr.msra.gmra.mrb[8].mxu1 %v4064_v51 }
0x127c   :  { %17518 = vmatpush3.bf16.msra.mxu1 %v19018_v44  ;;  %16152 = vmatprep.mubr.msk.f32.mxu1 %vm18908_vm0, %v18909_v2 }
0x127d   :  { %17519 = vmatprep.subr.bf16.mxu1 %v18904_v0 }
0x1283   :  { %16153 = vmatmul.mubr.f32.vlgmr.msra.gmra.mrb[8].mxu1 %v4065_v54 }
0x1284   :  { %17521 = vmatpush3.bf16.msra.mxu1 %v19027_v46  ;;  %16159 = vmatprep.mubr.msk.f32.mxu1 %vm18908_vm0, %v18909_v2 }
0x1285   :  { %17522 = vmatprep.subr.bf16.mxu1 %v18904_v0 }
0x128b   :  { %16160 = vmatmul.mubr.f32.vlgmr.msra.gmra.mrb[8].mxu1 %v4063_v45 }
0x128c   :  { %17524 = vmatpush3.bf16.msra.mxu1 %v19018_v44  ;;  %16166 = vmatprep.mubr.msk.f32.mxu1 %vm18908_vm0, %v18909_v2 }
0x128d   :  { %17543 = vmatprep.subr.bf16.mxu1 %v18904_v0 }
0x1293   :  { %16167 = vmatmul.mubr.f32.vlgmr.msra.gmra.mrb[8].mxu1 %v4063_v45 }
0x1294   :  { %17545 = vmatpush3.bf16.msra.mxu1 %v19018_v44  ;;  %16215 = vmatprep.mubr.msk.f32.mxu1 %vm18908_vm0, %v18909_v2 }
0x1295   :  { %17546 = vmatprep.subr.bf16.mxu1 %v18904_v0 }
0x1366   :  { %v4451_v52 = vpop.f32.mrb[8].mxu1 }
0x1367   :  { %v4456_v55 = vrot.slane %v4451_v52, 2  ;;  %v4457_v60 = vrot.slane %v4451_v52, 3  ;;  %v16168_v61 = vpop.f32.mrb[9].mxu1 }
0x1369   :  { %v4460_v62 = vadd.f32 %v19120_v56, %v4456_v55  ;;  %v4461_v1 = vadd.f32 %v19122_v59, %v4457_v60 }
0x136b   :  { %18701 = vtanh.f32 %v4460_v62  ;;  %v14982_v63 = vmul.f32 -1.442695, %v4460_v62  ;;  %v14983_v3 = vmul.f32 -1.442695, %v4461_v1 }
0x136c   :  { %18703 = vtanh.f32 %v4461_v1 }
0x136d   :  { %18705 = vpow2.f32 %v14982_v63 }
0x136e   :  { %18707 = vpow2.f32 %v14983_v3 }
0x1375   :  { %v18702_v4 = vpop.eup %18701 }
0x1376   :  { %v18704_v5 = vpop.eup %18703  ;;  %4486 = vrot.lane.b32.xlu0 %v18702_v4, %s18913_s3 }
0x1377   :  { %4488 = vrot.lane.b32.xlu1 %v18704_v5, %s18913_s3  ;;  %v18706_v6 = vpop.eup %18705 }
0x1378   :  { %v18708_v7 = vpop.eup %18707  ;;  %v4468_v8 = vadd.f32 1.0, %v18706_v6 }
0x1379   :  { %v4469_v10 = vadd.f32 1.0, %v18708_v7 }
0x137a   :  { %18709 = vrcp.f32 %v4468_v8 }
0x137b   :  { %18711 = vrcp.f32 %v4469_v10 }
0x1384   :  { %v18710_v12 = vpop.eup %18709 }
0x1385   :  { %v18712_v9 = vpop.eup %18711  ;;  %v4482_v18 = vmul.f32 %v18710_v12, %v4478_v16 }
0x1386   :  { %v4483_v27 = vmul.f32 %v18712_v9, %v4479_v17 }
0x13e8   :  { %v4487_v15 = vpop.permute.xlu0 %4486 }
0x13e9   :  { %v4489_v11 = vpop.permute.xlu1 %4488  ;;  %v4492_v28 = vmul.f32 %v18710_v12, %v4487_v15 }
0x13ea   :  { %v4493_v13 = vmul.f32 %v18712_v9, %v4489_v11 }
0x13eb   :  { %4496 = vrot.lane.b32.xlu0 %v4492_v28, %s18914_s4 }
0x13ec   :  { %4498 = vrot.lane.b32.xlu1 %v4493_v13, %s18914_s4 }
0x145d   :  { %v4497_v14 = vpop.permute.xlu0 %4496 }
0x145e   :  { %v4499_v19 = vpop.permute.xlu1 %4498  ;;  %v19436_v20 = vadd.f32 %v4497_v14, %v4482_v18 }
0x145f   :  { %v19438_v21 = vadd.f32 %v4499_v19, %v4483_v27 }
0x1460   :  { %18713 = vtanh.f32 %v19436_v20  ;;  %v5007_v6 = vrot.slane %v19436_v20, 7 }
0x1461   :  { %18715 = vtanh.f32 %v19438_v21  ;;  %v5008_v7 = vrot.slane %v19438_v21, 7 }
0x146a   :  { %v18714_v24 = vpop.eup %18713 }
0x146b   :  { %v18716_v25 = vpop.eup %18715  ;;  %4508 = vrot.lane.b32.xlu0 %v18714_v24, %s18915_s5 }
0x146c   :  { %4510 = vrot.lane.b32.xlu1 %v18716_v25, %s18915_s5 }
0x14dd   :  { %v4509_v26 = vpop.permute.xlu0 %4508 }
0x14de   :  { %v4511_v29 = vpop.permute.xlu1 %4510  ;;  %v4514_v30 = vmul.f32 %v18710_v12, %v4509_v26 }
0x14df   :  { %v4515_v31 = vmul.f32 %v18712_v9, %v4511_v29 }
0x14e0   :  { %v4518_v32 = vrot.slane %v4514_v30, 6  ;;  %v19446_v33 = vsel %vm9288_vm12, %v19395_v48, %v4514_v30 }
0x14e1   :  { %v4519_v34 = vrot.slane %v4515_v31, 5  ;;  %v19450_v35 = vsel %vm9288_vm12, %v19399_v50, %v4515_v31 }
0x14e3   :  { %v4520_v36 = vsel %vm1347_vm5, %v4519_v34, %v4518_v32 }
0x14e4   :  { %4521 = vrot.lane.b32.xlu0 %v4520_v36, %s18916_s7 }
0x1556   :  { %v4522_v38 = vpop.permute.xlu0 %4521 }
0x1557   :  { %v4523_v39 = vsel %vm827_vm6, %v4522_v38, 0 }
0x1558   :  { %v4592_v40 = vand.u32 4294901760, %v4523_v39 }
0x155a   :  { %v4593_v42 = vsub.f32 %v4523_v39, %v4592_v40 }
0x155c   :  { %v4594_v49 = vand.u32 4294901760, %v4593_v42 }
0x155e   :  { %v4595_v22 = vsub.f32 %v4593_v42, %v4594_v49 }
0x1560   :  { %v4596_v23 = vand.u32 4294901760, %v4595_v22 }
0x1562   :  { %16174 = vmatmul.mubr.f32.vlgmr.msra.gmra.mrb[10].mxu0 %v4596_v23 }
0x1563   :  { %17530 = vmatpush3.bf16.msra.mxu0 %v18997_v37  ;;  %16180 = vmatprep.mubr.msk.f32.mxu0 %vm18908_vm0, %v18909_v2 }
0x1564   :  { %17531 = vmatprep.subr.bf16.mxu0 %v18904_v0 }
0x156a   :  { %16181 = vmatmul.mubr.f32.vlgmr.msra.gmra.mrb[10].mxu0 %v4592_v40 }
0x156b   :  { %17533 = vmatpush3.bf16.msra.mxu0 %v19003_v41  ;;  %16187 = vmatprep.mubr.msk.f32.mxu0 %vm18908_vm0, %v18909_v2 }
0x156c   :  { %17534 = vmatprep.subr.bf16.mxu0 %v18904_v0 }
0x1572   :  { %16188 = vmatmul.mubr.f32.vlgmr.msra.gmra.mrb[10].mxu0 %v4593_v42 }
0x1573   :  { %17536 = vmatpush3.bf16.msra.mxu0 %v19018_v44  ;;  %16194 = vmatprep.mubr.msk.f32.mxu0 %vm18908_vm0, %v18909_v2 }
0x1574   :  { %17537 = vmatprep.subr.bf16.mxu0 %v18904_v0 }
0x157a   :  { %16195 = vmatmul.mubr.f32.vlgmr.msra.gmra.mrb[10].mxu0 %v4594_v49 }
0x157b   :  { %17539 = vmatpush3.bf16.msra.mxu0 %v19027_v46  ;;  %16201 = vmatprep.mubr.msk.f32.mxu0 %vm18908_vm0, %v18909_v2 }
0x157c   :  { %17540 = vmatprep.subr.bf16.mxu0 %v18904_v0 }
0x1582   :  { %16202 = vmatmul.mubr.f32.vlgmr.msra.gmra.mrb[10].mxu0 %v4592_v40 }
0x1583   :  { %17542 = vmatpush3.bf16.msra.mxu0 %v19018_v44  ;;  %16208 = vmatprep.mubr.msk.f32.mxu0 %vm18908_vm0, %v18909_v2 }
0x1584   :  { %17561 = vmatprep.subr.bf16.mxu0 %v18904_v0 }
0x158a   :  { %16209 = vmatmul.mubr.f32.vlgmr.msra.gmra.mrb[10].mxu0 %v4592_v40 }
0x158b   :  { %17563 = vmatpush3.bf16.msra.mxu0 %v19018_v44  ;;  %16257 = vmatprep.mubr.msk.f32.mxu0 %vm18908_vm0, %v18909_v2 }
0x158c   :  { %17564 = vmatprep.subr.bf16.mxu0 %v18904_v0 }
0x165d   :  { %v4980_v48 = vpop.f32.mrb[10].mxu0 }
0x165e   :  { %v4985_v50 = vrot.slane %v4980_v48, 1  ;;  %v4986_v43 = vrot.slane %v4980_v48, 2  ;;  %v16210_v45 = vpop.f32.mrb[11].mxu0 }
0x1660   :  { %v4989_v51 = vadd.f32 %v19120_v56, %v4985_v50  ;;  %v4990_v54 = vadd.f32 %v19122_v59, %v4986_v43 }
0x1662   :  { %18717 = vtanh.f32 %v4989_v51  ;;  %v14984_v52 = vmul.f32 -1.442695, %v4989_v51  ;;  %v14985_v55 = vmul.f32 -1.442695, %v4990_v54 }
0x1663   :  { %18719 = vtanh.f32 %v4990_v54 }
0x1664   :  { %18721 = vpow2.f32 %v14984_v52 }
0x1665   :  { %18723 = vpow2.f32 %v14985_v55 }
0x166c   :  { %v18718_v57 = vpop.eup %18717 }
0x166d   :  { %v18720_v58 = vpop.eup %18719  ;;  %5015 = vrot.lane.b32.xlu1 %v18718_v57, %s18913_s3 }
0x166e   :  { %5017 = vrot.lane.b32.xlu0 %v18720_v58, %s18913_s3  ;;  %v18722_v60 = vpop.eup %18721 }
0x166f   :  { %v18724_v61 = vpop.eup %18723  ;;  %v4997_v62 = vadd.f32 1.0, %v18722_v60 }
0x1670   :  { %v4998_v1 = vadd.f32 1.0, %v18724_v61 }
0x1671   :  { %18725 = vrcp.f32 %v4997_v62 }
0x1672   :  { %18727 = vrcp.f32 %v4998_v1 }
0x167b   :  { %v18726_v56 = vpop.eup %18725 }
0x167c   :  { %v18728_v4 = vpop.eup %18727  ;;  %v5011_v8 = vmul.f32 %v18726_v56, %v5007_v6 }
0x167d   :  { %v5012_v10 = vmul.f32 %v18728_v4, %v5008_v7 }
0x16df   :  { %v5016_v59 = vpop.permute.xlu1 %5015 }
0x16e0   :  { %v5018_v5 = vpop.permute.xlu0 %5017  ;;  %v5021_v63 = vmul.f32 %v18726_v56, %v5016_v59 }
0x16e1   :  { %v5022_v3 = vmul.f32 %v18728_v4, %v5018_v5 }
0x16e2   :  { %5025 = vrot.lane.b32.xlu1 %v5021_v63, %s18914_s4 }
0x16e3   :  { %5027 = vrot.lane.b32.xlu0 %v5022_v3, %s18914_s4 }
0x1754   :  { %v5026_v12 = vpop.permute.xlu1 %5025 }
0x1755   :  { %v5028_v15 = vpop.permute.xlu0 %5027  ;;  %v19487_v9 = vadd.f32 %v5026_v12, %v5011_v8 }
0x1756   :  { %v19489_v11 = vadd.f32 %v5028_v15, %v5012_v10 }
0x1757   :  { %18729 = vtanh.f32 %v19487_v9  ;;  %v5535_v55 = vrot.slane %v19487_v9, 7 }
0x1758   :  { %18731 = vtanh.f32 %v19489_v11  ;;  %v5536_v61 = vrot.slane %v19489_v11, 7 }
0x1761   :  { %v18730_v28 = vpop.eup %18729 }
0x1762   :  { %v18732_v13 = vpop.eup %18731  ;;  %5037 = vrot.lane.b32.xlu1 %v18730_v28, %s18915_s5 }
0x1763   :  { %5039 = vrot.lane.b32.xlu0 %v18732_v13, %s18915_s5 }
0x17d4   :  { %v5038_v16 = vpop.permute.xlu1 %5037 }
0x17d5   :  { %v5040_v17 = vpop.permute.xlu0 %5039  ;;  %v5043_v18 = vmul.f32 %v18726_v56, %v5038_v16 }
0x17d6   :  { %v5044_v27 = vmul.f32 %v18728_v4, %v5040_v17 }
0x17d7   :  { %v5047_v14 = vrot.slane %v5043_v18, 7  ;;  %v19497_v19 = vsel %vm9291_vm13, %v19446_v33, %v5043_v18 }
0x17d8   :  { %v5048_v20 = vrot.slane %v5044_v27, 6  ;;  %v19501_v21 = vsel %vm9291_vm13, %v19450_v35, %v5044_v27 }
0x17da   :  { %v5049_v24 = vsel %vm1347_vm5, %v5048_v20, %v5047_v14 }
0x17db   :  { %5050 = vrot.lane.b32.xlu1 %v5049_v24, %s18916_s7 }
0x184d   :  { %v5051_v25 = vpop.permute.xlu1 %5050 }
0x184e   :  { %v5052_v26 = vsel %vm827_vm6, %v5051_v25, 0 }
0x184f   :  { %v5121_v29 = vand.u32 4294901760, %v5052_v26 }
0x1851   :  { %v5122_v30 = vsub.f32 %v5052_v26, %v5121_v29 }
0x1853   :  { %v5123_v31 = vand.u32 4294901760, %v5122_v30 }
0x1855   :  { %v5124_v32 = vsub.f32 %v5122_v30, %v5123_v31 }
0x1857   :  { %v5125_v34 = vand.u32 4294901760, %v5124_v32 }
0x1859   :  { %16216 = vmatmul.mubr.f32.vlgmr.msra.gmra.mrb[10].mxu1 %v5125_v34 }
0x185a   :  { %17548 = vmatpush3.bf16.msra.mxu1 %v18997_v37  ;;  %16222 = vmatprep.mubr.msk.f32.mxu1 %vm18908_vm0, %v18909_v2 }
0x185b   :  { %17549 = vmatprep.subr.bf16.mxu1 %v18904_v0 }
0x1861   :  { %16223 = vmatmul.mubr.f32.vlgmr.msra.gmra.mrb[10].mxu1 %v5121_v29 }
0x1862   :  { %17551 = vmatpush3.bf16.msra.mxu1 %v19003_v41  ;;  %16229 = vmatprep.mubr.msk.f32.mxu1 %vm18908_vm0, %v18909_v2 }
0x1863   :  { %17552 = vmatprep.subr.bf16.mxu1 %v18904_v0 }
0x1869   :  { %16230 = vmatmul.mubr.f32.vlgmr.msra.gmra.mrb[10].mxu1 %v5122_v30 }
0x186a   :  { %17554 = vmatpush3.bf16.msra.mxu1 %v19018_v44  ;;  %16236 = vmatprep.mubr.msk.f32.mxu1 %vm18908_vm0, %v18909_v2 }
0x186b   :  { %17555 = vmatprep.subr.bf16.mxu1 %v18904_v0 }
0x1871   :  { %16237 = vmatmul.mubr.f32.vlgmr.msra.gmra.mrb[10].mxu1 %v5123_v31 }
0x1872   :  { %17557 = vmatpush3.bf16.msra.mxu1 %v19027_v46  ;;  %16243 = vmatprep.mubr.msk.f32.mxu1 %vm18908_vm0, %v18909_v2 }
0x1873   :  { %17558 = vmatprep.subr.bf16.mxu1 %v18904_v0 }
0x1879   :  { %16244 = vmatmul.mubr.f32.vlgmr.msra.gmra.mrb[10].mxu1 %v5121_v29 }
0x187a   :  { %17560 = vmatpush3.bf16.msra.mxu1 %v19018_v44  ;;  %16250 = vmatprep.mubr.msk.f32.mxu1 %vm18908_vm0, %v18909_v2 }
0x187b   :  { %17579 = vmatprep.subr.bf16.mxu1 %v18904_v0 }
0x1881   :  { %16251 = vmatmul.mubr.f32.vlgmr.msra.gmra.mrb[10].mxu1 %v5121_v29 }
0x1882   :  { %17581 = vmatpush3.bf16.msra.mxu1 %v19018_v44  ;;  %16299 = vmatprep.mubr.msk.f32.mxu1 %vm18908_vm0, %v18909_v2 }
0x1883   :  { %17582 = vmatprep.subr.bf16.mxu1 %v18904_v0 }
0x1954   :  { %v5509_v33 = vpop.f32.mrb[10].mxu1 }
0x1955   :  { %v5514_v35 = vrot.slane %v5509_v33, 1  ;;  %v5517_v36 = vadd.f32 %v19116_v47, %v5509_v33  ;;  %v16252_v38 = vpop.f32.mrb[11].mxu1 }
0x1957   :  { %v5518_v39 = vadd.f32 %v19118_v53, %v5514_v35  ;;  %18733 = vtanh.f32 %v5517_v36  ;;  %v14986_v49 = vmul.f32 -1.442695, %v5517_v36 }
0x1959   :  { %18735 = vtanh.f32 %v5518_v39  ;;  %v14987_v22 = vmul.f32 -1.442695, %v5518_v39 }
0x195a   :  { %18737 = vpow2.f32 %v14986_v49 }
0x195b   :  { %18739 = vpow2.f32 %v14987_v22 }
0x1961   :  { %v18734_v40 = vpop.eup %18733 }
0x1962   :  { %5543 = vrot.lane.b32.xlu1 %v18734_v40, %s18913_s3 }
0x1963   :  { %v18736_v42 = vpop.eup %18735 }
0x1964   :  { %5545 = vrot.lane.b32.xlu0 %v18736_v42, %s18913_s3  ;;  %v18738_v23 = vpop.eup %18737 }
0x1965   :  { %v18740_v48 = vpop.eup %18739  ;;  %v5525_v50 = vadd.f32 1.0, %v18738_v23 }
0x1966   :  { %v5526_v43 = vadd.f32 1.0, %v18740_v48 }
0x1967   :  { %18741 = vrcp.f32 %v5525_v50 }
0x1968   :  { %18743 = vrcp.f32 %v5526_v43 }
0x1971   :  { %v18742_v45 = vpop.eup %18741 }
0x1972   :  { %v18744_v57 = vpop.eup %18743  ;;  %v5539_v60 = vmul.f32 %v18742_v45, %v5535_v55 }
0x1973   :  { %v5540_v56 = vmul.f32 %v18744_v57, %v5536_v61 }
0x19d4   :  { %v5544_v51 = vpop.permute.xlu1 %5543 }
0x19d5   :  { %v5549_v54 = vmul.f32 %v18742_v45, %v5544_v51 }
0x19d6   :  { %v5546_v58 = vpop.permute.xlu0 %5545 }
0x19d7   :  { %5553 = vrot.lane.b32.xlu1 %v5549_v54, %s18914_s4  ;;  %v5550_v52 = vmul.f32 %v18744_v57, %v5546_v58 }
0x19d9   :  { %5555 = vrot.lane.b32.xlu0 %v5550_v52, %s18914_s4 }
0x1a49   :  { %v5554_v62 = vpop.permute.xlu1 %5553 }
0x1a4a   :  { %v19538_v1 = vadd.f32 %v5554_v62, %v5539_v60 }
0x1a4b   :  { %v5556_v59 = vpop.permute.xlu0 %5555 }
0x1a4c   :  { %18745 = vtanh.f32 %v19538_v1  ;;  %v19541_v4 = vadd.f32 %v5556_v59, %v5540_v56  ;;  %v6062_v23 = vrot.slane %v19538_v1, 7 }
0x1a4e   :  { %18747 = vtanh.f32 %v19541_v4  ;;  %v6063_v49 = vrot.slane %v19541_v4, 7 }
0x1a56   :  { %v18746_v5 = vpop.eup %18745 }
0x1a57   :  { %5565 = vrot.lane.b32.xlu1 %v18746_v5, %s18915_s5 }
0x1a58   :  { %v18748_v63 = vpop.eup %18747 }
0x1a59   :  { %5567 = vrot.lane.b32.xlu0 %v18748_v63, %s18915_s5 }
0x1ac9   :  { %v5566_v3 = vpop.permute.xlu1 %5565 }
0x1aca   :  { %v19548_v8 = vmul.f32 %v18742_v45, %v5566_v3 }
0x1acb   :  { %v5568_v6 = vpop.permute.xlu0 %5567 }
0x1acc   :  { %v19546_v7 = vmul.f32 %v18744_v57, %v5568_v6 }
0x1ace   :  { %v5575_v10 = vrot.slane %v19546_v7, 7 }
0x1ad0   :  { %v5576_v12 = vsel %vm1347_vm5, %v5575_v10, %v19548_v8 }
0x1ad1   :  { %5577 = vrot.lane.b32.xlu0 %v5576_v12, %s18916_s7 }
0x1b43   :  { %v5578_v15 = vpop.permute.xlu0 %5577 }
0x1b44   :  { %v5579_v9 = vsel %vm827_vm6, %v5578_v15, 0 }
0x1b45   :  { %v5648_v11 = vand.u32 4294901760, %v5579_v9 }
0x1b47   :  { %v5649_v28 = vsub.f32 %v5579_v9, %v5648_v11 }
0x1b49   :  { %v5650_v13 = vand.u32 4294901760, %v5649_v28 }
0x1b4b   :  { %v5651_v16 = vsub.f32 %v5649_v28, %v5650_v13 }
0x1b4d   :  { %v5652_v17 = vand.u32 4294901760, %v5651_v16 }
0x1b4f   :  { %16258 = vmatmul.mubr.f32.vlgmr.msra.gmra.mrb[12].mxu0 %v5652_v17 }
0x1b50   :  { %17566 = vmatpush3.bf16.msra.mxu0 %v18997_v37  ;;  %16264 = vmatprep.mubr.msk.f32.mxu0 %vm18908_vm0, %v18909_v2 }
0x1b51   :  { %17567 = vmatprep.subr.bf16.mxu0 %v18904_v0 }
0x1b57   :  { %16265 = vmatmul.mubr.f32.vlgmr.msra.gmra.mrb[12].mxu0 %v5648_v11 }
0x1b58   :  { %17569 = vmatpush3.bf16.msra.mxu0 %v19003_v41  ;;  %16271 = vmatprep.mubr.msk.f32.mxu0 %vm18908_vm0, %v18909_v2 }
0x1b59   :  { %17570 = vmatprep.subr.bf16.mxu0 %v18904_v0 }
0x1b5f   :  { %16272 = vmatmul.mubr.f32.vlgmr.msra.gmra.mrb[12].mxu0 %v5649_v28 }
0x1b60   :  { %17572 = vmatpush3.bf16.msra.mxu0 %v19018_v44  ;;  %16278 = vmatprep.mubr.msk.f32.mxu0 %vm18908_vm0, %v18909_v2 }
0x1b61   :  { %17573 = vmatprep.subr.bf16.mxu0 %v18904_v0 }
0x1b67   :  { %16279 = vmatmul.mubr.f32.vlgmr.msra.gmra.mrb[12].mxu0 %v5650_v13 }
0x1b68   :  { %17575 = vmatpush3.bf16.msra.mxu0 %v19027_v46  ;;  %16285 = vmatprep.mubr.msk.f32.mxu0 %vm18908_vm0, %v18909_v2 }
0x1b69   :  { %17576 = vmatprep.subr.bf16.mxu0 %v18904_v0 }
0x1b6f   :  { %16286 = vmatmul.mubr.f32.vlgmr.msra.gmra.mrb[12].mxu0 %v5648_v11 }
0x1b70   :  { %17578 = vmatpush3.bf16.msra.mxu0 %v19018_v44  ;;  %16292 = vmatprep.mubr.msk.f32.mxu0 %vm18908_vm0, %v18909_v2 }
0x1b71   :  { %17597 = vmatprep.subr.bf16.mxu0 %v18904_v0 }
0x1b77   :  { %16293 = vmatmul.mubr.f32.vlgmr.msra.gmra.mrb[12].mxu0 %v5648_v11 }
0x1b78   :  { %17599 = vmatpush3.bf16.msra.mxu0 %v19018_v44  ;;  %16341 = vmatprep.mubr.msk.f32.mxu0 %vm18908_vm0, %v18909_v2 }
0x1b79   :  { %17600 = vmatprep.subr.bf16.mxu0 %v18904_v0 }
0x1c4a   :  { %v6036_v18 = vpop.f32.mrb[12].mxu0 }
0x1c4b   :  { %v6041_v27 = vrot.slane %v6036_v18, 7  ;;  %v6045_v14 = vadd.f32 %v19118_v53, %v6036_v18  ;;  %v16294_v20 = vpop.f32.mrb[13].mxu0 }
0x1c4d   :  { %v6044_v24 = vadd.f32 %v19116_v47, %v6041_v27  ;;  %18749 = vtanh.f32 %v6045_v14  ;;  %v14989_v29 = vmul.f32 -1.442695, %v6045_v14 }
0x1c4f   :  { %18751 = vtanh.f32 %v6044_v24  ;;  %v14988_v30 = vmul.f32 -1.442695, %v6044_v24 }
0x1c50   :  { %18753 = vpow2.f32 %v14989_v29 }
0x1c51   :  { %18755 = vpow2.f32 %v14988_v30 }
0x1c57   :  { %v18750_v25 = vpop.eup %18749 }
0x1c58   :  { %6072 = vrot.lane.b32.xlu0 %v18750_v25, %s18913_s3 }
0x1c59   :  { %v18752_v26 = vpop.eup %18751 }
0x1c5a   :  { %6070 = vrot.lane.b32.xlu1 %v18752_v26, %s18913_s3  ;;  %v18754_v31 = vpop.eup %18753 }
0x1c5b   :  { %v18756_v32 = vpop.eup %18755  ;;  %v6053_v34 = vadd.f32 1.0, %v18754_v31 }
0x1c5c   :  { %v6052_v33 = vadd.f32 1.0, %v18756_v32 }
0x1c5d   :  { %18757 = vrcp.f32 %v6053_v34 }
0x1c5e   :  { %18759 = vrcp.f32 %v6052_v33 }
0x1c67   :  { %v18758_v35 = vpop.eup %18757 }
0x1c68   :  { %v18760_v39 = vpop.eup %18759  ;;  %v6067_v22 = vmul.f32 %v18758_v35, %v6063_v49 }
0x1c69   :  { %v6066_v43 = vmul.f32 %v18760_v39, %v6062_v23 }
0x1cca   :  { %v6073_v36 = vpop.permute.xlu0 %6072 }
0x1ccb   :  { %v6077_v38 = vmul.f32 %v18758_v35, %v6073_v36 }
0x1ccc   :  { %v6071_v40 = vpop.permute.xlu1 %6070 }
0x1ccd   :  { %6082 = vrot.lane.b32.xlu0 %v6077_v38, %s18914_s4  ;;  %v6076_v42 = vmul.f32 %v18760_v39, %v6071_v40 }
0x1ccf   :  { %6080 = vrot.lane.b32.xlu1 %v6076_v42, %s18914_s4 }
0x1d3f   :  { %v6083_v48 = vpop.permute.xlu0 %6082 }
0x1d40   :  { %v19587_v50 = vadd.f32 %v6083_v48, %v6067_v22 }
0x1d41   :  { %v6081_v45 = vpop.permute.xlu1 %6080 }
0x1d42   :  { %18761 = vtanh.f32 %v19587_v50  ;;  %v19590_v51 = vadd.f32 %v6081_v45, %v6066_v43  ;;  %v6591_v34 = vrot.slane %v19587_v50, 7 }
0x1d44   :  { %18763 = vtanh.f32 %v19590_v51  ;;  %v6590_v32 = vrot.slane %v19590_v51, 7 }
0x1d4c   :  { %v18762_v54 = vpop.eup %18761 }
0x1d4d   :  { %6094 = vrot.lane.b32.xlu0 %v18762_v54, %s18915_s5 }
0x1d4e   :  { %v18764_v57 = vpop.eup %18763 }
0x1d4f   :  { %6092 = vrot.lane.b32.xlu1 %v18764_v57, %s18915_s5 }
0x1dbf   :  { %v6095_v58 = vpop.permute.xlu0 %6094 }
0x1dc0   :  { %v19597_v60 = vmul.f32 %v18758_v35, %v6095_v58 }
0x1dc1   :  { %v6093_v52 = vpop.permute.xlu1 %6092 }
0x1dc2   :  { %v19595_v55 = vmul.f32 %v18760_v39, %v6093_v52  ;;  %v9295_v45 = vsel %vm9273_vm7, %v19546_v7, %v19597_v60 }
0x1dc4   :  { %v6102_v61 = vrot.slane %v19595_v55, 1  ;;  %v9294_v50 = vsel %vm9273_vm7, %v19548_v8, %v19595_v55 }
0x1dc6   :  { %v6103_v62 = vsel %vm1347_vm5, %v19597_v60, %v6102_v61 }
0x1dc7   :  { %6104 = vrot.lane.b32.xlu1 %v6103_v62, %s18916_s7 }
0x1e39   :  { %v6105_v1 = vpop.permute.xlu1 %6104 }
0x1e3a   :  { %v6106_v56 = vsel %vm827_vm6, %v6105_v1, 0 }
0x1e3b   :  { %v6175_v59 = vand.u32 4294901760, %v6106_v56 }
0x1e3d   :  { %v6176_v4 = vsub.f32 %v6106_v56, %v6175_v59 }
0x1e3f   :  { %v6177_v5 = vand.u32 4294901760, %v6176_v4 }
0x1e41   :  { %v6178_v63 = vsub.f32 %v6176_v4, %v6177_v5 }
0x1e43   :  { %v6179_v3 = vand.u32 4294901760, %v6178_v63 }
0x1e45   :  { %16300 = vmatmul.mubr.f32.vlgmr.msra.gmra.mrb[12].mxu1 %v6179_v3 }
0x1e46   :  { %17584 = vmatpush3.bf16.msra.mxu1 %v18997_v37  ;;  %16306 = vmatprep.mubr.msk.f32.mxu1 %vm18908_vm0, %v18909_v2 }
0x1e47   :  { %17585 = vmatprep.subr.bf16.mxu1 %v18904_v0 }
0x1e4d   :  { %16307 = vmatmul.mubr.f32.vlgmr.msra.gmra.mrb[12].mxu1 %v6175_v59 }
0x1e4e   :  { %17587 = vmatpush3.bf16.msra.mxu1 %v19003_v41  ;;  %16313 = vmatprep.mubr.msk.f32.mxu1 %vm18908_vm0, %v18909_v2 }
0x1e4f   :  { %17588 = vmatprep.subr.bf16.mxu1 %v18904_v0 }
0x1e55   :  { %16314 = vmatmul.mubr.f32.vlgmr.msra.gmra.mrb[12].mxu1 %v6176_v4 }
0x1e56   :  { %17590 = vmatpush3.bf16.msra.mxu1 %v19018_v44  ;;  %16320 = vmatprep.mubr.msk.f32.mxu1 %vm18908_vm0, %v18909_v2 }
0x1e57   :  { %17591 = vmatprep.subr.bf16.mxu1 %v18904_v0 }
0x1e5d   :  { %16321 = vmatmul.mubr.f32.vlgmr.msra.gmra.mrb[12].mxu1 %v6177_v5 }
0x1e5e   :  { %17593 = vmatpush3.bf16.msra.mxu1 %v19027_v46  ;;  %16327 = vmatprep.mubr.msk.f32.mxu1 %vm18908_vm0, %v18909_v2 }
0x1e5f   :  { %17594 = vmatprep.subr.bf16.mxu1 %v18904_v0 }
0x1e65   :  { %16328 = vmatmul.mubr.f32.vlgmr.msra.gmra.mrb[12].mxu1 %v6175_v59 }
0x1e66   :  { %17596 = vmatpush3.bf16.msra.mxu1 %v19018_v44  ;;  %16334 = vmatprep.mubr.msk.f32.mxu1 %vm18908_vm0, %v18909_v2 }
0x1e67   :  { %17615 = vmatprep.subr.bf16.mxu1 %v18904_v0 }
0x1e6d   :  { %16335 = vmatmul.mubr.f32.vlgmr.msra.gmra.mrb[12].mxu1 %v6175_v59 }
0x1e6e   :  { %17617 = vmatpush3.bf16.msra.mxu1 %v19018_v44  ;;  %16383 = vmatprep.mubr.msk.f32.mxu1 %vm18908_vm0, %v18909_v2 }
0x1e6f   :  { %17618 = vmatprep.subr.bf16.mxu1 %v18904_v0 }
0x1f40   :  { %v6563_v6 = vpop.f32.mrb[12].mxu1 }
0x1f41   :  { %v6568_v10 = vrot.slane %v6563_v6, 6  ;;  %v6569_v12 = vrot.slane %v6563_v6, 7  ;;  %v16336_v15 = vpop.f32.mrb[13].mxu1 }
0x1f43   :  { %v6572_v9 = vadd.f32 %v19116_v47, %v6568_v10  ;;  %v6573_v11 = vadd.f32 %v19118_v53, %v6569_v12 }
0x1f45   :  { %18765 = vtanh.f32 %v6572_v9  ;;  %v14990_v16 = vmul.f32 -1.442695, %v6572_v9  ;;  %v14991_v17 = vmul.f32 -1.442695, %v6573_v11 }
0x1f46   :  { %18767 = vtanh.f32 %v6573_v11 }
0x1f47   :  { %18769 = vpow2.f32 %v14990_v16 }
0x1f48   :  { %18771 = vpow2.f32 %v14991_v17 }
0x1f4f   :  { %v18766_v28 = vpop.eup %18765 }
0x1f50   :  { %v18768_v13 = vpop.eup %18767  ;;  %6598 = vrot.lane.b32.xlu0 %v18766_v28, %s18913_s3 }
0x1f51   :  { %6600 = vrot.lane.b32.xlu1 %v18768_v13, %s18913_s3  ;;  %v18770_v18 = vpop.eup %18769 }
0x1f52   :  { %v18772_v27 = vpop.eup %18771  ;;  %v6580_v14 = vadd.f32 1.0, %v18770_v18 }
0x1f53   :  { %v6581_v20 = vadd.f32 1.0, %v18772_v27 }
0x1f54   :  { %18773 = vrcp.f32 %v6580_v14 }
0x1f55   :  { %18775 = vrcp.f32 %v6581_v20 }
0x1f5e   :  { %v18774_v24 = vpop.eup %18773 }
0x1f5f   :  { %v18776_v26 = vpop.eup %18775  ;;  %v6594_v33 = vmul.f32 %v18774_v24, %v6590_v32 }
0x1f60   :  { %v6595_v35 = vmul.f32 %v18776_v26, %v6591_v34 }
0x1fc2   :  { %v6599_v25 = vpop.permute.xlu0 %6598 }
0x1fc3   :  { %v6601_v29 = vpop.permute.xlu1 %6600  ;;  %v6604_v30 = vmul.f32 %v18774_v24, %v6599_v25 }
0x1fc4   :  { %v6605_v31 = vmul.f32 %v18776_v26, %v6601_v29 }
0x1fc5   :  { %6608 = vrot.lane.b32.xlu0 %v6604_v30, %s18914_s4 }
0x1fc6   :  { %6610 = vrot.lane.b32.xlu1 %v6605_v31, %s18914_s4 }
0x2037   :  { %v6609_v36 = vpop.permute.xlu0 %6608 }
0x2038   :  { %v6611_v38 = vpop.permute.xlu1 %6610  ;;  %v19636_v39 = vadd.f32 %v6609_v36, %v6594_v33 }
0x2039   :  { %v19638_v40 = vadd.f32 %v6611_v38, %v6595_v35 }
0x203a   :  { %18777 = vtanh.f32 %v19636_v39 }
0x203b   :  { %18779 = vtanh.f32 %v19638_v40  ;;  %v7120_v25 = vrot.slane %v19638_v40, 7 }
0x2044   :  { %v18778_v42 = vpop.eup %18777 }
0x2045   :  { %v18780_v49 = vpop.eup %18779  ;;  %6620 = vrot.lane.b32.xlu0 %v18778_v42, %s18915_s5 }
0x2046   :  { %6622 = vrot.lane.b32.xlu1 %v18780_v49, %s18915_s5 }
0x20b7   :  { %v6621_v22 = vpop.permute.xlu0 %6620 }
0x20b8   :  { %v6623_v23 = vpop.permute.xlu1 %6622  ;;  %v6626_v48 = vmul.f32 %v18774_v24, %v6621_v22  ;;  %v7119_v24 = vrot.slane %v19636_v39, 7 }
0x20b9   :  { %v6627_v43 = vmul.f32 %v18776_v26, %v6623_v23 }
0x20ba   :  { %v6630_v51 = vrot.slane %v6626_v48, 2  ;;  %v19651_v54 = vsel %vm9276_vm8, %v9294_v50, %v6626_v48 }
0x20bb   :  { %v6631_v57 = vrot.slane %v6627_v43, 1  ;;  %v19654_v58 = vsel %vm9276_vm8, %v9295_v45, %v6627_v43 }
0x20bd   :  { %v6632_v52 = vsel %vm1347_vm5, %v6631_v57, %v6630_v51 }
0x20be   :  { %6633 = vrot.lane.b32.xlu0 %v6632_v52, %s18916_s7 }
0x2130   :  { %v6634_v61 = vpop.permute.xlu0 %6633 }
0x2131   :  { %v6635_v8 = vsel %vm827_vm6, %v6634_v61, 0 }
0x2132   :  { %v6704_v55 = vand.u32 4294901760, %v6635_v8 }
0x2134   :  { %v6705_v62 = vsub.f32 %v6635_v8, %v6704_v55 }
0x2136   :  { %v6706_v1 = vand.u32 4294901760, %v6705_v62 }
0x2138   :  { %v6707_v56 = vsub.f32 %v6705_v62, %v6706_v1 }
0x213a   :  { %v6708_v7 = vand.u32 4294901760, %v6707_v56 }
0x213c   :  { %16342 = vmatmul.mubr.f32.vlgmr.msra.gmra.mrb[14].mxu0 %v6708_v7 }
0x213d   :  { %17602 = vmatpush3.bf16.msra.mxu0 %v18997_v37  ;;  %16348 = vmatprep.mubr.msk.f32.mxu0 %vm18908_vm0, %v18909_v2 }
0x213e   :  { %17603 = vmatprep.subr.bf16.mxu0 %v18904_v0 }
0x2144   :  { %16349 = vmatmul.mubr.f32.vlgmr.msra.gmra.mrb[14].mxu0 %v6704_v55 }
0x2145   :  { %17605 = vmatpush3.bf16.msra.mxu0 %v19003_v41  ;;  %16355 = vmatprep.mubr.msk.f32.mxu0 %vm18908_vm0, %v18909_v2 }
0x2146   :  { %17606 = vmatprep.subr.bf16.mxu0 %v18904_v0 }
0x214c   :  { %16356 = vmatmul.mubr.f32.vlgmr.msra.gmra.mrb[14].mxu0 %v6705_v62 }
0x214d   :  { %17608 = vmatpush3.bf16.msra.mxu0 %v19018_v44  ;;  %16362 = vmatprep.mubr.msk.f32.mxu0 %vm18908_vm0, %v18909_v2 }
0x214e   :  { %17609 = vmatprep.subr.bf16.mxu0 %v18904_v0 }
0x2154   :  { %16363 = vmatmul.mubr.f32.vlgmr.msra.gmra.mrb[14].mxu0 %v6706_v1 }
0x2155   :  { %17611 = vmatpush3.bf16.msra.mxu0 %v19027_v46  ;;  %16369 = vmatprep.mubr.msk.f32.mxu0 %vm18908_vm0, %v18909_v2 }
0x2156   :  { %17612 = vmatprep.subr.bf16.mxu0 %v18904_v0 }
0x215c   :  { %16370 = vmatmul.mubr.f32.vlgmr.msra.gmra.mrb[14].mxu0 %v6704_v55 }
0x215d   :  { %17614 = vmatpush3.bf16.msra.mxu0 %v19018_v44  ;;  %16376 = vmatprep.mubr.msk.f32.mxu0 %vm18908_vm0, %v18909_v2 }
0x215e   :  { %17633 = vmatprep.subr.bf16.mxu0 %v18904_v0 }
0x2164   :  { %16377 = vmatmul.mubr.f32.vlgmr.msra.gmra.mrb[14].mxu0 %v6704_v55 }
0x2165   :  { %17635 = vmatpush3.bf16.msra.mxu0 %v19018_v44  ;;  %16425 = vmatprep.mubr.msk.f32.mxu0 %vm18908_vm0, %v18909_v2 }
0x2166   :  { %17636 = vmatprep.subr.bf16.mxu0 %v18904_v0 }
0x2237   :  { %v7092_v60 = vpop.f32.mrb[14].mxu0 }
0x2238   :  { %v7097_v59 = vrot.slane %v7092_v60, 5  ;;  %v7098_v4 = vrot.slane %v7092_v60, 6  ;;  %v16378_v5 = vpop.f32.mrb[15].mxu0 }
0x223a   :  { %v7101_v63 = vadd.f32 %v19116_v47, %v7097_v59  ;;  %v7102_v3 = vadd.f32 %v19118_v53, %v7098_v4 }
0x223c   :  { %18781 = vtanh.f32 %v7101_v63  ;;  %v14992_v12 = vmul.f32 -1.442695, %v7101_v63  ;;  %v14993_v15 = vmul.f32 -1.442695, %v7102_v3 }
0x223d   :  { %18783 = vtanh.f32 %v7102_v3 }
0x223e   :  { %18785 = vpow2.f32 %v14992_v12 }
0x223f   :  { %18787 = vpow2.f32 %v14993_v15 }
0x2246   :  { %v18782_v6 = vpop.eup %18781 }
0x2247   :  { %v18784_v10 = vpop.eup %18783  ;;  %7127 = vrot.lane.b32.xlu1 %v18782_v6, %s18913_s3 }
0x2248   :  { %7129 = vrot.lane.b32.xlu0 %v18784_v10, %s18913_s3  ;;  %v18786_v9 = vpop.eup %18785 }
0x2249   :  { %v18788_v11 = vpop.eup %18787  ;;  %v7109_v28 = vadd.f32 1.0, %v18786_v9 }
0x224a   :  { %v7110_v13 = vadd.f32 1.0, %v18788_v11 }
0x224b   :  { %18789 = vrcp.f32 %v7109_v28 }
0x224c   :  { %18791 = vrcp.f32 %v7110_v13 }
0x2255   :  { %v18790_v16 = vpop.eup %18789 }
0x2256   :  { %v18792_v18 = vpop.eup %18791  ;;  %v7123_v26 = vmul.f32 %v18790_v16, %v7119_v24 }
0x2257   :  { %v7124_v29 = vmul.f32 %v18792_v18, %v7120_v25 }
0x22b9   :  { %v7128_v17 = vpop.permute.xlu1 %7127 }
0x22ba   :  { %v7130_v27 = vpop.permute.xlu0 %7129  ;;  %v7133_v14 = vmul.f32 %v18790_v16, %v7128_v17 }
0x22bb   :  { %v7134_v20 = vmul.f32 %v18792_v18, %v7130_v27 }
0x22bc   :  { %7137 = vrot.lane.b32.xlu1 %v7133_v14, %s18914_s4 }
0x22bd   :  { %7139 = vrot.lane.b32.xlu0 %v7134_v20, %s18914_s4 }
0x232e   :  { %v7138_v30 = vpop.permute.xlu1 %7137 }
0x232f   :  { %v7140_v31 = vpop.permute.xlu0 %7139  ;;  %v19691_v32 = vadd.f32 %v7138_v30, %v7123_v26 }
0x2330   :  { %v19693_v34 = vadd.f32 %v7140_v31, %v7124_v29 }
0x2331   :  { %18793 = vtanh.f32 %v19691_v32  ;;  %v7648_v28 = vrot.slane %v19691_v32, 7 }
0x2332   :  { %18795 = vtanh.f32 %v19693_v34  ;;  %v7649_v13 = vrot.slane %v19693_v34, 7 }
0x233b   :  { %v18794_v33 = vpop.eup %18793 }
0x233c   :  { %v18796_v35 = vpop.eup %18795  ;;  %7149 = vrot.lane.b32.xlu1 %v18794_v33, %s18915_s5 }
0x233d   :  { %7151 = vrot.lane.b32.xlu0 %v18796_v35, %s18915_s5 }
0x23ae   :  { %v7150_v36 = vpop.permute.xlu1 %7149 }
0x23af   :  { %v7152_v38 = vpop.permute.xlu0 %7151  ;;  %v7155_v39 = vmul.f32 %v18790_v16, %v7150_v36 }
0x23b0   :  { %v7156_v40 = vmul.f32 %v18792_v18, %v7152_v38 }
0x23b1   :  { %v7159_v42 = vrot.slane %v7155_v39, 3  ;;  %v19701_v49 = vsel %vm9279_vm9, %v19651_v54, %v7155_v39 }
0x23b2   :  { %v7160_v22 = vrot.slane %v7156_v40, 2  ;;  %v19705_v23 = vsel %vm9279_vm9, %v19654_v58, %v7156_v40  ;;  %vm10159_vm9 = vcmask 588800  }
0x23b4   :  { %v7161_v48 = vsel %vm1347_vm5, %v7160_v22, %v7159_v42 }
0x23b5   :  { %7162 = vrot.lane.b32.xlu1 %v7161_v48, %s18916_s7 }
0x2427   :  { %v7163_v50 = vpop.permute.xlu1 %7162 }
0x2428   :  { %v7164_v43 = vsel %vm827_vm6, %v7163_v50, 0 }
0x2429   :  { %v7233_v45 = vand.u32 4294901760, %v7164_v43 }
0x242b   :  { %v7234_v51 = vsub.f32 %v7164_v43, %v7233_v45 }
0x242d   :  { %v7235_v57 = vand.u32 4294901760, %v7234_v51 }
0x242f   :  { %v7236_v52 = vsub.f32 %v7234_v51, %v7235_v57 }
0x2431   :  { %v7237_v61 = vand.u32 4294901760, %v7236_v52 }
0x2433   :  { %16384 = vmatmul.mubr.f32.vlgmr.msra.gmra.mrb[14].mxu1 %v7237_v61 }
0x2434   :  { %17620 = vmatpush3.bf16.msra.mxu1 %v18997_v37  ;;  %16390 = vmatprep.mubr.msk.f32.mxu1 %vm18908_vm0, %v18909_v2 }
0x2435   :  { %17621 = vmatprep.subr.bf16.mxu1 %v18904_v0 }
0x243b   :  { %16391 = vmatmul.mubr.f32.vlgmr.msra.gmra.mrb[14].mxu1 %v7233_v45 }
0x243c   :  { %17623 = vmatpush3.bf16.msra.mxu1 %v19003_v41  ;;  %16397 = vmatprep.mubr.msk.f32.mxu1 %vm18908_vm0, %v18909_v2 }
0x243d   :  { %17624 = vmatprep.subr.bf16.mxu1 %v18904_v0 }
0x2443   :  { %16398 = vmatmul.mubr.f32.vlgmr.msra.gmra.mrb[14].mxu1 %v7234_v51 }
0x2444   :  { %17626 = vmatpush3.bf16.msra.mxu1 %v19018_v44  ;;  %16404 = vmatprep.mubr.msk.f32.mxu1 %vm18908_vm0, %v18909_v2 }
0x2445   :  { %17627 = vmatprep.subr.bf16.mxu1 %v18904_v0 }
0x244b   :  { %16405 = vmatmul.mubr.f32.vlgmr.msra.gmra.mrb[14].mxu1 %v7235_v57 }
0x244c   :  { %17629 = vmatpush3.bf16.msra.mxu1 %v19027_v46  ;;  %16411 = vmatprep.mubr.msk.f32.mxu1 %vm18908_vm0, %v18909_v2 }
0x244d   :  { %17630 = vmatprep.subr.bf16.mxu1 %v18904_v0 }
0x2453   :  { %16412 = vmatmul.mubr.f32.vlgmr.msra.gmra.mrb[14].mxu1 %v7233_v45 }
0x2454   :  { %17632 = vmatpush3.bf16.msra.mxu1 %v19018_v44  ;;  %16418 = vmatprep.mubr.msk.f32.mxu1 %vm18908_vm0, %v18909_v2 }
0x2455   :  { %17651 = vmatprep.subr.bf16.mxu1 %v18904_v0 }
0x245b   :  { %16419 = vmatmul.mubr.f32.vlgmr.msra.gmra.mrb[14].mxu1 %v7233_v45 }
0x245c   :  { %17653 = vmatpush3.bf16.msra.mxu1 %v19018_v44  ;;  %16467 = vmatprep.mubr.msk.f32.mxu1 %vm18908_vm0, %v18909_v2 }
0x245d   :  { %17654 = vmatprep.subr.bf16.mxu1 %v18904_v0 }
0x252e   :  { %v7621_v54 = vpop.f32.mrb[14].mxu1 }
0x252f   :  { %v7626_v58 = vrot.slane %v7621_v54, 4  ;;  %v7627_v8 = vrot.slane %v7621_v54, 5  ;;  %v16420_v55 = vpop.f32.mrb[15].mxu1 }
0x2531   :  { %v7630_v62 = vadd.f32 %v19116_v47, %v7626_v58  ;;  %v7631_v1 = vadd.f32 %v19118_v53, %v7627_v8 }
0x2533   :  { %18797 = vtanh.f32 %v7630_v62  ;;  %v14994_v60 = vmul.f32 -1.442695, %v7630_v62  ;;  %v14995_v59 = vmul.f32 -1.442695, %v7631_v1 }
0x2534   :  { %18799 = vtanh.f32 %v7631_v1 }
0x2535   :  { %18801 = vpow2.f32 %v14994_v60 }
0x2536   :  { %18803 = vpow2.f32 %v14995_v59 }
0x253d   :  { %v18798_v56 = vpop.eup %18797 }
0x253e   :  { %v18800_v7 = vpop.eup %18799  ;;  %7656 = vrot.lane.b32.xlu0 %v18798_v56, %s18913_s3 }
0x253f   :  { %7658 = vrot.lane.b32.xlu1 %v18800_v7, %s18913_s3  ;;  %v18802_v4 = vpop.eup %18801 }
0x2540   :  { %v18804_v5 = vpop.eup %18803  ;;  %v7638_v63 = vadd.f32 1.0, %v18802_v4 }
0x2541   :  { %v7639_v3 = vadd.f32 1.0, %v18804_v5 }
0x2542   :  { %18805 = vrcp.f32 %v7638_v63 }
0x2543   :  { %18807 = vrcp.f32 %v7639_v3 }
0x254c   :  { %v18806_v6 = vpop.eup %18805 }
0x254d   :  { %v18808_v12 = vpop.eup %18807  ;;  %v7652_v16 = vmul.f32 %v18806_v6, %v7648_v28 }
0x254e   :  { %v7653_v17 = vmul.f32 %v18808_v12, %v7649_v13 }
0x25b0   :  { %v7657_v10 = vpop.permute.xlu0 %7656 }
0x25b1   :  { %v7659_v15 = vpop.permute.xlu1 %7658  ;;  %v7662_v9 = vmul.f32 %v18806_v6, %v7657_v10 }
0x25b2   :  { %v7663_v11 = vmul.f32 %v18808_v12, %v7659_v15 }
0x25b3   :  { %7666 = vrot.lane.b32.xlu0 %v7662_v9, %s18914_s4 }
0x25b4   :  { %7668 = vrot.lane.b32.xlu1 %v7663_v11, %s18914_s4 }
0x2625   :  { %v7667_v18 = vpop.permute.xlu0 %7666 }
0x2626   :  { %v7669_v27 = vpop.permute.xlu1 %7668  ;;  %v19742_v14 = vadd.f32 %v7667_v18, %v7652_v16 }
0x2627   :  { %v19744_v20 = vadd.f32 %v7669_v27, %v7653_v17 }
0x2628   :  { %18809 = vtanh.f32 %v19742_v14  ;;  %v8177_v63 = vrot.slane %v19742_v14, 7 }
0x2629   :  { %18811 = vtanh.f32 %v19744_v20  ;;  %v8178_v3 = vrot.slane %v19744_v20, 7 }
0x2632   :  { %v18810_v24 = vpop.eup %18809 }
0x2633   :  { %v18812_v25 = vpop.eup %18811  ;;  %7678 = vrot.lane.b32.xlu0 %v18810_v24, %s18915_s5 }
0x2634   :  { %7680 = vrot.lane.b32.xlu1 %v18812_v25, %s18915_s5 }
0x26a5   :  { %v7679_v26 = vpop.permute.xlu0 %7678 }
0x26a6   :  { %v7681_v29 = vpop.permute.xlu1 %7680  ;;  %v7684_v30 = vmul.f32 %v18806_v6, %v7679_v26 }
0x26a7   :  { %v7685_v31 = vmul.f32 %v18808_v12, %v7681_v29 }
0x26a8   :  { %v7688_v32 = vrot.slane %v7684_v30, 4  ;;  %v19752_v34 = vsel %vm9282_vm10, %v19701_v49, %v7684_v30 }
0x26a9   :  { %v7689_v33 = vrot.slane %v7685_v31, 3  ;;  %v19756_v35 = vsel %vm9282_vm10, %v19705_v23, %v7685_v31 }
0x26ab   :  { %v7690_v36 = vsel %vm1347_vm5, %v7689_v33, %v7688_v32 }
0x26ac   :  { %7691 = vrot.lane.b32.xlu0 %v7690_v36, %s18916_s7 }
0x271e   :  { %v7692_v38 = vpop.permute.xlu0 %7691 }
0x271f   :  { %v7693_v39 = vsel %vm827_vm6, %v7692_v38, 0 }
0x2720   :  { %v7762_v40 = vand.u32 4294901760, %v7693_v39 }
0x2722   :  { %v7763_v42 = vsub.f32 %v7693_v39, %v7762_v40 }
0x2724   :  { %v7764_v22 = vand.u32 4294901760, %v7763_v42 }
0x2726   :  { %v7765_v48 = vsub.f32 %v7763_v42, %v7764_v22 }
0x2728   :  { %v7766_v50 = vand.u32 4294901760, %v7765_v48 }
0x272a   :  { %16426 = vmatmul.mubr.f32.vlgmr.msra.gmra.mrb[16].mxu0 %v7766_v50 }
0x272b   :  { %17638 = vmatpush3.bf16.msra.mxu0 %v18997_v37  ;;  %16432 = vmatprep.mubr.msk.f32.mxu0 %vm18908_vm0, %v18909_v2 }
0x272c   :  { %17639 = vmatprep.subr.bf16.mxu0 %v18904_v0 }
0x2732   :  { %16433 = vmatmul.mubr.f32.vlgmr.msra.gmra.mrb[16].mxu0 %v7762_v40 }
0x2733   :  { %17641 = vmatpush3.bf16.msra.mxu0 %v19003_v41  ;;  %16439 = vmatprep.mubr.msk.f32.mxu0 %vm18908_vm0, %v18909_v2 }
0x2734   :  { %17642 = vmatprep.subr.bf16.mxu0 %v18904_v0 }
0x273a   :  { %16440 = vmatmul.mubr.f32.vlgmr.msra.gmra.mrb[16].mxu0 %v7763_v42 }
0x273b   :  { %17644 = vmatpush3.bf16.msra.mxu0 %v19018_v44  ;;  %16446 = vmatprep.mubr.msk.f32.mxu0 %vm18908_vm0, %v18909_v2 }
0x273c   :  { %17645 = vmatprep.subr.bf16.mxu0 %v18904_v0 }
0x2742   :  { %16447 = vmatmul.mubr.f32.vlgmr.msra.gmra.mrb[16].mxu0 %v7764_v22 }
0x2743   :  { %17647 = vmatpush3.bf16.msra.mxu0 %v19027_v46  ;;  %16453 = vmatprep.mubr.msk.f32.mxu0 %vm18908_vm0, %v18909_v2 }
0x2744   :  { %17648 = vmatprep.subr.bf16.mxu0 %v18904_v0 }
0x274a   :  { %16454 = vmatmul.mubr.f32.vlgmr.msra.gmra.mrb[16].mxu0 %v7762_v40 }
0x274b   :  { %17650 = vmatpush3.bf16.msra.mxu0 %v19018_v44  ;;  %16460 = vmatprep.mubr.msk.f32.mxu0 %vm18908_vm0, %v18909_v2 }
0x274c   :  { %17669 = vmatprep.subr.bf16.mxu0 %v18904_v0 }
0x2752   :  { %16461 = vmatmul.mubr.f32.vlgmr.msra.gmra.mrb[16].mxu0 %v7762_v40 }
0x2753   :  { %17671 = vmatpush3.bf16.msra.mxu0 %v19018_v44  ;;  %16509 = vmatprep.mubr.msk.f32.mxu0 %vm18908_vm0, %v18909_v2 }
0x2754   :  { %17672 = vmatprep.subr.bf16.mxu0 %v18904_v0 }
0x2825   :  { %v8150_v49 = vpop.f32.mrb[16].mxu0 }
0x2826   :  { %v8155_v23 = vrot.slane %v8150_v49, 3  ;;  %v8156_v43 = vrot.slane %v8150_v49, 4  ;;  %v16462_v45 = vpop.f32.mrb[17].mxu0 }
0x2828   :  { %v8159_v51 = vadd.f32 %v19116_v47, %v8155_v23  ;;  %v8160_v57 = vadd.f32 %v19118_v53, %v8156_v43 }
0x282a   :  { %18813 = vtanh.f32 %v8159_v51  ;;  %v14996_v54 = vmul.f32 -1.442695, %v8159_v51  ;;  %v14997_v58 = vmul.f32 -1.442695, %v8160_v57 }
0x282b   :  { %18815 = vtanh.f32 %v8160_v57 }
0x282c   :  { %18817 = vpow2.f32 %v14996_v54 }
0x282d   :  { %18819 = vpow2.f32 %v14997_v58 }
0x2834   :  { %v18814_v52 = vpop.eup %18813 }
0x2835   :  { %v18816_v61 = vpop.eup %18815  ;;  %8185 = vrot.lane.b32.xlu1 %v18814_v52, %s18913_s3 }
0x2836   :  { %8187 = vrot.lane.b32.xlu0 %v18816_v61, %s18913_s3  ;;  %v18818_v8 = vpop.eup %18817 }
0x2837   :  { %v18820_v55 = vpop.eup %18819  ;;  %v8167_v62 = vadd.f32 1.0, %v18818_v8 }
0x2838   :  { %v8168_v1 = vadd.f32 1.0, %v18820_v55 }
0x2839   :  { %18821 = vrcp.f32 %v8167_v62 }
0x283a   :  { %18823 = vrcp.f32 %v8168_v1 }
0x2843   :  { %v18822_v56 = vpop.eup %18821 }
0x2844   :  { %v18824_v60 = vpop.eup %18823  ;;  %v8181_v6 = vmul.f32 %v18822_v56, %v8177_v63  ;;  %v9308_v63 = vlaneseq }
0x2845   :  { %v8182_v10 = vmul.f32 %v18824_v60, %v8178_v3 }
0x2846   :  { %v19845_v3 = vshrl.u32 %v9308_v63, 7 }
0x28a7   :  { %v8186_v7 = vpop.permute.xlu1 %8185 }
0x28a8   :  { %v8188_v59 = vpop.permute.xlu0 %8187  ;;  %v8191_v4 = vmul.f32 %v18822_v56, %v8186_v7 }
0x28a9   :  { %v8192_v5 = vmul.f32 %v18824_v60, %v8188_v59 }
0x28aa   :  { %8195 = vrot.lane.b32.xlu1 %v8191_v4, %s18914_s4 }
0x28ab   :  { %8197 = vrot.lane.b32.xlu0 %v8192_v5, %s18914_s4 }
0x291c   :  { %v8196_v12 = vpop.permute.xlu1 %8195 }
0x291d   :  { %v8198_v15 = vpop.permute.xlu0 %8197  ;;  %v19793_v9 = vadd.f32 %v8196_v12, %v8181_v6  ;;  %v9317_v6 = vand.u32 15, %v19845_v3 }
0x291e   :  { %v19795_v11 = vadd.f32 %v8198_v15, %v8182_v10  ;;  %v19849_v10 = vld [vmem:[%s19049_s28] sm:$0xff] }
0x291f   :  { %18825 = vtanh.f32 %v19793_v9  ;;  %v8706_v62 = vrot.slane %v19793_v9, 7  ;;  %v9373_v12 = vrot.slane %v19849_v10, 7  ;;  %vm19852_vm14 = vcmp.eq.s32.totalorder %v9317_v6, 0 }
0x2920   :  { %18827 = vtanh.f32 %v19795_v11  ;;  %v8707_v1 = vrot.slane %v19795_v11, 7  ;;  %v9397_v63 = vrot.slane %v19849_v10, 1 }
0x2921   :  { %v9384_v11 = vsel %vm9273_vm7, %v19849_v10, %v9373_v12 }
0x2929   :  { %v18826_v28 = vpop.eup %18825 }
0x292a   :  { %v18828_v13 = vpop.eup %18827  ;;  %8207 = vrot.lane.b32.xlu1 %v18826_v28, %s18915_s5  ;;  %v9311_v28 = vadd.s32 16, %v19845_v3 }
0x292b   :  { %8209 = vrot.lane.b32.xlu0 %v18828_v13, %s18915_s5 }
0x299c   :  { %v8208_v16 = vpop.permute.xlu1 %8207 }
0x299d   :  { %v8210_v17 = vpop.permute.xlu0 %8209  ;;  %v8213_v18 = vmul.f32 %v18822_v56, %v8208_v16  ;;  %v9393_v16 = vsel %vm19852_vm14, 0.0, %v9384_v11 }
0x299e   :  { %v8214_v27 = vmul.f32 %v18824_v60, %v8210_v17  ;;  %v19864_v17 = vld [vmem:[%s19049_s28 + $0x8] sm:$0xff] }
0x299f   :  { %v8217_v14 = vrot.slane %v8213_v18, 5  ;;  %v19803_v20 = vsel %vm9285_vm11, %v19752_v34, %v8213_v18  ;;  %v9374_v18 = vrot.slane %v19864_v17, 7 }
0x29a0   :  { %v8218_v24 = vrot.slane %v8214_v27, 4  ;;  %v19807_v25 = vsel %vm9285_vm11, %v19756_v35, %v8214_v27  ;;  %v9331_v27 = vand.u32 15, %v9311_v28 }
0x29a2   :  { %v8219_v26 = vsel %vm1347_vm5, %v8218_v24, %v8217_v14  ;;  %v19868_v14 = vld [vmem:[%s19049_s28 + $0x10] sm:$0xff]  ;;  %vm19873_vm15 = vcmp.eq.s32.totalorder %v9331_v27, 0 }
0x29a3   :  { %8220 = vrot.lane.b32.xlu1 %v8219_v26, %s18916_s7  ;;  %v9376_v24 = vrot.slane %v19868_v14, 7  ;;  %v9375_v26 = vsel %vm9273_vm7, %v9373_v12, %v9374_v18  ;;  %v9400_v6 = vrot.slane %v19868_v14, 1 }
0x2a15   :  { %v8221_v29 = vpop.permute.xlu1 %8220 }
0x2a16   :  { %v8222_v30 = vsel %vm827_vm6, %v8221_v29, 0 }
0x2a17   :  { %v8291_v31 = vand.u32 4294901760, %v8222_v30 }
0x2a19   :  { %v8292_v32 = vsub.f32 %v8222_v30, %v8291_v31  ;;  %v9377_v30 = vsel %vm9273_vm7, %v9374_v18, %v9376_v24 }
0x2a1b   :  { %v8293_v33 = vand.u32 4294901760, %v8292_v32 }
0x2a1d   :  { %v8294_v36 = vsub.f32 %v8292_v32, %v8293_v33 }
0x2a1f   :  { %v8295_v38 = vand.u32 4294901760, %v8294_v36 }
0x2a21   :  { %16468 = vmatmul.mubr.f32.vlgmr.msra.gmra.mrb[16].mxu1 %v8295_v38  ;;  %v9459_v38 = vld [vmem:[%s14946_s12 + $0x8] sm:$0xf] }
0x2a22   :  { %17656 = vmatpush3.bf16.msra.mxu1 %v18997_v37  ;;  %16474 = vmatprep.mubr.msk.f32.mxu1 %vm18908_vm0, %v18909_v2 }
0x2a23   :  { %17657 = vmatprep.subr.bf16.mxu1 %v18904_v0 }
0x2a29   :  { %16475 = vmatmul.mubr.f32.vlgmr.msra.gmra.mrb[16].mxu1 %v8291_v31 }
0x2a2a   :  { %17659 = vmatpush3.bf16.msra.mxu1 %v19003_v41  ;;  %16481 = vmatprep.mubr.msk.f32.mxu1 %vm18908_vm0, %v18909_v2 }
0x2a2b   :  { %17660 = vmatprep.subr.bf16.mxu1 %v18904_v0 }
0x2a31   :  { %16482 = vmatmul.mubr.f32.vlgmr.msra.gmra.mrb[16].mxu1 %v8292_v32  ;;  %v19882_v32 = vld [vmem:[%s19049_s28 + $0x18] sm:$0xff]  ;;  %s14949_s28 = sld [smem:[%s21552_s0 + %s18923_s24]]   ;;  %s18928_s24 = smov 19  }
0x2a32   :  { %17662 = vmatpush3.bf16.msra.mxu1 %v19018_v44  ;;  %16488 = vmatprep.mubr.msk.f32.mxu1 %vm18908_vm0, %v18909_v2 }
0x2a33   :  { %17663 = vmatprep.subr.bf16.mxu1 %v18904_v0 }
0x2a39   :  { %16489 = vmatmul.mubr.f32.vlgmr.msra.gmra.mrb[16].mxu1 %v8293_v33  ;;  %v9378_v33 = vrot.slane %v19882_v32, 7 }
0x2a3a   :  { %17665 = vmatpush3.bf16.msra.mxu1 %v19027_v46  ;;  %16495 = vmatprep.mubr.msk.f32.mxu1 %vm18908_vm0, %v18909_v2 }
0x2a3b   :  { %17666 = vmatprep.subr.bf16.mxu1 %v18904_v0  ;;  %v9379_v36 = vsel %vm9273_vm7, %v9376_v24, %v9378_v33 }
0x2a41   :  { %16496 = vmatmul.mubr.f32.vlgmr.msra.gmra.mrb[16].mxu1 %v8291_v31 }
0x2a42   :  { %17668 = vmatpush3.bf16.msra.mxu1 %v19018_v44  ;;  %16502 = vmatprep.mubr.msk.f32.mxu1 %vm18908_vm0, %v18909_v2 }
0x2a49   :  { %16503 = vmatmul.mubr.f32.vlgmr.msra.gmra.mrb[16].mxu1 %v8291_v31  ;;  %v9395_v31 = vsel %vm19873_vm15, 0.0, %v9377_v30 }
0x2b1c   :  { %v8679_v34 = vpop.f32.mrb[16].mxu1 }
0x2b1d   :  { %v8684_v35 = vrot.slane %v8679_v34, 2  ;;  %v8685_v39 = vrot.slane %v8679_v34, 3  ;;  %v16504_v40 = vpop.f32.mrb[17].mxu1  ;;  %v9458_v34 = vld [vmem:[%s14946_s12] sm:$0xff]  ;;  %s14950_s12 = sld [smem:[%s21552_s0 + %s18925_s9]]  }
0x2b1f   :  { %v8688_v42 = vadd.f32 %v19116_v47, %v8684_v35  ;;  %v8689_v22 = vadd.f32 %v19118_v53, %v8685_v39  ;;  %v9480_v35 = vsel %vm9282_vm10, %v9459_v38, 0  ;;  %v9483_v39 = vand.u32 4294901760, %v9458_v34 }
0x2b20   :  { %v9486_v40 = vand.u32 4294901760, %v9480_v35 }
0x2b21   :  { %18829 = vtanh.f32 %v8688_v42  ;;  %v14998_v49 = vmul.f32 -1.442695, %v8688_v42  ;;  %v14999_v23 = vmul.f32 -1.442695, %v8689_v22  ;;  %v9591_v42 = vsub.f32 %v9458_v34, %v9483_v39 }
0x2b22   :  { %18831 = vtanh.f32 %v8689_v22  ;;  %v9598_v22 = vsub.f32 %v9480_v35, %v9486_v40 }
0x2b23   :  { %18833 = vpow2.f32 %v14998_v49 }
0x2b24   :  { %18835 = vpow2.f32 %v14999_v23 }
0x2b2b   :  { %v18830_v48 = vpop.eup %18829 }
0x2b2c   :  { %v18832_v50 = vpop.eup %18831  ;;  %8714 = vrot.lane.b32.xlu0 %v18830_v48, %s18913_s3  ;;  %v9592_v48 = vand.u32 4294901760, %v9591_v42 }
0x2b2d   :  { %8716 = vrot.lane.b32.xlu1 %v18832_v50, %s18913_s3  ;;  %v18834_v43 = vpop.eup %18833  ;;  %v9599_v50 = vand.u32 4294901760, %v9598_v22 }
0x2b2e   :  { %v18836_v45 = vpop.eup %18835  ;;  %v8696_v51 = vadd.f32 1.0, %v18834_v43 }
0x2b2f   :  { %v8697_v57 = vadd.f32 1.0, %v18836_v45 }
0x2b30   :  { %18837 = vrcp.f32 %v8696_v51  ;;  %v9593_v51 = vsub.f32 %v9591_v42, %v9592_v48 }
0x2b31   :  { %18839 = vrcp.f32 %v8697_v57  ;;  %v9600_v57 = vsub.f32 %v9598_v22, %v9599_v50 }
0x2b3a   :  { %v18838_v52 = vpop.eup %18837 }
0x2b3b   :  { %v18840_v54 = vpop.eup %18839  ;;  %v8710_v56 = vmul.f32 %v18838_v52, %v8706_v62  ;;  %v9601_v62 = vand.u32 4294901760, %v9600_v57 }
0x2b3c   :  { %v8711_v7 = vmul.f32 %v18840_v54, %v8707_v1 }
0x2b9e   :  { %v8715_v61 = vpop.permute.xlu0 %8714 }
0x2b9f   :  { %v8717_v58 = vpop.permute.xlu1 %8716  ;;  %v8720_v8 = vmul.f32 %v18838_v52, %v8715_v61 }
0x2ba0   :  { %v8721_v55 = vmul.f32 %v18840_v54, %v8717_v58 }
0x2ba1   :  { %8724 = vrot.lane.b32.xlu0 %v8720_v8, %s18914_s4 }
0x2ba2   :  { %8726 = vrot.lane.b32.xlu1 %v8721_v55, %s18914_s4  ;;  %v9594_v55 = vand.u32 4294901760, %v9593_v51 }
0x2c13   :  { %v8725_v60 = vpop.permute.xlu0 %8724 }
0x2c14   :  { %v8727_v59 = vpop.permute.xlu1 %8726  ;;  %v19839_v4 = vadd.f32 %v8725_v60, %v8710_v56  ;;  %v9310_v60 = vadd.s32 8, %v19845_v3 }
0x2c15   :  { %v19841_v5 = vadd.f32 %v8727_v59, %v8711_v7  ;;  %v17691_v7 = vpack.c.bf16 %v9601_v62, %v9594_v55  ;;  %v9398_v59 = vrot.slane %v19864_v17, 1 }
0x2c16   :  { %18841 = vtanh.f32 %v19839_v4 }
0x2c17   :  { %18843 = vtanh.f32 %v19841_v5  ;;  %17692 = vmatprep.subr.bf16.mxu1 %v17691_v7 }
0x2c18   :  { %17694 = vmatpush3.bf16.msra.mxu1 %v17691_v7 }
0x2c20   :  { %v18842_v15 = vpop.eup %18841 }
0x2c21   :  { %v18844_v13 = vpop.eup %18843  ;;  %8736 = vrot.lane.b32.xlu0 %v18842_v15, %s18915_s5  ;;  %v9324_v15 = vand.u32 15, %v9310_v60 }
0x2c22   :  { %8738 = vrot.lane.b32.xlu1 %v18844_v13, %s18915_s5 }
0x2c26   :  { %9425 = vrot.lane.b32.xlu1 %v9393_v16, %s18917_s8  ;;  %v9399_v16 = vsel %vm9291_vm13, %v9397_v63, %v9398_v59 }
0x2c2a   :  { %9427 = vrot.lane.b32.xlu1 %v9375_v26, %s18917_s8 }
0x2c2e   :  { %9429 = vrot.lane.b32.xlu1 %v9395_v31, %s18917_s8 }
0x2c32   :  { %9431 = vrot.lane.b32.xlu1 %v9379_v36, %s18917_s8  ;;  %v9402_v36 = vrot.slane %v19882_v32, 1 }
0x2c93   :  { %v8737_v49 = vpop.permute.xlu0 %8736 }
0x2c94   :  { %v8739_v23 = vpop.permute.xlu1 %8738  ;;  %v8742_v43 = vmul.f32 %v18838_v52, %v8737_v49  ;;  %v19902_v52 = vpack.c.bf16 %v9486_v40, %v9483_v39 }
0x2c95   :  { %v8743_v45 = vmul.f32 %v18840_v54, %v8739_v23 }
0x2c96   :  { %v8746_v61 = vrot.slane %v8742_v43, 6  ;;  %v19894_v58 = vsel %vm9288_vm12, %v19803_v20, %v8742_v43  ;;  %v17695_v20 = vpack.c.bf16 %v9598_v22, %v9591_v42 }
0x2c97   :  { %v8747_v8 = vrot.slane %v8743_v45, 5  ;;  %v19898_v1 = vsel %vm9288_vm12, %v19807_v25, %v8743_v45  ;;  %v19912_v25 = vpack.c.bf16 %v9599_v50, %v9592_v48  ;;  %v9403_v50 = vsel %vm9291_vm13, %v9400_v6, %v9402_v36 }
0x2c98   :  { %17696 = vmatprep.subr.bf16.mxu1 %v17695_v20  ;;  %v9426_v54 = vpop.permute.xlu1 %9425  ;;  %v9408_v45 = vsel %vm9291_vm13, %v9402_v36, %v19882_v32 }
0x2c99   :  { %v8748_v56 = vsel %vm1347_vm5, %v8747_v8, %v8746_v61  ;;  %vm19925_vm5 = vcmp.eq.s32.totalorder %v9324_v15, 15 }
0x2c9a   :  { %8749 = vrot.lane.b32.xlu0 %v8748_v56, %s18916_s7 }
0x2c9c   :  { %v9428_v13 = vpop.permute.xlu1 %9427 }
0x2c9e   :  { %9437 = vrot.lane.b32.xlu0 %v19849_v10, %s18919_s13  ;;  %v9401_v10 = vsel %vm9291_vm13, %v9398_v59, %v9400_v6 }
0x2c9f   :  { %v9418_v33 = vsel %vm19925_vm5, 0.0, %v9401_v10 }
0x2ca0   :  { %v9430_v35 = vpop.permute.xlu1 %9429 }
0x2ca2   :  { %9439 = vrot.lane.b32.xlu0 %v19864_v17, %s18919_s13 }
0x2ca4   :  { %v9432_v61 = vpop.permute.xlu1 %9431 }
0x2ca6   :  { %9441 = vrot.lane.b32.xlu0 %v19868_v14, %s18919_s13  ;;  %v9312_v14 = vadd.s32 24, %v19845_v3 }
0x2ca8   :  { %v9338_v39 = vand.u32 15, %v9312_v14 }
0x2caa   :  { %9443 = vrot.lane.b32.xlu0 %v19882_v32, %s18919_s13  ;;  %vm19950_vm8 = vcmp.eq.s32.totalorder %v9338_v39, 15  ;;  %v10147_v39 = vld [vmem:[%s20007_s17 + $0x20] sm:$0xff] }
0x2cab   :  { %v9420_v55 = vsel %vm19950_vm8, 0.0, %v9408_v45 }
0x2d0c   :  { %v8750_v12 = vpop.permute.xlu0 %8749 }
0x2d0d   :  { %v8751_v11 = vsel %vm827_vm6, %v8750_v12, 0 }
0x2d0e   :  { %v19919_v28 = vand.u32 4294901760, %v8751_v11 }
0x2d10   :  { %v19923_v18 = vsub.f32 %v8751_v11, %v19919_v28  ;;  %v9438_v27 = vpop.permute.xlu0 %9437 }
0x2d11   :  { %v9450_v24 = vsel %vm9449_vm2, %v9426_v54, %v9438_v27 }
0x2d12   :  { %v8822_v26 = vand.u32 4294901760, %v19923_v18  ;;  %v9454_v30 = vsel %vm186_vm1, %v9450_v24, %v9399_v16  ;;  %v10145_v24 = vld [vmem:[%s20007_s17 + $0x10] sm:$0xff] }
0x2d13   :  { %v9468_v31 = vsel %vm191_vm3, %v9454_v30, 0 }
0x2d14   :  { %v8823_v38 = vsub.f32 %v19923_v18, %v8822_v26  ;;  %v19941_v34 = vand.u32 4294901760, %v9468_v31  ;;  %v9440_v3 = vpop.permute.xlu0 %9439 }
0x2d15   :  { %v9451_v40 = vsel %vm9449_vm2, %v9428_v13, %v9440_v3 }
0x2d16   :  { %v9455_v42 = vsel %vm186_vm1, %v9451_v40, %v9418_v33  ;;  %v8824_v22 = vand.u32 4294901760, %v8823_v38  ;;  %16561 = vmatprep.mubr.f32.mxu1 %v19941_v34  ;;  %v9550_v60 = vsub.f32 %v9468_v31, %v19941_v34  ;;  %v10179_v31 = vand.u32 4294901760, %v10145_v24  ;;  %v20027_v40 = vld [vmem:[%s20007_s17 + $0x28] sm:$0xff] }
0x2d17   :  { %v9471_v48 = vsel %vm191_vm3, %v9455_v42, 0 }
0x2d18   :  { %v19948_v49 = vand.u32 4294901760, %v9471_v48  ;;  %16510 = vmatmul.mubr.f32.vlgmr.msra.gmra.mrb[18].mxu0 %v8824_v22  ;;  %v9442_v23 = vpop.permute.xlu0 %9441  ;;  %v10185_v22 = vand.u32 4294901760, %v10147_v39 }
0x2d19   :  { %v9452_v51 = vsel %vm9449_vm2, %v9430_v35, %v9442_v23  ;;  %17674 = vmatpush3.bf16.msra.mxu0 %v18997_v37  ;;  %16516 = vmatprep.mubr.msk.f32.mxu0 %vm18908_vm0, %v18909_v2  ;;  %v15002_v35 = vld [vmem:[%s14947_s20] ss:$0 sm:$0xff] }
0x2d1a   :  { %v9456_v57 = vsel %vm186_vm1, %v9452_v51, %v9403_v50  ;;  %16562 = vmatmul.mubr.f32.vlgmr.msra.gmra.mrb[18].mxu1 %v19948_v49  ;;  %17675 = vmatprep.subr.bf16.mxu0 %v18904_v0 }
0x2d1b   :  { %v9474_v8 = vsel %vm191_vm3, %v9456_v57, 0  ;;  %17698 = vmatpush3.bf16.msra.mxu1 %v17695_v20  ;;  %v9560_v20 = vsub.f32 %v9471_v48, %v19948_v49  ;;  %v10188_v48 = vand.u32 4294901760, %v20027_v40  ;;  %v10149_v57 = vld [vmem:[%s20007_s17 + $0x30] sm:$0xff] }
0x2d1c   :  { %v9569_v32 = vand.u32 4294901760, %v9474_v8  ;;  %v9444_v62 = vpop.permute.xlu0 %9443  ;;  %17700 = vmatprep.subr.bf16.mxu1 %v19902_v52 }
0x2d1d   :  { %v9453_v37 = vsel %vm9449_vm2, %v9432_v61, %v9444_v62  ;;  %v9561_v6 = vand.u32 4294901760, %v9560_v20  ;;  %v20034_v51 = vpack.c.bf16 %v10188_v48, %v10185_v22  ;;  %v20038_v61 = vld [vmem:[%s20007_s17 + $0x38] sm:$0xff] }
0x2d1e   :  { %v9457_v56 = vsel %vm186_vm1, %v9453_v37, %v9420_v55  ;;  %16564 = vmatprep.mubr.f32.mxu1 %v9569_v32  ;;  %v9570_v59 = vsub.f32 %v9474_v8, %v9569_v32  ;;  %v10191_v55 = vand.u32 4294901760, %v10149_v57 }
0x2d1f   :  { %v9477_v7 = vsel %vm191_vm3, %v9457_v56, 0 }
0x2d20   :  { %v9579_v54 = vand.u32 4294901760, %v9477_v7  ;;  %16517 = vmatmul.mubr.f32.vlgmr.msra.gmra.mrb[18].mxu0 %v19919_v28  ;;  %v9571_v12 = vand.u32 4294901760, %v9570_v59 }
0x2d21   :  { %17677 = vmatpush3.bf16.msra.mxu0 %v19003_v41  ;;  %16523 = vmatprep.mubr.msk.f32.mxu0 %vm18908_vm0, %v18909_v2  ;;  %v9551_v41 = vand.u32 4294901760, %v9550_v60 }
0x2d22   :  { %16565 = vmatmul.mubr.f32.gmra.mrb[20].mxu1 %v9579_v54  ;;  %17678 = vmatprep.subr.bf16.mxu0 %v18904_v0  ;;  %v9580_v63 = vsub.f32 %v9477_v7, %v9579_v54  ;;  %v9572_v11 = vsub.f32 %v9570_v59, %v9571_v12 }
0x2d23   :  { %16571 = vmatprep.mubr.f32.mxu1 %v9550_v60 }
0x2d24   :  { %v9581_v15 = vand.u32 4294901760, %v9580_v63  ;;  %v9573_v13 = vand.u32 4294901760, %v9572_v11 }
0x2d26   :  { %16572 = vmatmul.mubr.f32.vlgmr.msra.gmra.mrb[18].mxu1 %v9560_v20 }
0x2d27   :  { %16574 = vmatprep.mubr.f32.mxu1 %v9570_v59  ;;  %17702 = vmatpush3.bf16.msra.mxu1 %v19902_v52 }
0x2d28   :  { %16524 = vmatmul.mubr.f32.vlgmr.msra.gmra.mrb[18].mxu0 %v19923_v18  ;;  %17704 = vmatprep.subr.bf16.mxu1 %v19912_v25 }
0x2d29   :  { %17680 = vmatpush3.bf16.msra.mxu0 %v19018_v44  ;;  %16530 = vmatprep.mubr.msk.f32.mxu0 %vm18908_vm0, %v18909_v2 }
0x2d2a   :  { %16575 = vmatmul.mubr.f32.gmra.mrb[20].mxu1 %v9580_v63  ;;  %17681 = vmatprep.subr.bf16.mxu0 %v18904_v0 }
0x2d2b   :  { %16581 = vmatprep.mubr.f32.mxu1 %v9551_v41 }
0x2d2e   :  { %16582 = vmatmul.mubr.f32.vlgmr.msra.gmra.mrb[18].mxu1 %v9561_v6 }
0x2d2f   :  { %16584 = vmatprep.mubr.f32.mxu1 %v9571_v12  ;;  %17706 = vmatpush3.bf16.msra.mxu1 %v19912_v25 }
0x2d30   :  { %16531 = vmatmul.mubr.f32.vlgmr.msra.gmra.mrb[18].mxu0 %v8822_v26  ;;  %17708 = vmatprep.subr.bf16.mxu1 %v19902_v52  ;;  %v10146_v26 = vld [vmem:[%s20007_s17 + $0x18] sm:$0xff] }
0x2d31   :  { %17683 = vmatpush3.bf16.msra.mxu0 %v19027_v46  ;;  %16537 = vmatprep.mubr.msk.f32.mxu0 %vm18908_vm0, %v18909_v2  ;;  %v9562_v46 = vsub.f32 %v9560_v20, %v9561_v6  ;;  %v10182_v33 = vand.u32 4294901760, %v10146_v26 }
0x2d32   :  { %16585 = vmatmul.mubr.f32.gmra.mrb[20].mxu1 %v9581_v15  ;;  %17684 = vmatprep.subr.bf16.mxu0 %v18904_v0  ;;  %v9552_v0 = vsub.f32 %v9550_v60, %v9551_v41 }
0x2d33   :  { %16591 = vmatprep.mubr.f32.mxu1 %v19941_v34  ;;  %v20063_v11 = vsub.f32 %v10146_v26, %v10182_v33 }
0x2d34   :  { %v9553_v25 = vand.u32 4294901760, %v9552_v0 }
0x2d36   :  { %16592 = vmatmul.mubr.f32.vlgmr.msra.gmra.mrb[18].mxu1 %v19948_v49 }
0x2d37   :  { %16594 = vmatprep.mubr.f32.mxu1 %v9569_v32  ;;  %17710 = vmatpush3.bf16.msra.mxu1 %v19902_v52 }
0x2d38   :  { %16538 = vmatmul.mubr.f32.vlgmr.msra.gmra.mrb[18].mxu0 %v19919_v28 }
0x2d39   :  { %17686 = vmatpush3.bf16.msra.mxu0 %v19018_v44  ;;  %16544 = vmatprep.mubr.msk.f32.mxu0 %vm18908_vm0, %v18909_v2  ;;  %v9563_v44 = vand.u32 4294901760, %v9562_v46  ;;  %v9582_v2 = vsub.f32 %v9580_v63, %v9581_v15  ;;  %vm10138_vm0 = vcmask 392192  }
0x2d3a   :  { %16595 = vmatmul.mubr.f32.gmra.mrb[20].mxu1 %v9579_v54  ;;  %17688 = vmatprep.subr.bf16.mxu0 %v19902_v52 }
0x2d3b   :  { %16601 = vmatprep.mubr.f32.mxu1 %v19941_v34  ;;  %v9583_v16 = vand.u32 4294901760, %v9582_v2  ;;  %v20023_v34 = vpack.c.bf16 %v10182_v33, %v10179_v31  ;;  %v10316_v33 = vsub.f32 %v10147_v39, %v10185_v22 }
0x2d3e   :  { %16602 = vmatmul.mubr.f32.vlgmr.msra.gmra.mrb[18].mxu1 %v19948_v49 }
0x2d3f   :  { %16604 = vmatprep.mubr.f32.mxu1 %v9569_v32  ;;  %v10194_v32 = vand.u32 4294901760, %v20038_v61 }
0x2d40   :  { %16545 = vmatmul.mubr.f32.vlgmr.msra.gmra.mrb[18].mxu0 %v19919_v28  ;;  %v10144_v28 = vld [vmem:[%s20007_s17 + $0x8] sm:$0xff] }
0x2d41   :  { %17690 = vmatpush3.bf16.msra.mxu0 %v19902_v52  ;;  %16551 = vmatprep.mubr.f32.mxu0 %v9553_v25  ;;  %v10143_v52 = vld [vmem:[%s20007_s17] sm:$0xff]  ;;  %v10176_v27 = vand.u32 4294901760, %v10144_v28  ;;  %v20052_v63 = vpack.c.bf16 %v10194_v32, %v10191_v55  ;;  %v20061_v25 = vsub.f32 %v10145_v24, %v10179_v31  ;;  %v10310_v31 = vand.u32 4294901760, %v20063_v11 }
0x2d42   :  { %16605 = vmatmul.mubr.f32.gmra.mrb[20].mxu1 %v9579_v54  ;;  %v10173_v18 = vand.u32 4294901760, %v10143_v52 }
0x2d43   :  { %v20046_v7 = vsub.f32 %v10144_v28, %v10176_v27 }
0x2d44   :  { %16552 = vmatmul.mubr.f32.vlgmr.msra.gmra.mrb[20].mxu0 %v9563_v44  ;;  %v20015_v10 = vpack.c.bf16 %v10176_v27, %v10173_v18  ;;  %v20044_v56 = vsub.f32 %v10143_v52, %v10173_v18 }
0x2d45   :  { %16554 = vmatprep.mubr.f32.mxu0 %v9573_v13  ;;  %v10296_v46 = vand.u32 4294901760, %v20046_v7 }
0x2d46   :  { %17712 = vmatprep.subr.bf16.mxu0 %v20015_v10  ;;  %v10289_v15 = vand.u32 4294901760, %v20044_v56 }
0x2d47   :  { %17714 = vmatpush3.bf16.msra.mxu0 %v20015_v10  ;;  %v10297_v26 = vsub.f32 %v20046_v7, %v10296_v46 }
0x2d48   :  { %16555 = vmatmul.mubr.f32.gmra.mrb[22].mxu0 %v9583_v16  ;;  %17716 = vmatprep.subr.bf16.mxu0 %v20023_v34  ;;  %v20072_v16 = vld [vmem:[%s20007_s17 + $0x40] sm:$0xff]  ;;  %v10290_v24 = vsub.f32 %v20044_v56, %v10289_v15  ;;  %s18927_s17 = smov 14  }
0x2d49   :  { %v20076_v18 = vand.u32 4294901760, %v20072_v16  ;;  %v10298_v39 = vand.u32 4294901760, %v10297_v26  ;;  %s14953_s20 = sld [smem:[%s21552_s0 + %s18927_s17]]   ;;  %s18939_s17 = smov 29  }
0x2d4b   :  { %17718 = vmatpush3.bf16.msra.mxu0 %v20023_v34 }
0x2d4c   :  { %17720 = vmatprep.subr.bf16.mxu0 %v20034_v51 }
0x2d4f   :  { %17722 = vmatpush3.bf16.msra.mxu0 %v20034_v51 }
0x2d50   :  { %17724 = vmatprep.subr.bf16.mxu0 %v20052_v63 }
0x2d53   :  { %17726 = vmatpush3.bf16.msra.mxu0 %v20052_v63 }
0x2d54   :  { %16623 = vmatprep.subr.mxu0 %v20076_v18 }
0x2d57   :  { %16624 = vmatpush3.msra.mxu0 %v20076_v18 }
0x2e11   :  { %v16603_v14 = vpop.f32.mrb[18].mxu1 }
0x2e12   :  { %v10048_v30 = vpop.f32.mrb[19].mxu1 }
0x2e13   :  { %v20020_v36 = vpop.f32.mrb[18].mxu0 }
0x2e14   :  { %v16546_v38 = vpop.f32.mrb[19].mxu0 }
0x2e15   :  { %v16606_v3 = vpop.f32.mrb[20].mxu1 }
0x2e16   :  { %v10060_v42 = vpop.f32.mrb[21].mxu1 }
0x2e17   :  { %v16553_v50 = vpop.f32.mrb[20].mxu0 }
0x2e18   :  { %v9566_v49 = vadd.f32 %v16553_v50, %v15002_v35  ;;  %v9555_v23 = vpop.f32.mrb[21].mxu0 }
0x2e19   :  { %v9556_v45 = vadd.f32 %v15002_v35, %v9555_v23  ;;  %v10311_v23 = vsub.f32 %v20063_v11, %v10310_v31 }
0x2e1a   :  { %v18221_v8 = vadd.f32 %v16603_v14, %v9566_v49  ;;  %v10291_v49 = vand.u32 4294901760, %v10290_v24 }
0x2e1b   :  { %v20041_v62 = vadd.f32 %v10048_v30, %v9556_v45  ;;  %v16556_v37 = vpop.f32.mrb[22].mxu0  ;;  %v10303_v30 = vand.u32 4294901760, %v20061_v25  ;;  %v10317_v45 = vand.u32 4294901760, %v10316_v33 }
0x2e1c   :  { %v10075_v54 = vrot.slane %v18221_v8, 7  ;;  %v10091_v60 = vrot.slane %v18221_v8, 1  ;;  %v9586_v20 = vadd.f32 %v16556_v37, %v15002_v35  ;;  %v9575_v59 = vpop.f32.mrb[23].mxu0  ;;  %10108 = vrot.lane.b32.xlu0 %v18221_v8, %s18921_s21  ;;  %v10323_v8 = vsub.f32 %v20027_v40, %v10188_v48 }
0x2e1d   :  { %v9576_v41 = vadd.f32 %v15002_v35, %v9575_v59  ;;  %10106 = vrot.lane.b32.xlu1 %v20041_v62, %s18921_s21  ;;  %v10090_v6 = vrot.slane %v20041_v62, 1  ;;  %v10074_v12 = vrot.slane %v20041_v62, 7  ;;  %v10304_v22 = vsub.f32 %v20061_v25, %v10303_v30 }
0x2e1e   :  { %v18225_v0 = vadd.f32 %v16606_v3, %v9586_v20  ;;  %v10330_v37 = vsub.f32 %v10149_v57, %v10191_v55  ;;  %v10312_v20 = vand.u32 4294901760, %v10311_v23  ;;  %v10318_v59 = vsub.f32 %v10316_v33, %v10317_v45 }
0x2e1f   :  { %v18227_v44 = vadd.f32 %v10060_v42, %v9576_v41  ;;  %v10092_v2 = vsel %vm9291_vm13, %v10090_v6, %v10091_v60  ;;  %v20069_v13 = vsel %vm9273_vm7, %v10074_v12, %v10075_v54  ;;  %v10324_v41 = vand.u32 4294901760, %v10323_v8 }
0x2e20   :  { %v10095_v52 = vrot.slane %v18225_v0, 1  ;;  %v10079_v28 = vrot.slane %v18225_v0, 7  ;;  %v10331_v6 = vand.u32 4294901760, %v10330_v37  ;;  %v10337_v40 = vsub.f32 %v20038_v61, %v10194_v32 }
0x2e21   :  { %v10077_v27 = vrot.slane %v18227_v44, 7  ;;  %v10093_v14 = vrot.slane %v18227_v44, 1  ;;  %10122 = vrot.lane.b32.xlu1 %v10092_v2, %s18922_s22  ;;  %v10319_v48 = vand.u32 4294901760, %v10318_v59  ;;  %v10325_v57 = vsub.f32 %v10323_v8, %v10324_v41 }
0x2e22   :  { %v10332_v55 = vsub.f32 %v10330_v37, %v10331_v6  ;;  %v20126_v61 = vpack.c.bf16 %v20046_v7, %v20044_v56  ;;  %v20130_v32 = vpack.c.bf16 %v20063_v11, %v20061_v25  ;;  %v10085_v25 = vsel %vm9273_vm7, %v20041_v62, %v10074_v12 }
0x2e23   :  { %v10094_v38 = vsel %vm9291_vm13, %v10091_v60, %v10093_v14  ;;  %v10096_v3 = vsel %vm9291_vm13, %v10093_v14, %v10095_v52  ;;  %v20091_v35 = vsel %vm9273_vm7, %v10075_v54, %v10077_v27  ;;  %v20096_v50 = vsel %vm9273_vm7, %v10077_v27, %v10079_v28 }
0x2e24   :  { %v10103_v42 = vsel %vm19925_vm5, 0.0, %v10094_v38  ;;  %v20106_v54 = vpack.c.bf16 %v10298_v39, %v10291_v49  ;;  %v10305_v60 = vand.u32 4294901760, %v10304_v22  ;;  %v10338_v28 = vand.u32 4294901760, %v10337_v40 }
0x2e25   :  { %10124 = vrot.lane.b32.xlu0 %v10103_v42, %s18922_s22  ;;  %10110 = vrot.lane.b32.xlu1 %v18227_v44, %s18921_s21  ;;  %v10101_v44 = vsel %vm9291_vm13, %v10095_v52, %v18225_v0  ;;  %v10326_v14 = vand.u32 4294901760, %v10325_v57  ;;  %v10333_v24 = vand.u32 4294901760, %v10332_v55  ;;  %v20134_v42 = vpack.c.bf16 %v10337_v40, %v10330_v37 }
0x2e26   :  { %v20111_v2 = vpack.c.bf16 %v10312_v20, %v10305_v60  ;;  %17728 = vmatprep.subr.bf16.mxu0 %v20106_v54  ;;  %v10105_v27 = vsel %vm19950_vm8, 0.0, %v10101_v44  ;;  %v20140_v49 = vpack.c.bf16 %v10296_v46, %v10289_v15  ;;  %v20142_v39 = vpack.c.bf16 %v10310_v31, %v10303_v30 }
0x2e27   :  { %v20120_v52 = vpack.c.bf16 %v10326_v14, %v10319_v48  ;;  %v20144_v22 = vpack.c.bf16 %v10324_v41, %v10317_v45  ;;  %v20146_v23 = vpack.c.bf16 %v10338_v28, %v10331_v6  ;;  %v10086_v56 = vsel %vm19852_vm14, 0.0, %v10085_v25 }
0x2e28   :  { %v10088_v59 = vsel %vm19873_vm15, 0.0, %v20091_v35 }
0x2e29   :  { %10112 = vrot.lane.b32.xlu0 %v18225_v0, %s18921_s21  ;;  %10126 = vrot.lane.b32.xlu1 %v10096_v3, %s18922_s22  ;;  %v10339_v0 = vsub.f32 %v10337_v40, %v10338_v28  ;;  %v20132_v3 = vpack.c.bf16 %v10323_v8, %v10316_v33 }
0x2e2b   :  { %v10340_v26 = vand.u32 4294901760, %v10339_v0 }
0x2e2d   :  { %10128 = vrot.lane.b32.xlu0 %v10105_v27, %s18922_s22  ;;  %v20122_v38 = vpack.c.bf16 %v10340_v26, %v10333_v24 }
0x2e8e   :  { %v10109_v7 = vpop.permute.xlu0 %10108 }
0x2e8f   :  { %v10107_v60 = vpop.permute.xlu1 %10106  ;;  %v10135_v33 = vsel %vm211_vm4, %v20069_v13, %v10109_v7 }
0x2e90   :  { %v10134_v15 = vsel %vm211_vm4, %v10086_v56, %v10107_v60 }
0x2e93   :  { %v10123_v46 = vpop.permute.xlu1 %10122 }
0x2e94   :  { %v10139_v11 = vsel %vm10138_vm0, %v10134_v15, %v10123_v46  ;;  %v10344_v46 = vsub.f32 %v20072_v16, %v20076_v18 }
0x2e95   :  { %v10161_v30 = vsel %vm10159_vm9, %v10139_v11, 0 }
0x2e96   :  { %v20157_v31 = vand.u32 4294901760, %v10161_v30 }
0x2e97   :  { %v10125_v45 = vpop.permute.xlu0 %10124  ;;  %v10111_v62 = vpop.permute.xlu1 %10110 }
0x2e98   :  { %v20162_v12 = vsub.f32 %v10161_v30, %v20157_v31  ;;  %v10140_v8 = vsel %vm10138_vm0, %v10135_v33, %v10125_v45  ;;  %v10136_v6 = vsel %vm211_vm4, %v10088_v59, %v10111_v62  ;;  %v10345_v45 = vand.u32 4294901760, %v10344_v46 }
0x2e99   :  { %v10164_v37 = vsel %vm10159_vm9, %v10140_v8, 0 }
0x2e9a   :  { %v20166_v20 = vand.u32 4294901760, %v10164_v37  ;;  %v10248_v41 = vand.u32 4294901760, %v20162_v12 }
0x2e9b   :  { %v10113_v13 = vpop.permute.xlu0 %10112  ;;  %v10127_v44 = vpop.permute.xlu1 %10126 }
0x2e9c   :  { %v20174_v40 = vsub.f32 %v10164_v37, %v20166_v20  ;;  %v10141_v48 = vsel %vm10138_vm0, %v10136_v6, %v10127_v44  ;;  %v10249_v57 = vsub.f32 %v20162_v12, %v10248_v41  ;;  %v10137_v14 = vsel %vm211_vm4, %v20096_v50, %v10113_v13 }
0x2e9d   :  { %v10167_v55 = vsel %vm10159_vm9, %v10141_v48, 0  ;;  %v10346_v37 = vsub.f32 %v10344_v46, %v10345_v45 }
0x2e9e   :  { %v10258_v28 = vand.u32 4294901760, %v20174_v40  ;;  %v20182_v35 = vand.u32 4294901760, %v10167_v55  ;;  %v10250_v27 = vand.u32 4294901760, %v10249_v57 }
0x2e9f   :  { %v10129_v24 = vpop.permute.xlu0 %10128  ;;  %v10347_v16 = vand.u32 4294901760, %v10346_v37  ;;  %v11004_v37 = vld [vmem:[%s20288_s2 + $0x10] sm:$0xff] }
0x2ea0   :  { %v10259_v0 = vsub.f32 %v20174_v40, %v10258_v28  ;;  %v10267_v26 = vsub.f32 %v10167_v55, %v20182_v35  ;;  %v10142_v60 = vsel %vm10138_vm0, %v10137_v14, %v10129_v24  ;;  %16625 = vmatprep.mubr.f32.mxu0 %v10250_v27  ;;  %v11002_v24 = vld [vmem:[%s20288_s2] sm:$0xff] }
0x2ea1   :  { %v10170_v25 = vsel %vm10159_vm9, %v10142_v60, 0 }
0x2ea2   :  { %v10260_v56 = vand.u32 4294901760, %v10259_v0  ;;  %v20192_v7 = vand.u32 4294901760, %v10170_v25  ;;  %v10268_v15 = vand.u32 4294901760, %v10267_v26  ;;  %v11003_v0 = vld [vmem:[%s20288_s2 + $0x8] sm:$0xff] }
0x2ea3   :  { %v11034_v60 = vand.u32 4294901760, %v11003_v0 }
0x2ea4   :  { %v10277_v50 = vsub.f32 %v10170_v25, %v20192_v7  ;;  %16626 = vmatmul.mubr.f32.vlgmr.msra.gmra.mrb[24].mxu0 %v10260_v56  ;;  %v10269_v11 = vsub.f32 %v10267_v26, %v10268_v15 }
0x2ea5   :  { %17730 = vmatpush3.bf16.msra.mxu0 %v20106_v54 }
0x2ea6   :  { %17732 = vmatprep.subr.bf16.mxu0 %v20111_v2  ;;  %v10270_v30 = vand.u32 4294901760, %v10269_v11  ;;  %v10278_v33 = vand.u32 4294901760, %v10277_v50 }
0x2ea8   :  { %16628 = vmatprep.mubr.f32.mxu0 %v10270_v30  ;;  %v10279_v62 = vsub.f32 %v10277_v50, %v10278_v33 }
0x2ea9   :  { %17734 = vmatpush3.bf16.msra.mxu0 %v20111_v2 }
0x2eaa   :  { %17736 = vmatprep.subr.bf16.mxu0 %v20120_v52  ;;  %v10280_v8 = vand.u32 4294901760, %v10279_v62 }
0x2eac   :  { %16629 = vmatmul.mubr.f32.gmra.mrb[26].mxu0 %v10280_v8 }
0x2ead   :  { %17738 = vmatpush3.bf16.msra.mxu0 %v20120_v52  ;;  %16649 = vmatprep.mubr.f32.mxu0 %v20157_v31 }
0x2eae   :  { %17740 = vmatprep.subr.bf16.mxu0 %v20122_v38 }
0x2eb1   :  { %17742 = vmatpush3.bf16.msra.mxu0 %v20122_v38 }
0x2eb2   :  { %16647 = vmatprep.subr.mxu0 %v10347_v16 }
0x2eb5   :  { %16648 = vmatpush3.msra.mxu0 %v10347_v16  ;;  %v11005_v16 = vld [vmem:[%s20288_s2 + $0x18] sm:$0xff] }
0x2eb6   :  { %16650 = vmatmul.mubr.f32.vlgmr.msra.gmra.mrb[24].mxu0 %v20166_v20  ;;  %17744 = vmatprep.subr.bf16.mxu0 %v20126_v61 }
0x2eb7   :  { %16652 = vmatprep.mubr.f32.mxu0 %v20182_v35  ;;  %17746 = vmatpush3.bf16.msra.mxu0 %v20126_v61 }
0x2eb8   :  { %17748 = vmatprep.subr.bf16.mxu0 %v20130_v32 }
0x2eba   :  { %16653 = vmatmul.mubr.f32.gmra.mrb[26].mxu0 %v20192_v7 }
0x2ebb   :  { %17750 = vmatpush3.bf16.msra.mxu0 %v20130_v32  ;;  %16673 = vmatprep.mubr.f32.mxu0 %v20162_v12 }
0x2ebc   :  { %17752 = vmatprep.subr.bf16.mxu0 %v20132_v3 }
0x2ebf   :  { %17754 = vmatpush3.bf16.msra.mxu0 %v20132_v3 }
0x2ec0   :  { %17756 = vmatprep.subr.bf16.mxu0 %v20134_v42 }
0x2ec3   :  { %17758 = vmatpush3.bf16.msra.mxu0 %v20134_v42 }
0x2ec4   :  { %16671 = vmatprep.subr.mxu0 %v10344_v46 }
0x2ec7   :  { %16672 = vmatpush3.msra.mxu0 %v10344_v46 }
0x2ec8   :  { %16674 = vmatmul.mubr.f32.vlgmr.msra.gmra.mrb[24].mxu0 %v20174_v40  ;;  %17760 = vmatprep.subr.bf16.mxu0 %v20015_v10 }
0x2ec9   :  { %16676 = vmatprep.mubr.f32.mxu0 %v10267_v26  ;;  %17762 = vmatpush3.bf16.msra.mxu0 %v20015_v10  ;;  %v11031_v26 = vand.u32 4294901760, %v11002_v24 }
0x2eca   :  { %17764 = vmatprep.subr.bf16.mxu0 %v20023_v34 }
0x2ecb   :  { %v20292_v25 = vpack.c.bf16 %v11034_v60, %v11031_v26  ;;  %v20294_v56 = vsub.f32 %v11002_v24, %v11031_v26 }
0x2ecc   :  { %16677 = vmatmul.mubr.f32.gmra.mrb[26].mxu0 %v10277_v50 }
0x2ecd   :  { %17766 = vmatpush3.bf16.msra.mxu0 %v20023_v34  ;;  %16697 = vmatprep.mubr.f32.mxu0 %v10248_v41 }
0x2ece   :  { %17768 = vmatprep.subr.bf16.mxu0 %v20034_v51 }
0x2ed1   :  { %17770 = vmatpush3.bf16.msra.mxu0 %v20034_v51 }
0x2ed2   :  { %17772 = vmatprep.subr.bf16.mxu0 %v20052_v63 }
0x2ed5   :  { %17774 = vmatpush3.bf16.msra.mxu0 %v20052_v63 }
0x2ed6   :  { %16695 = vmatprep.subr.mxu0 %v20076_v18 }
0x2ed9   :  { %16696 = vmatpush3.msra.mxu0 %v20076_v18 }
0x2eda   :  { %16698 = vmatmul.mubr.f32.vlgmr.msra.gmra.mrb[24].mxu0 %v10258_v28  ;;  %17776 = vmatprep.subr.bf16.mxu0 %v20140_v49 }
0x2edb   :  { %16700 = vmatprep.mubr.f32.mxu0 %v10268_v15  ;;  %17778 = vmatpush3.bf16.msra.mxu0 %v20140_v49 }
0x2edc   :  { %17780 = vmatprep.subr.bf16.mxu0 %v20142_v39 }
0x2ede   :  { %16701 = vmatmul.mubr.f32.gmra.mrb[26].mxu0 %v10278_v33 }
0x2edf   :  { %17782 = vmatpush3.bf16.msra.mxu0 %v20142_v39  ;;  %16721 = vmatprep.mubr.f32.mxu0 %v20157_v31 }
0x2ee0   :  { %17784 = vmatprep.subr.bf16.mxu0 %v20144_v22 }
0x2ee3   :  { %17786 = vmatpush3.bf16.msra.mxu0 %v20144_v22 }
0x2ee4   :  { %17788 = vmatprep.subr.bf16.mxu0 %v20146_v23 }
0x2ee7   :  { %17790 = vmatpush3.bf16.msra.mxu0 %v20146_v23 }
0x2ee8   :  { %16719 = vmatprep.subr.mxu0 %v10345_v45 }
0x2eeb   :  { %16720 = vmatpush3.msra.mxu0 %v10345_v45 }
0x2eec   :  { %16722 = vmatmul.mubr.f32.vlgmr.msra.gmra.mrb[24].mxu0 %v20166_v20  ;;  %17792 = vmatprep.subr.bf16.mxu0 %v20015_v10 }
0x2eed   :  { %16724 = vmatprep.mubr.f32.mxu0 %v20182_v35  ;;  %17794 = vmatpush3.bf16.msra.mxu0 %v20015_v10  ;;  %v15003_v10 = vld [vmem:[%s14949_s28] ss:$0 sm:$0xff]  ;;  %s20715_s28 = sld [smem:[%s21552_s0 + %s18928_s24]]  }
0x2eee   :  { %17796 = vmatprep.subr.bf16.mxu0 %v20023_v34 }
0x2ef0   :  { %16725 = vmatmul.mubr.f32.gmra.mrb[26].mxu0 %v20192_v7 }
0x2ef1   :  { %17798 = vmatpush3.bf16.msra.mxu0 %v20023_v34  ;;  %16745 = vmatprep.mubr.f32.mxu0 %v20157_v31 }
0x2ef2   :  { %17800 = vmatprep.subr.bf16.mxu0 %v20034_v51 }
0x2ef5   :  { %17802 = vmatpush3.bf16.msra.mxu0 %v20034_v51 }
0x2ef6   :  { %17804 = vmatprep.subr.bf16.mxu0 %v20052_v63 }
0x2ef9   :  { %17806 = vmatpush3.bf16.msra.mxu0 %v20052_v63 }
0x2efa   :  { %16743 = vmatprep.subr.mxu0 %v20076_v18 }
0x2efd   :  { %16744 = vmatpush3.msra.mxu0 %v20076_v18 }
0x2efe   :  { %16746 = vmatmul.mubr.f32.vlgmr.msra.gmra.mrb[24].mxu0 %v20166_v20  ;;  %17808 = vmatprep.subr.bf16.mxu0 %v20292_v25 }
0x2eff   :  { %16748 = vmatprep.mubr.f32.mxu0 %v20182_v35  ;;  %17810 = vmatpush3.bf16.msra.mxu0 %v20292_v25 }
0x2f02   :  { %16749 = vmatmul.mubr.f32.gmra.mrb[26].mxu0 %v20192_v7  ;;  %v20296_v7 = vsub.f32 %v11003_v0, %v11034_v60 }
0x2f04   :  { %v17839_v15 = vpack.c.bf16 %v20296_v7, %v20294_v56 }
0x2f06   :  { %17840 = vmatprep.subr.bf16.mxu1 %v17839_v15 }
0x2f07   :  { %17842 = vmatpush3.bf16.msra.mxu1 %v17839_v15 }
0x2fd1   :  { %v16747_v34 = vpop.f32.mrb[24].mxu0 }
0x2fd2   :  { %v18228_v51 = vadd.f32 %v16747_v34, %v15003_v10  ;;  %v10829_v54 = vpop.f32.mrb[25].mxu0 }
0x2fd3   :  { %v18229_v63 = vadd.f32 %v15003_v10, %v10829_v54  ;;  %v11040_v54 = vand.u32 4294901760, %v11005_v16 }
0x2fd4   :  { %v10854_v2 = vsel %vm211_vm4, %v18228_v51, 0.0 }
0x2fd5   :  { %10855 = vadd.xlane.f32.xlu0 %v10854_v2  ;;  %v16750_v18 = vpop.f32.mrb[26].mxu0  ;;  %v10851_v52 = vsel %vm211_vm4, %v18229_v63, 0.0 }
0x2fd6   :  { %v18230_v38 = vadd.f32 %v16750_v18, %v15003_v10  ;;  %v10841_v61 = vpop.f32.mrb[27].mxu0  ;;  %10852 = vadd.xlane.f32.xlu1 %v10851_v52  ;;  %v20313_v52 = vsub.f32 %v11005_v16, %v11040_v54 }
0x2fd7   :  { %v18231_v32 = vadd.f32 %v15003_v10, %v10841_v61  ;;  %v11007_v61 = vld [vmem:[%s20288_s2 + $0x28] sm:$0xff] }
0x2fd8   :  { %v10860_v3 = vsel %vm211_vm4, %v18230_v38, 0.0 }
0x2fd9   :  { %v10857_v42 = vsel %vm211_vm4, %v18231_v32, 0.0 }
0x2fda   :  { %10858 = vadd.xlane.f32.xlu0 %v10857_v42  ;;  %10861 = vadd.xlane.f32.xlu1 %v10860_v3  ;;  %v11046_v3 = vand.u32 4294901760, %v11007_v61 }
0x3062   :  { %v10856_v49 = vpop.xlane.xlu0 %10855 }
0x3063   :  { %v10865_v39 = vmul.f32 0.041666668, %v10856_v49  ;;  %v10853_v22 = vpop.xlane.xlu1 %10852 }
0x3064   :  { %v10864_v23 = vmul.f32 0.041666668, %v10853_v22  ;;  %v20323_v22 = vsub.f32 %v11007_v61, %v11046_v3 }
0x3065   :  { %v20265_v31 = vsub.f32 %v18228_v51, %v10865_v39  ;;  %v11037_v51 = vand.u32 4294901760, %v11004_v37 }
0x3066   :  { %v20267_v12 = vsub.f32 %v18229_v63, %v10864_v23  ;;  %v11008_v23 = vld [vmem:[%s20288_s2 + $0x30] sm:$0xff] }
0x3067   :  { %v10859_v20 = vpop.xlane.xlu0 %10858  ;;  %v10862_v59 = vpop.xlane.xlu1 %10861  ;;  %v10873_v41 = vmul.f32 %v20265_v31, %v20265_v31  ;;  %v20307_v18 = vsub.f32 %v11004_v37, %v11037_v51  ;;  %v20317_v42 = vpack.c.bf16 %v11040_v54, %v11037_v51 }
0x3068   :  { %v10866_v6 = vmul.f32 0.041666668, %v10859_v20  ;;  %v10867_v13 = vmul.f32 0.041666668, %v10862_v59  ;;  %v10872_v44 = vmul.f32 %v20267_v12, %v20267_v12  ;;  %v11009_v20 = vld [vmem:[%s20288_s2 + $0x38] sm:$0xff] }
0x3069   :  { %v10879_v40 = vsel %vm211_vm4, %v10873_v41, 0.0  ;;  %v17843_v49 = vpack.c.bf16 %v20313_v52, %v20307_v18  ;;  %17812 = vmatprep.subr.bf16.mxu0 %v20317_v42  ;;  %v11049_v41 = vand.u32 4294901760, %v11008_v23 }
0x306a   :  { %v20274_v48 = vsub.f32 %v18231_v32, %v10866_v6  ;;  %v20276_v57 = vsub.f32 %v18230_v38, %v10867_v13  ;;  %10880 = vadd.xlane.f32.xlu1 %v10879_v40  ;;  %v10876_v55 = vsel %vm211_vm4, %v10872_v44, 0.0  ;;  %v11006_v38 = vld [vmem:[%s20288_s2 + $0x20] sm:$0xff]  ;;  %17814 = vmatpush3.bf16.msra.mxu0 %v20317_v42  ;;  %v11052_v6 = vand.u32 4294901760, %v11009_v20 }
0x306b   :  { %10877 = vadd.xlane.f32.xlu0 %v10876_v55  ;;  %v11043_v32 = vand.u32 4294901760, %v11006_v38  ;;  %17844 = vmatprep.subr.bf16.mxu1 %v17843_v49  ;;  %v15004_v44 = vld [vmem:[%s14950_s12] ss:$0 sm:$0xff]  ;;  %s14964_s12 = sld [smem:[%s21552_s0 + %s18935_s10]]  }
0x306c   :  { %v10874_v28 = vmul.f32 %v20274_v48, %v20274_v48  ;;  %v10875_v35 = vmul.f32 %v20276_v57, %v20276_v57  ;;  %17846 = vmatpush3.bf16.msra.mxu1 %v17843_v49  ;;  %v20341_v15 = vpack.c.bf16 %v11052_v6, %v11049_v41 }
0x306d   :  { %v20321_v39 = vsub.f32 %v11006_v38, %v11043_v32  ;;  %v20339_v60 = vpack.c.bf16 %v11046_v3, %v11043_v32  ;;  %v11154_v38 = vand.u32 4294901760, %v20296_v7 }
0x306e   :  { %v10882_v27 = vsel %vm211_vm4, %v10874_v28, 0.0  ;;  %v10885_v14 = vsel %vm211_vm4, %v10875_v35, 0.0  ;;  %v20332_v28 = vsub.f32 %v11008_v23, %v11049_v41  ;;  %v20334_v35 = vsub.f32 %v11009_v20, %v11052_v6  ;;  %v20376_v23 = vld [vmem:[%s18948_s6] sm:$0xff] }
0x306f   :  { %10883 = vadd.xlane.f32.xlu0 %v10882_v27  ;;  %10886 = vadd.xlane.f32.xlu1 %v10885_v14  ;;  %v17847_v59 = vpack.c.bf16 %v20323_v22, %v20321_v39  ;;  %v15005_v27 = vld [vmem:[%s14951_s16] ss:$0 sm:$0xff]  ;;  %v11787_v20 = vrot.slane %v20376_v23, 7  ;;  %v11155_v41 = vsub.f32 %v20296_v7, %v11154_v38  ;;  %s18931_s16 = smov 21  }
0x3070   :  { %v17851_v0 = vpack.c.bf16 %v20334_v35, %v20332_v28  ;;  %17816 = vmatprep.subr.bf16.mxu0 %v20339_v60 }
0x3071   :  { %17848 = vmatprep.subr.bf16.mxu1 %v17847_v59  ;;  %17818 = vmatpush3.bf16.msra.mxu0 %v20339_v60 }
0x3072   :  { %17850 = vmatpush3.bf16.msra.mxu1 %v17847_v59  ;;  %17820 = vmatprep.subr.bf16.mxu0 %v20341_v15 }
0x3073   :  { %17852 = vmatprep.subr.bf16.mxu1 %v17851_v0 }
0x3075   :  { %17822 = vmatpush3.bf16.msra.mxu0 %v20341_v15 }
0x3076   :  { %17854 = vmatpush3.bf16.msra.mxu1 %v17851_v0 }
0x30f7   :  { %v10881_v46 = vpop.xlane.xlu1 %10880 }
0x30f8   :  { %v10889_v50 = vmul.f32 0.041666668, %v10881_v46  ;;  %v10878_v11 = vpop.xlane.xlu0 %10877  ;;  %v11010_v46 = vld [vmem:[%s20288_s2 + $0x40] sm:$0xff]  ;;  %s14957_s2 = sld [smem:[%s21552_s0 + %s18929_s29]]  }
0x30f9   :  { %v10888_v30 = vmul.f32 0.041666668, %v10878_v11  ;;  %v20344_v11 = vand.u32 4294901760, %v11010_v46 }
0x30fa   :  { %v10893_v33 = vadd.f32 1e-05, %v10889_v50 }
0x30fb   :  { %v10892_v45 = vadd.f32 1e-05, %v10888_v30  ;;  %16767 = vmatprep.subr.mxu0 %v20344_v11 }
0x30fc   :  { %18845 = vrsqrt.f32 %v10893_v33  ;;  %v10884_v62 = vpop.xlane.xlu0 %10883  ;;  %v10887_v8 = vpop.xlane.xlu1 %10886  ;;  %16768 = vmatpush3.msra.mxu0 %v20344_v11 }
0x30fd   :  { %18847 = vrsqrt.f32 %v10892_v45  ;;  %v10890_v10 = vmul.f32 0.041666668, %v10884_v62  ;;  %v10891_v34 = vmul.f32 0.041666668, %v10887_v8  ;;  %v20351_v8 = vsub.f32 %v11010_v46, %v20344_v11 }
0x30ff   :  { %v10894_v63 = vadd.f32 1e-05, %v10890_v10  ;;  %v10895_v2 = vadd.f32 1e-05, %v10891_v34  ;;  %16815 = vmatprep.subr.mxu1 %v20351_v8 }
0x3100   :  { %16816 = vmatpush3.msra.mxu1 %v20351_v8 }
0x3101   :  { %18849 = vrsqrt.f32 %v10894_v63  ;;  %v11147_v63 = vand.u32 4294901760, %v20294_v56  ;;  %17856 = vmatprep.subr.bf16.mxu1 %v20292_v25 }
0x3102   :  { %18851 = vrsqrt.f32 %v10895_v2 }
0x3103   :  { %v11148_v59 = vsub.f32 %v20294_v56, %v11147_v63 }
0x3106   :  { %v18846_v13 = vpop.eup %18845 }
0x3107   :  { %v18848_v40 = vpop.eup %18847  ;;  %v10901_v55 = vmul.f32 %v18846_v13, %v20265_v31 }
0x3108   :  { %v10900_v14 = vmul.f32 %v18848_v40, %v20267_v12  ;;  %v11168_v40 = vand.u32 4294901760, %v20313_v52 }
0x3109   :  { %v10912_v24 = vmul.f32 %v15004_v44, %v10901_v55 }
0x310a   :  { %v10911_v26 = vmul.f32 %v15004_v44, %v10900_v14  ;;  %v11149_v14 = vand.u32 4294901760, %v11148_v59  ;;  %v11196_v59 = vand.u32 4294901760, %v20334_v35 }
0x310b   :  { %v18850_v31 = vpop.eup %18849  ;;  %v10923_v50 = vadd.f32 %v15005_v27, %v10912_v24  ;;  %v11156_v24 = vand.u32 4294901760, %v11155_v41  ;;  %v20425_v41 = vld [vmem:[%s18948_s6 + $0x10] sm:$0xff] }
0x310c   :  { %v18852_v30 = vpop.eup %18851  ;;  %v10922_v33 = vadd.f32 %v15005_v27, %v10911_v26  ;;  %v10902_v12 = vmul.f32 %v18850_v31, %v20274_v48  ;;  %v11169_v31 = vsub.f32 %v20313_v52, %v11168_v40  ;;  %v11182_v52 = vand.u32 4294901760, %v20323_v22 }
0x310d   :  { %v10903_v45 = vmul.f32 %v18852_v30, %v20276_v57  ;;  %v10927_v62 = vmax.f32 %v10923_v50, 0.0  ;;  %v11798_v30 = vsel %vm9273_vm7, %v20376_v23, %v11787_v20 }
0x310e   :  { %v20353_v37 = vmax.f32 %v10922_v33, 0.0  ;;  %v10913_v16 = vmul.f32 %v15004_v44, %v10902_v12  ;;  %v20403_v12 = vpack.c.bf16 %v11156_v24, %v11149_v14 }
0x310f   :  { %10968 = vrot.lane.b32.xlu1 %v10927_v62, %s18921_s21  ;;  %v10914_v10 = vmul.f32 %v15004_v44, %v10903_v45  ;;  %v10951_v48 = vrot.slane %v10927_v62, 1  ;;  %v10935_v34 = vrot.slane %v10927_v62, 7  ;;  %v11161_v44 = vand.u32 4294901760, %v20307_v18 }
0x3110   :  { %10966 = vrot.lane.b32.xlu0 %v20353_v37, %s18921_s21  ;;  %v10950_v57 = vrot.slane %v20353_v37, 1  ;;  %v10924_v51 = vadd.f32 %v15005_v27, %v10913_v16  ;;  %v10934_v54 = vrot.slane %v20353_v37, 7  ;;  %v11170_v62 = vand.u32 4294901760, %v11169_v31  ;;  %17824 = vmatprep.subr.bf16.mxu0 %v20403_v12 }
0x3111   :  { %v10925_v2 = vadd.f32 %v15005_v27, %v10914_v10  ;;  %v11162_v46 = vsub.f32 %v20307_v18, %v11161_v44  ;;  %v11175_v18 = vand.u32 4294901760, %v20321_v39  ;;  %v20410_v10 = vld [vmem:[%s18948_s6 + $0x8] sm:$0xff] }
0x3112   :  { %v10952_v61 = vsel %vm9291_vm13, %v10950_v57, %v10951_v48  ;;  %v10928_v32 = vmax.f32 %v10924_v51, 0.0  ;;  %v20370_v3 = vsel %vm9273_vm7, %v10934_v54, %v10935_v34  ;;  %v11183_v51 = vsub.f32 %v20323_v22, %v11182_v52 }
0x3113   :  { %10982 = vrot.lane.b32.xlu1 %v10952_v61, %s18922_s22  ;;  %v10929_v49 = vmax.f32 %v10925_v2, 0.0  ;;  %v11163_v45 = vand.u32 4294901760, %v11162_v46  ;;  %v11176_v57 = vsub.f32 %v20321_v39, %v11175_v18  ;;  %v11799_v61 = vsel %vm19852_vm14, 0.0, %v11798_v30 }
0x3114   :  { %v10953_v6 = vrot.slane %v10928_v32, 1  ;;  %v10937_v13 = vrot.slane %v10928_v32, 7  ;;  %v11197_v22 = vsub.f32 %v20334_v35, %v11196_v59  ;;  %v20455_v30 = vpack.c.bf16 %v11168_v40, %v11161_v44 }
0x3115   :  { %v10955_v55 = vrot.slane %v10929_v49, 1  ;;  %v10939_v27 = vrot.slane %v10929_v49, 7  ;;  %v20461_v7 = vpack.c.bf16 %v11182_v52, %v11175_v18  ;;  %v10945_v44 = vsel %vm9273_vm7, %v20353_v37, %v10934_v54 }
0x3116   :  { %v10954_v0 = vsel %vm9291_vm13, %v10951_v48, %v10953_v6  ;;  %v20390_v26 = vsel %vm9273_vm7, %v10935_v34, %v10937_v13  ;;  %v11788_v48 = vrot.slane %v20410_v10, 7  ;;  %v20414_v34 = vpack.c.bf16 %v11170_v62, %v11163_v45 }
0x3117   :  { %10970 = vrot.lane.b32.xlu1 %v10928_v32, %s18921_s21  ;;  %v10963_v50 = vsel %vm19925_vm5, 0.0, %v10954_v0  ;;  %v20401_v33 = vsel %vm9273_vm7, %v10937_v13, %v10939_v27  ;;  %v10956_v16 = vsel %vm9291_vm13, %v10953_v6, %v10955_v55  ;;  %v10961_v2 = vsel %vm9291_vm13, %v10955_v55, %v10929_v49 }
0x3118   :  { %10984 = vrot.lane.b32.xlu0 %v10963_v50, %s18922_s22  ;;  %v11189_v32 = vand.u32 4294901760, %v20332_v28  ;;  %v11790_v6 = vrot.slane %v20425_v41, 7  ;;  %v11177_v13 = vand.u32 4294901760, %v11176_v57  ;;  %v11184_v27 = vand.u32 4294901760, %v11183_v51 }
0x3119   :  { %v11789_v14 = vsel %vm9273_vm7, %v11787_v20, %v11788_v48  ;;  %v11198_v0 = vand.u32 4294901760, %v11197_v22  ;;  %v20452_v20 = vld [vmem:[%s18948_s6 + $0x18] sm:$0xff]  ;;  %v10946_v45 = vsel %vm19852_vm14, 0.0, %v10945_v44  ;;  %s18926_s6 = smov 17  }
0x311a   :  { %v11190_v39 = vsub.f32 %v20332_v28, %v11189_v32  ;;  %v20433_v55 = vpack.c.bf16 %v11184_v27, %v11177_v13  ;;  %v11791_v46 = vsel %vm9273_vm7, %v11788_v48, %v11790_v6  ;;  %v20444_v28 = vpack.c.bf16 %v11154_v38, %v11147_v63 }
0x311b   :  { %10986 = vrot.lane.b32.xlu1 %v10956_v16, %s18922_s22  ;;  %v11801_v35 = vsel %vm19873_vm15, 0.0, %v11791_v46  ;;  %v11792_v50 = vrot.slane %v20452_v20, 7  ;;  %v20466_v63 = vpack.c.bf16 %v11196_v59, %v11189_v32 }
0x311c   :  { %10972 = vrot.lane.b32.xlu0 %v10929_v49, %s18921_s21  ;;  %v10965_v49 = vsel %vm19950_vm8, 0.0, %v10961_v2  ;;  %v11191_v24 = vand.u32 4294901760, %v11190_v39 }
0x311d   :  { %v11793_v56 = vsel %vm9273_vm7, %v11790_v6, %v11792_v50  ;;  %v11806_v50 = vrot.slane %v20425_v41, 1 }
0x311e   :  { %v20438_v31 = vpack.c.bf16 %v11198_v0, %v11191_v24  ;;  %v11804_v24 = vrot.slane %v20410_v10, 1 }
0x311f   :  { %11823 = vrot.lane.b32.xlu1 %v11799_v61, %s18917_s8  ;;  %v10948_v61 = vsel %vm19873_vm15, 0.0, %v20390_v26 }
0x3120   :  { %10988 = vrot.lane.b32.xlu0 %v10965_v49, %s18922_s22 }
0x3123   :  { %11825 = vrot.lane.b32.xlu1 %v11789_v14, %s18917_s8 }
0x3124   :  { %11835 = vrot.lane.b32.xlu0 %v20376_v23, %s18919_s13 }
0x3127   :  { %11827 = vrot.lane.b32.xlu1 %v11801_v35, %s18917_s8 }
0x3128   :  { %11837 = vrot.lane.b32.xlu0 %v20410_v10, %s18919_s13 }
0x312b   :  { %11829 = vrot.lane.b32.xlu1 %v11793_v56, %s18917_s8  ;;  %s14960_s8 = sld [smem:[%s21552_s0 + %s18931_s16]]  }
0x312c   :  { %11839 = vrot.lane.b32.xlu0 %v20425_v41, %s18919_s13 }
0x3130   :  { %11841 = vrot.lane.b32.xlu0 %v20452_v20, %s18919_s13  ;;  %s14956_s13 = sld [smem:[%s21552_s0 + %s18926_s6]]  }
0x3131   :  { %s14965_s6 = sld [smem:[%s21552_s0 + %s18936_s14]]  }
0x3136   :  { %v11856_v49 = vld [vmem:[%s14956_s13 + $0x8] sm:$0xf]  ;;  %v20508_v35 = vld [vmem:[%s14956_s13] sm:$0xff]  ;;  %s18932_s13 = smov 22  }
0x3137   :  { %s14961_s19 = sld [smem:[%s21552_s0 + %s18932_s13]]  }
0x3181   :  { %v10969_v38 = vpop.permute.xlu1 %10968 }
0x3182   :  { %v10967_v40 = vpop.permute.xlu0 %10966  ;;  %v10995_v37 = vsel %vm211_vm4, %v20370_v3, %v10969_v38  ;;  %v11803_v38 = vrot.slane %v20376_v23, 1 }
0x3183   :  { %v10994_v62 = vsel %vm211_vm4, %v10946_v45, %v10967_v40  ;;  %v20515_v40 = vsel %vm9282_vm10, %v11856_v49, 0 }
0x3185   :  { %v10983_v18 = vpop.permute.xlu1 %10982 }
0x3186   :  { %v10998_v52 = vsel %vm10138_vm0, %v10994_v62, %v10983_v18  ;;  %v11880_v18 = vand.u32 4294901760, %v20508_v35 }
0x3187   :  { %v11019_v16 = vsel %vm10159_vm9, %v10998_v52, 0 }
0x3188   :  { %v20482_v48 = vand.u32 4294901760, %v11019_v16 }
0x3189   :  { %v10971_v57 = vpop.permute.xlu1 %10970 }
0x318a   :  { %v20487_v54 = vsub.f32 %v11019_v16, %v20482_v48  ;;  %v10985_v51 = vpop.permute.xlu0 %10984  ;;  %v10996_v6 = vsel %vm211_vm4, %v10948_v61, %v10971_v57  ;;  %v11883_v16 = vand.u32 4294901760, %v20515_v40 }
0x318b   :  { %v10999_v2 = vsel %vm10138_vm0, %v10995_v37, %v10985_v51  ;;  %v11807_v51 = vsel %vm9291_vm13, %v11804_v24, %v11806_v50 }
0x318c   :  { %v11022_v32 = vsel %vm10159_vm9, %v10999_v2, 0  ;;  %16817 = vmatprep.mubr.f32.mxu1 %v20487_v54  ;;  %v11106_v59 = vand.u32 4294901760, %v20487_v54  ;;  %v11816_v49 = vsel %vm19925_vm5, 0.0, %v11807_v51 }
0x318d   :  { %v20497_v13 = vand.u32 4294901760, %v11022_v32  ;;  %v10987_v3 = vpop.permute.xlu1 %10986 }
0x318e   :  { %v11000_v27 = vsel %vm10138_vm0, %v10996_v6, %v10987_v3  ;;  %v10973_v39 = vpop.permute.xlu0 %10972  ;;  %v11107_v22 = vsub.f32 %v20487_v54, %v11106_v59  ;;  %v11805_v54 = vsel %vm9291_vm13, %v11803_v38, %v11804_v24  ;;  %v20566_v38 = vand.u32 4294901760, %v20351_v8 }
0x318f   :  { %v20502_v14 = vsub.f32 %v11022_v32, %v20497_v13  ;;  %v11025_v26 = vsel %vm10159_vm9, %v11000_v27, 0  ;;  %v10997_v10 = vsel %vm211_vm4, %v20401_v33, %v10973_v39  ;;  %v20549_v27 = vsub.f32 %v20508_v35, %v11880_v18 }
0x3190   :  { %v20506_v0 = vand.u32 4294901760, %v11025_v26  ;;  %v11108_v46 = vand.u32 4294901760, %v11107_v22 }
0x3191   :  { %v11116_v56 = vand.u32 4294901760, %v20502_v14  ;;  %16818 = vmatmul.mubr.f32.vlgmr.msra.gmra.mrb[22].mxu1 %v20502_v14  ;;  %v11824_v44 = vpop.permute.xlu1 %11823 }
0x3192   :  { %v20518_v45 = vsub.f32 %v11025_v26, %v20506_v0  ;;  %17858 = vmatpush3.bf16.msra.mxu1 %v20292_v25  ;;  %v10989_v62 = vpop.permute.xlu0 %10988  ;;  %16769 = vmatprep.mubr.f32.mxu0 %v11108_v46  ;;  %v20558_v26 = vsub.f32 %v20515_v40, %v11883_v16 }
0x3193   :  { %v11117_v41 = vsub.f32 %v20502_v14, %v11116_v56  ;;  %v11001_v23 = vsel %vm10138_vm0, %v10997_v10, %v10989_v62  ;;  %17860 = vmatprep.subr.bf16.mxu1 %v20317_v42 }
0x3194   :  { %v11028_v52 = vsel %vm10159_vm9, %v11001_v23, 0  ;;  %16820 = vmatprep.mubr.f32.mxu1 %v20518_v45  ;;  %v11126_v33 = vand.u32 4294901760, %v20518_v45  ;;  %v11989_v23 = vand.u32 4294901760, %v20549_v27 }
0x3195   :  { %v11118_v57 = vand.u32 4294901760, %v11117_v41  ;;  %v20533_v37 = vand.u32 4294901760, %v11028_v52  ;;  %v11826_v2 = vpop.permute.xlu1 %11825 }
0x3196   :  { %17862 = vmatpush3.bf16.msra.mxu1 %v20317_v42  ;;  %v11836_v61 = vpop.permute.xlu0 %11835  ;;  %v11127_v32 = vsub.f32 %v20518_v45, %v11126_v33 }
0x3197   :  { %v20542_v6 = vsub.f32 %v11028_v52, %v20533_v37  ;;  %16770 = vmatmul.mubr.f32.vlgmr.msra.gmra.mrb[28].mxu0 %v11118_v57  ;;  %v11847_v3 = vsel %vm9449_vm2, %v11824_v44, %v11836_v61  ;;  %17864 = vmatprep.subr.bf16.mxu1 %v20339_v60  ;;  %v11204_v61 = vsub.f32 %v20351_v8, %v20566_v38 }
0x3198   :  { %17826 = vmatpush3.bf16.msra.mxu0 %v20403_v12  ;;  %v11851_v39 = vsel %vm186_vm1, %v11847_v3, %v11805_v54  ;;  %v11128_v22 = vand.u32 4294901760, %v11127_v32  ;;  %v11808_v12 = vrot.slane %v20452_v20, 1  ;;  %v11996_v54 = vand.u32 4294901760, %v20558_v26 }
0x3199   :  { %v11865_v24 = vsel %vm191_vm3, %v11851_v39, 0  ;;  %16821 = vmatmul.mubr.f32.gmra.mrb[24].mxu1 %v20542_v6  ;;  %17828 = vmatprep.subr.bf16.mxu0 %v20414_v34  ;;  %v11136_v46 = vand.u32 4294901760, %v20542_v6  ;;  %v11828_v10 = vpop.permute.xlu1 %11827 }
0x319a   :  { %17866 = vmatpush3.bf16.msra.mxu1 %v20339_v60  ;;  %16772 = vmatprep.mubr.f32.mxu0 %v11128_v22  ;;  %v11838_v44 = vpop.permute.xlu0 %11837  ;;  %v20573_v52 = vand.u32 4294901760, %v11865_v24  ;;  %v11997_v22 = vsub.f32 %v20558_v26, %v11996_v54 }
0x319b   :  { %16841 = vmatprep.mubr.f32.mxu1 %v11106_v59  ;;  %v11848_v62 = vsel %vm9449_vm2, %v11826_v2, %v11838_v44  ;;  %17868 = vmatprep.subr.bf16.mxu1 %v20341_v15  ;;  %v11137_v41 = vsub.f32 %v20542_v6, %v11136_v46  ;;  %v11809_v2 = vsel %vm9291_vm13, %v11806_v50, %v11808_v12 }
0x319c   :  { %17830 = vmatpush3.bf16.msra.mxu0 %v20414_v34  ;;  %v11852_v57 = vsel %vm186_vm1, %v11848_v62, %v11816_v49  ;;  %v11814_v34 = vsel %vm9291_vm13, %v11808_v12, %v20452_v20  ;;  %v11990_v50 = vsub.f32 %v20549_v27, %v11989_v23  ;;  %v20594_v39 = vsub.f32 %v11865_v24, %v20573_v52 }
0x319d   :  { %v11868_v51 = vsel %vm191_vm3, %v11852_v57, 0  ;;  %17832 = vmatprep.subr.bf16.mxu0 %v20433_v55  ;;  %v11138_v59 = vand.u32 4294901760, %v11137_v41  ;;  %v11830_v20 = vpop.permute.xlu1 %11829  ;;  %v11818_v12 = vsel %vm19950_vm8, 0.0, %v11814_v34  ;;  %v11205_v24 = vand.u32 4294901760, %v11204_v61 }
0x319e   :  { %17870 = vmatpush3.bf16.msra.mxu1 %v20341_v15  ;;  %v11840_v32 = vpop.permute.xlu0 %11839  ;;  %v20586_v6 = vand.u32 4294901760, %v11868_v51  ;;  %v11991_v41 = vand.u32 4294901760, %v11990_v50  ;;  %v17911_v34 = vpack.c.bf16 %v20558_v26, %v20549_v27 }
0x319f   :  { %16773 = vmatmul.mubr.f32.gmra.mrb[30].mxu0 %v11138_v59  ;;  %v11849_v3 = vsel %vm9449_vm2, %v11828_v10, %v11840_v32  ;;  %16839 = vmatprep.subr.mxu1 %v20344_v11 }
0x31a0   :  { %17834 = vmatpush3.bf16.msra.mxu0 %v20433_v55  ;;  %v11853_v8 = vsel %vm186_vm1, %v11849_v3, %v11809_v2  ;;  %16793 = vmatprep.mubr.f32.mxu0 %v20482_v48  ;;  %v20610_v10 = vsub.f32 %v11868_v51, %v20586_v6  ;;  %v11948_v51 = vand.u32 4294901760, %v20594_v39  ;;  %v11998_v2 = vand.u32 4294901760, %v11997_v22 }
0x31a1   :  { %v11871_v49 = vsel %vm191_vm3, %v11853_v8, 0  ;;  %17836 = vmatprep.subr.bf16.mxu0 %v20438_v31  ;;  %v12540_v8 = vld [vmem:[%s20715_s28 + $0x8] sm:$0xff] }
0x31a2   :  { %v20606_v44 = vand.u32 4294901760, %v11871_v49  ;;  %16840 = vmatpush3.msra.mxu1 %v20344_v11  ;;  %v11842_v55 = vpop.permute.xlu0 %11841  ;;  %v11958_v45 = vand.u32 4294901760, %v20610_v10  ;;  %v17907_v61 = vpack.c.bf16 %v11998_v2, %v11991_v41  ;;  %v12571_v22 = vand.u32 4294901760, %v12540_v8  ;;  %v12544_v41 = vld [vmem:[%s20715_s28 + $0x28] sm:$0xff] }
0x31a3   :  { %16842 = vmatmul.mubr.f32.vlgmr.msra.gmra.mrb[22].mxu1 %v11116_v56  ;;  %17872 = vmatprep.subr.bf16.mxu1 %v20444_v28  ;;  %v11850_v62 = vsel %vm9449_vm2, %v11830_v20, %v11842_v55 }
0x31a4   :  { %v20617_v57 = vsub.f32 %v11871_v49, %v20606_v44  ;;  %17838 = vmatpush3.bf16.msra.mxu0 %v20438_v31  ;;  %16844 = vmatprep.mubr.f32.mxu1 %v11126_v33  ;;  %v11854_v59 = vsel %vm186_vm1, %v11850_v62, %v11818_v12  ;;  %v20633_v31 = vpack.c.bf16 %v11883_v16, %v11880_v18  ;;  %v12541_v12 = vld [vmem:[%s20715_s28 + $0x10] sm:$0xff]  ;;  %v12543_v62 = vld [vmem:[%s20715_s28 + $0x20] sm:$0xff] }
0x31a5   :  { %17874 = vmatpush3.bf16.msra.mxu1 %v20444_v28  ;;  %v11874_v14 = vsel %vm191_vm3, %v11854_v59, 0  ;;  %16791 = vmatprep.subr.mxu0 %v11205_v24  ;;  %v11949_v28 = vsub.f32 %v20594_v39, %v11948_v51  ;;  %v11959_v40 = vsub.f32 %v20610_v10, %v11958_v45  ;;  %v12580_v59 = vand.u32 4294901760, %v12543_v62 }
0x31a6   :  { %v20626_v56 = vand.u32 4294901760, %v11874_v14  ;;  %17876 = vmatprep.subr.bf16.mxu1 %v20455_v30  ;;  %v11968_v35 = vand.u32 4294901760, %v20617_v57  ;;  %vm14233_vm3 = vcmask 326656  }
0x31a7   :  { %16845 = vmatmul.mubr.f32.gmra.mrb[24].mxu1 %v11136_v46  ;;  %v11950_v16 = vand.u32 4294901760, %v11949_v28  ;;  %v11960_v46 = vand.u32 4294901760, %v11959_v40 }
0x31a8   :  { %v20637_v33 = vsub.f32 %v11874_v14, %v20626_v56  ;;  %16792 = vmatpush3.msra.mxu0 %v11205_v24  ;;  %16865 = vmatprep.mubr.f32.mxu1 %v20482_v48  ;;  %v12542_v24 = vld [vmem:[%s20715_s28 + $0x18] sm:$0xff] }
0x31a9   :  { %17878 = vmatpush3.bf16.msra.mxu1 %v20455_v30  ;;  %16794 = vmatmul.mubr.f32.vlgmr.msra.gmra.mrb[28].mxu0 %v20497_v13  ;;  %v11969_v30 = vsub.f32 %v20617_v57, %v11968_v35  ;;  %v12577_v55 = vand.u32 4294901760, %v12542_v24 }
0x31aa   :  { %17904 = vmatprep.subr.bf16.mxu0 %v20633_v31  ;;  %16796 = vmatprep.mubr.f32.mxu0 %v20506_v0  ;;  %v11978_v18 = vand.u32 4294901760, %v20637_v33 }
0x31ab   :  { %17906 = vmatpush3.bf16.msra.mxu0 %v20633_v31  ;;  %17880 = vmatprep.subr.bf16.mxu1 %v20461_v7  ;;  %v11970_v3 = vand.u32 4294901760, %v11969_v30  ;;  %v20753_v30 = vsub.f32 %v12540_v8, %v12571_v22 }
0x31ac   :  { %17908 = vmatprep.subr.bf16.mxu0 %v17907_v61  ;;  %v11979_v32 = vsub.f32 %v20637_v33, %v11978_v18 }
0x31ad   :  { %17882 = vmatpush3.bf16.msra.mxu1 %v20461_v7  ;;  %16797 = vmatmul.mubr.f32.gmra.mrb[30].mxu0 %v20533_v37 }
0x31ae   :  { %16899 = vmatprep.mubr.f32.mxu0 %v11950_v16  ;;  %17884 = vmatprep.subr.bf16.mxu1 %v20466_v63  ;;  %v11980_v7 = vand.u32 4294901760, %v11979_v32 }
0x31b1   :  { %17886 = vmatpush3.bf16.msra.mxu1 %v20466_v63  ;;  %16900 = vmatmul.mubr.f32.vlgmr.msra.gmra.mrb[32].mxu0 %v11960_v46 }
0x31b2   :  { %16902 = vmatprep.mubr.f32.mxu0 %v11970_v3  ;;  %17910 = vmatpush3.bf16.msra.mxu0 %v17907_v61 }
0x31b3   :  { %16863 = vmatprep.subr.mxu1 %v20566_v38  ;;  %17912 = vmatprep.subr.bf16.mxu0 %v17911_v34 }
0x31b5   :  { %16864 = vmatpush3.msra.mxu1 %v20566_v38  ;;  %16903 = vmatmul.mubr.f32.gmra.mrb[34].mxu0 %v11980_v7 }
0x31b6   :  { %16866 = vmatmul.mubr.f32.vlgmr.msra.gmra.mrb[22].mxu1 %v20497_v13  ;;  %17888 = vmatprep.subr.bf16.mxu1 %v20292_v25 }
0x31b7   :  { %16868 = vmatprep.mubr.f32.mxu1 %v20506_v0  ;;  %17890 = vmatpush3.bf16.msra.mxu1 %v20292_v25  ;;  %v17919_v25 = vpack.c.bf16 %v11996_v54, %v11989_v23 }
0x31b8   :  { %16909 = vmatprep.mubr.f32.mxu0 %v20573_v52  ;;  %17892 = vmatprep.subr.bf16.mxu1 %v20317_v42 }
0x31b9   :  { %16910 = vmatmul.mubr.f32.vlgmr.msra.gmra.mrb[32].mxu0 %v20586_v6 }
0x31ba   :  { %16869 = vmatmul.mubr.f32.gmra.mrb[24].mxu1 %v20533_v37  ;;  %16912 = vmatprep.mubr.f32.mxu0 %v20606_v44 }
0x31bb   :  { %17894 = vmatpush3.bf16.msra.mxu1 %v20317_v42  ;;  %16889 = vmatprep.mubr.f32.mxu1 %v20482_v48 }
0x31bc   :  { %17914 = vmatpush3.bf16.msra.mxu0 %v17911_v34  ;;  %17896 = vmatprep.subr.bf16.mxu1 %v20339_v60 }
0x31bd   :  { %16913 = vmatmul.mubr.f32.gmra.mrb[34].mxu0 %v20626_v56  ;;  %17916 = vmatprep.subr.bf16.mxu0 %v20633_v31 }
0x31be   :  { %16919 = vmatprep.mubr.f32.mxu0 %v20594_v39  ;;  %v12539_v39 = vld [vmem:[%s20715_s28] sm:$0xff] }
0x31bf   :  { %17898 = vmatpush3.bf16.msra.mxu1 %v20339_v60  ;;  %v12568_v20 = vand.u32 4294901760, %v12539_v39 }
0x31c0   :  { %17900 = vmatprep.subr.bf16.mxu1 %v20341_v15 }
0x31c1   :  { %16920 = vmatmul.mubr.f32.vlgmr.msra.gmra.mrb[32].mxu0 %v20610_v10  ;;  %v20730_v49 = vpack.c.bf16 %v12571_v22, %v12568_v20  ;;  %v20749_v40 = vsub.f32 %v12539_v39, %v12568_v20  ;;  %v12704_v20 = vsub.f32 %v12542_v24, %v12577_v55 }
0x31c2   :  { %16922 = vmatprep.mubr.f32.mxu0 %v20617_v57  ;;  %17918 = vmatpush3.bf16.msra.mxu0 %v20633_v31  ;;  %v15009_v57 = vld [vmem:[%s14957_s2] ss:$0 sm:$0xff] }
0x31c3   :  { %17902 = vmatpush3.bf16.msra.mxu1 %v20341_v15  ;;  %17920 = vmatprep.subr.bf16.mxu0 %v17919_v25  ;;  %v15006_v15 = vld [vmem:[%s14953_s20] ss:$0 sm:$0xff]  ;;  %v12684_v7 = vand.u32 4294901760, %v20749_v40  ;;  %v12705_v24 = vand.u32 4294901760, %v12704_v20  ;;  %s14963_s20 = sld [smem:[%s21552_s0 + %s18921_s21]]  }
0x31c4   :  { %16887 = vmatprep.subr.mxu1 %v20344_v11 }
0x31c5   :  { %16923 = vmatmul.mubr.f32.gmra.mrb[34].mxu0 %v20637_v33  ;;  %v12546_v33 = vld [vmem:[%s20715_s28 + $0x38] sm:$0xff] }
0x31c6   :  { %16929 = vmatprep.mubr.f32.mxu0 %v11948_v51  ;;  %v12583_v51 = vand.u32 4294901760, %v12544_v41 }
0x31c7   :  { %16888 = vmatpush3.msra.mxu1 %v20344_v11 }
0x31c8   :  { %16890 = vmatmul.mubr.f32.vlgmr.msra.gmra.mrb[22].mxu1 %v20497_v13  ;;  %17928 = vmatprep.subr.bf16.mxu1 %v20730_v49  ;;  %v20742_v14 = vpack.c.bf16 %v12583_v51, %v12580_v59 }
0x31c9   :  { %16892 = vmatprep.mubr.f32.mxu1 %v20506_v0  ;;  %16930 = vmatmul.mubr.f32.vlgmr.msra.gmra.mrb[32].mxu0 %v11958_v45  ;;  %v12545_v45 = vld [vmem:[%s20715_s28 + $0x30] sm:$0xff] }
0x31ca   :  { %16932 = vmatprep.mubr.f32.mxu0 %v11968_v35  ;;  %17922 = vmatpush3.bf16.msra.mxu0 %v17919_v25  ;;  %v12586_v61 = vand.u32 4294901760, %v12545_v45  ;;  %v12589_v35 = vand.u32 4294901760, %v12546_v33 }
0x31cb   :  { %17924 = vmatprep.subr.bf16.mxu0 %v20633_v31  ;;  %17930 = vmatpush3.bf16.msra.mxu1 %v20730_v49 }
0x31cc   :  { %16893 = vmatmul.mubr.f32.gmra.mrb[24].mxu1 %v20533_v37  ;;  %v20759_v3 = vpack.c.bf16 %v12589_v35, %v12586_v61 }
0x31cd   :  { %16933 = vmatmul.mubr.f32.gmra.mrb[34].mxu0 %v11978_v18 }
0x31ce   :  { %16939 = vmatprep.mubr.f32.mxu0 %v20573_v52 }
0x31d1   :  { %16940 = vmatmul.mubr.f32.vlgmr.msra.gmra.mrb[32].mxu0 %v20586_v6 }
0x31d2   :  { %16942 = vmatprep.mubr.f32.mxu0 %v20606_v44  ;;  %17926 = vmatpush3.bf16.msra.mxu0 %v20633_v31 }
0x31d5   :  { %16943 = vmatmul.mubr.f32.gmra.mrb[34].mxu0 %v20626_v56 }
0x31d6   :  { %16949 = vmatprep.mubr.f32.mxu0 %v20573_v52 }
0x31d9   :  { %16950 = vmatmul.mubr.f32.vlgmr.msra.gmra.mrb[32].mxu0 %v20586_v6 }
0x31da   :  { %16952 = vmatprep.mubr.f32.mxu0 %v20606_v44  ;;  %v12574_v44 = vand.u32 4294901760, %v12541_v12 }
0x31dc   :  { %v20736_v10 = vpack.c.bf16 %v12577_v55, %v12574_v44  ;;  %v12697_v8 = vsub.f32 %v12541_v12, %v12574_v44  ;;  %v12711_v44 = vsub.f32 %v12543_v62, %v12580_v59  ;;  %v12718_v55 = vsub.f32 %v12544_v41, %v12583_v51 }
0x31dd   :  { %16953 = vmatmul.mubr.f32.gmra.mrb[34].mxu0 %v20626_v56 }
0x31de   :  { %17932 = vmatprep.subr.bf16.mxu1 %v20736_v10  ;;  %v12698_v12 = vand.u32 4294901760, %v12697_v8 }
0x31df   :  { %17934 = vmatpush3.bf16.msra.mxu1 %v20736_v10 }
0x31e0   :  { %17936 = vmatprep.subr.bf16.mxu1 %v20742_v14 }
0x31e3   :  { %17938 = vmatpush3.bf16.msra.mxu1 %v20742_v14 }
0x31e4   :  { %17940 = vmatprep.subr.bf16.mxu1 %v20759_v3 }
0x31e7   :  { %17942 = vmatpush3.bf16.msra.mxu1 %v20759_v3 }
0x327c   :  { %v16795_v42 = vpop.f32.mrb[28].mxu0 }
0x327d   :  { %v11256_v60 = vpop.f32.mrb[29].mxu0  ;;  %v18232_v0 = vadd.f32 %v16795_v42, %v15006_v15 }
0x327e   :  { %v18234_v37 = vadd.f32 %v15006_v15, %v11256_v60  ;;  %v12691_v60 = vand.u32 4294901760, %v20753_v30 }
0x3280   :  { %v16798_v11 = vpop.f32.mrb[30].mxu0 }
0x3281   :  { %v18236_v63 = vadd.f32 %v16798_v11, %v15006_v15  ;;  %v11268_v48 = vpop.f32.mrb[31].mxu0 }
0x3282   :  { %v18238_v13 = vadd.f32 %v15006_v15, %v11268_v48 }
0x329b   :  { %v16891_v27 = vpop.f32.mrb[22].mxu1 }
0x329c   :  { %v20717_v26 = vadd.f32 %v18232_v0, %v16891_v27  ;;  %v11687_v38 = vpop.f32.mrb[23].mxu1  ;;  %v20772_v0 = vld [vmem:[%s20715_s28 + $0x40] sm:$0xff] }
0x329d   :  { %v20719_v23 = vadd.f32 %v18234_v37, %v11687_v38  ;;  %v12685_v37 = vsub.f32 %v20749_v40, %v12684_v7 }
0x329f   :  { %v16894_v52 = vpop.f32.mrb[24].mxu1  ;;  %v12686_v39 = vand.u32 4294901760, %v12685_v37  ;;  %v12725_v37 = vsub.f32 %v12545_v45, %v12586_v61 }
0x32a0   :  { %v20721_v54 = vadd.f32 %v18236_v63, %v16894_v52  ;;  %v11699_v6 = vpop.f32.mrb[25].mxu1  ;;  %v20779_v52 = vand.u32 4294901760, %v20772_v0 }
0x32a1   :  { %v20723_v50 = vadd.f32 %v18238_v13, %v11699_v6  ;;  %v12692_v6 = vsub.f32 %v20753_v30, %v12691_v60  ;;  %v12726_v59 = vand.u32 4294901760, %v12725_v37 }
0x32a2   :  { %16971 = vmatprep.subr.mxu1 %v20779_v52 }
0x32a3   :  { %16972 = vmatpush3.msra.mxu1 %v20779_v52 }
0x32ac   :  { %v16951_v2 = vpop.f32.mrb[32].mxu0 }
0x32ad   :  { %v18240_v56 = vadd.f32 %v16951_v2, %v15009_v57  ;;  %v12445_v31 = vpop.f32.mrb[33].mxu0 }
0x32ae   :  { %v20746_v28 = vadd.f32 %v15009_v57, %v12445_v31 }
0x32af   :  { %v12472_v18 = vrot.slane %v18240_v56, 7  ;;  %v12488_v16 = vrot.slane %v18240_v56, 1  ;;  %12505 = vrot.lane.b32.xlu0 %v18240_v56, %s18921_s21 }
0x32b0   :  { %v16954_v46 = vpop.f32.mrb[34].mxu0  ;;  %12503 = vrot.lane.b32.xlu1 %v20746_v28, %s18921_s21  ;;  %v12487_v32 = vrot.slane %v20746_v28, 1  ;;  %v12471_v34 = vrot.slane %v20746_v28, 7 }
0x32b1   :  { %v18242_v25 = vadd.f32 %v16954_v46, %v15009_v57  ;;  %v12457_v42 = vpop.f32.mrb[35].mxu0  ;;  %v12693_v46 = vand.u32 4294901760, %v12692_v6 }
0x32b2   :  { %v18243_v15 = vadd.f32 %v15009_v57, %v12457_v42  ;;  %v12489_v11 = vsel %vm9291_vm13, %v12487_v32, %v12488_v16  ;;  %v20767_v63 = vsel %vm9273_vm7, %v12471_v34, %v12472_v18  ;;  %v12706_v32 = vsub.f32 %v12704_v20, %v12705_v24 }
0x32b3   :  { %v12492_v48 = vrot.slane %v18242_v25, 1  ;;  %v12476_v13 = vrot.slane %v18242_v25, 7  ;;  %v12712_v42 = vand.u32 4294901760, %v12711_v44 }
0x32b4   :  { %v12474_v27 = vrot.slane %v18243_v15, 7  ;;  %v12490_v38 = vrot.slane %v18243_v15, 1  ;;  %12519 = vrot.lane.b32.xlu1 %v12489_v11, %s18922_s22  ;;  %v12719_v11 = vand.u32 4294901760, %v12718_v55 }
0x32b5   :  { %v12713_v62 = vsub.f32 %v12711_v44, %v12712_v42 }
0x32b6   :  { %v12491_v22 = vsel %vm9291_vm13, %v12488_v16, %v12490_v38  ;;  %v12493_v57 = vsel %vm9291_vm13, %v12490_v38, %v12492_v48  ;;  %v20787_v2 = vsel %vm9273_vm7, %v12472_v18, %v12474_v27  ;;  %v20793_v31 = vsel %vm9273_vm7, %v12474_v27, %v12476_v13 }
0x32b7   :  { %v12500_v56 = vsel %vm19925_vm5, 0.0, %v12491_v22  ;;  %v20798_v18 = vpack.c.bf16 %v12693_v46, %v12686_v39  ;;  %v12699_v16 = vsub.f32 %v12697_v8, %v12698_v12  ;;  %v12498_v13 = vsel %vm9291_vm13, %v12492_v48, %v18242_v25 }
0x32b8   :  { %12521 = vrot.lane.b32.xlu0 %v12500_v56, %s18922_s22  ;;  %12507 = vrot.lane.b32.xlu1 %v18243_v15, %s18921_s21  ;;  %v12732_v27 = vsub.f32 %v12546_v33, %v12589_v35  ;;  %v12707_v38 = vand.u32 4294901760, %v12706_v32  ;;  %v12720_v41 = vsub.f32 %v12718_v55, %v12719_v11  ;;  %v12714_v39 = vand.u32 4294901760, %v12713_v62 }
0x32b9   :  { %17944 = vmatprep.subr.bf16.mxu1 %v20798_v18  ;;  %v12700_v15 = vand.u32 4294901760, %v12699_v16  ;;  %v12502_v48 = vsel %vm19950_vm8, 0.0, %v12498_v13  ;;  %v12727_v56 = vsub.f32 %v12725_v37, %v12726_v59  ;;  %v20817_v46 = vpack.c.bf16 %v12704_v20, %v12697_v8 }
0x32ba   :  { %v12733_v51 = vand.u32 4294901760, %v12732_v27  ;;  %v12721_v22 = vand.u32 4294901760, %v12720_v41  ;;  %v20819_v16 = vpack.c.bf16 %v12718_v55, %v12711_v44  ;;  %v20821_v32 = vpack.c.bf16 %v12732_v27, %v12725_v37 }
0x32bb   :  { %v20804_v6 = vpack.c.bf16 %v12707_v38, %v12700_v15  ;;  %v12728_v61 = vand.u32 4294901760, %v12727_v56  ;;  %v20827_v13 = vpack.c.bf16 %v12691_v60, %v12684_v7  ;;  %v20829_v15 = vpack.c.bf16 %v12705_v24, %v12698_v12 }
0x32bc   :  { %12509 = vrot.lane.b32.xlu0 %v18242_v25, %s18921_s21  ;;  %12523 = vrot.lane.b32.xlu1 %v12493_v57, %s18922_s22  ;;  %v12734_v45 = vsub.f32 %v12732_v27, %v12733_v51  ;;  %v20809_v33 = vpack.c.bf16 %v12721_v22, %v12714_v39  ;;  %v20815_v57 = vpack.c.bf16 %v20753_v30, %v20749_v40  ;;  %v12485_v27 = vsel %vm19873_vm15, 0.0, %v20787_v2 }
0x32bd   :  { %v20831_v38 = vpack.c.bf16 %v12719_v11, %v12712_v42  ;;  %v20833_v62 = vpack.c.bf16 %v12733_v51, %v12726_v59  ;;  %v12482_v8 = vsel %vm9273_vm7, %v20746_v28, %v12471_v34 }
0x32be   :  { %v12735_v35 = vand.u32 4294901760, %v12734_v45  ;;  %v12483_v20 = vsel %vm19852_vm14, 0.0, %v12482_v8 }
0x32c0   :  { %12525 = vrot.lane.b32.xlu0 %v12502_v48, %s18922_s22  ;;  %v20811_v25 = vpack.c.bf16 %v12735_v35, %v12728_v61 }
0x3321   :  { %v12506_v40 = vpop.permute.xlu0 %12505 }
0x3322   :  { %v12504_v41 = vpop.permute.xlu1 %12503  ;;  %v12532_v44 = vsel %vm211_vm4, %v20767_v63, %v12506_v40 }
0x3323   :  { %v12531_v30 = vsel %vm211_vm4, %v12483_v20, %v12504_v41 }
0x3326   :  { %v12520_v7 = vpop.permute.xlu1 %12519 }
0x3327   :  { %v12535_v60 = vsel %vm10138_vm0, %v12531_v30, %v12520_v7 }
0x3328   :  { %v12556_v12 = vsel %vm10159_vm9, %v12535_v60, 0 }
0x3329   :  { %v20844_v24 = vand.u32 4294901760, %v12556_v12 }
0x332a   :  { %v12522_v55 = vpop.permute.xlu0 %12521  ;;  %v12508_v42 = vpop.permute.xlu1 %12507 }
0x332b   :  { %v20849_v28 = vsub.f32 %v12556_v12, %v20844_v24  ;;  %v12536_v34 = vsel %vm10138_vm0, %v12532_v44, %v12522_v55  ;;  %v12533_v51 = vsel %vm211_vm4, %v12485_v27, %v12508_v42  ;;  %v12739_v55 = vsub.f32 %v20772_v0, %v20779_v52 }
0x332c   :  { %v12559_v11 = vsel %vm10159_vm9, %v12536_v34, 0 }
0x332d   :  { %v20853_v37 = vand.u32 4294901760, %v12559_v11  ;;  %v12643_v59 = vand.u32 4294901760, %v20849_v28  ;;  %v12740_v27 = vand.u32 4294901760, %v12739_v55 }
0x332e   :  { %v12510_v63 = vpop.permute.xlu0 %12509  ;;  %v12524_v39 = vpop.permute.xlu1 %12523 }
0x332f   :  { %v20861_v22 = vsub.f32 %v12559_v11, %v20853_v37  ;;  %v12537_v48 = vsel %vm10138_vm0, %v12533_v51, %v12524_v39  ;;  %v12644_v56 = vsub.f32 %v20849_v28, %v12643_v59  ;;  %v12534_v41 = vsel %vm211_vm4, %v20793_v31, %v12510_v63 }
0x3330   :  { %v12562_v45 = vsel %vm10159_vm9, %v12537_v48, 0  ;;  %v12741_v39 = vsub.f32 %v12739_v55, %v12740_v27 }
0x3331   :  { %v12653_v61 = vand.u32 4294901760, %v20861_v22  ;;  %v20869_v2 = vand.u32 4294901760, %v12562_v45  ;;  %v12645_v35 = vand.u32 4294901760, %v12644_v56 }
0x3332   :  { %v12526_v8 = vpop.permute.xlu0 %12525  ;;  %v12742_v0 = vand.u32 4294901760, %v12741_v39  ;;  %v13396_v39 = vld [vmem:[%s20968_s15] sm:$0xff] }
0x3333   :  { %v12654_v20 = vsub.f32 %v20861_v22, %v12653_v61  ;;  %v12662_v40 = vsub.f32 %v12562_v45, %v20869_v2  ;;  %v12538_v30 = vsel %vm10138_vm0, %v12534_v41, %v12526_v8  ;;  %16973 = vmatprep.mubr.f32.mxu1 %v12645_v35 }
0x3334   :  { %v12565_v7 = vsel %vm10159_vm9, %v12538_v30, 0 }
0x3335   :  { %v12655_v60 = vand.u32 4294901760, %v12654_v20  ;;  %v20879_v12 = vand.u32 4294901760, %v12565_v7  ;;  %v12663_v44 = vand.u32 4294901760, %v12662_v40 }
0x3337   :  { %v12672_v31 = vsub.f32 %v12565_v7, %v20879_v12  ;;  %16974 = vmatmul.mubr.f32.vlgmr.msra.gmra.mrb[26].mxu1 %v12655_v60  ;;  %v12664_v42 = vsub.f32 %v12662_v40, %v12663_v44 }
0x3338   :  { %17946 = vmatpush3.bf16.msra.mxu1 %v20798_v18 }
0x3339   :  { %17948 = vmatprep.subr.bf16.mxu1 %v20804_v6  ;;  %v12665_v34 = vand.u32 4294901760, %v12664_v42  ;;  %v12673_v11 = vand.u32 4294901760, %v12672_v31 }
0x333b   :  { %16976 = vmatprep.mubr.f32.mxu1 %v12665_v34  ;;  %v12674_v51 = vsub.f32 %v12672_v31, %v12673_v11 }
0x333c   :  { %17950 = vmatpush3.bf16.msra.mxu1 %v20804_v6 }
0x333d   :  { %17952 = vmatprep.subr.bf16.mxu1 %v20809_v33  ;;  %v12675_v63 = vand.u32 4294901760, %v12674_v51 }
0x333f   :  { %16977 = vmatmul.mubr.f32.gmra.mrb[28].mxu1 %v12675_v63 }
0x3340   :  { %17954 = vmatpush3.bf16.msra.mxu1 %v20809_v33  ;;  %16997 = vmatprep.mubr.f32.mxu1 %v20844_v24 }
0x3341   :  { %17956 = vmatprep.subr.bf16.mxu1 %v20811_v25 }
0x3344   :  { %17958 = vmatpush3.bf16.msra.mxu1 %v20811_v25 }
0x3345   :  { %16995 = vmatprep.subr.mxu1 %v12742_v0 }
0x3348   :  { %16996 = vmatpush3.msra.mxu1 %v12742_v0  ;;  %v13397_v0 = vld [vmem:[%s20968_s15 + $0x8] sm:$0xff] }
0x3349   :  { %16998 = vmatmul.mubr.f32.vlgmr.msra.gmra.mrb[26].mxu1 %v20853_v37  ;;  %17960 = vmatprep.subr.bf16.mxu1 %v20815_v57 }
0x334a   :  { %17000 = vmatprep.mubr.f32.mxu1 %v20869_v2  ;;  %17962 = vmatpush3.bf16.msra.mxu1 %v20815_v57 }
0x334b   :  { %17964 = vmatprep.subr.bf16.mxu1 %v20817_v46 }
0x334d   :  { %17001 = vmatmul.mubr.f32.gmra.mrb[28].mxu1 %v20879_v12 }
0x334e   :  { %17966 = vmatpush3.bf16.msra.mxu1 %v20817_v46  ;;  %17021 = vmatprep.mubr.f32.mxu1 %v20849_v28 }
0x334f   :  { %17968 = vmatprep.subr.bf16.mxu1 %v20819_v16 }
0x3352   :  { %17970 = vmatpush3.bf16.msra.mxu1 %v20819_v16 }
0x3353   :  { %17972 = vmatprep.subr.bf16.mxu1 %v20821_v32 }
0x3356   :  { %17974 = vmatpush3.bf16.msra.mxu1 %v20821_v32 }
0x3357   :  { %17019 = vmatprep.subr.mxu1 %v12739_v55 }
0x335a   :  { %17020 = vmatpush3.msra.mxu1 %v12739_v55 }
0x335b   :  { %17022 = vmatmul.mubr.f32.vlgmr.msra.gmra.mrb[26].mxu1 %v20861_v22  ;;  %17976 = vmatprep.subr.bf16.mxu1 %v20730_v49 }
0x335c   :  { %17024 = vmatprep.mubr.f32.mxu1 %v12662_v40  ;;  %17978 = vmatpush3.bf16.msra.mxu1 %v20730_v49 }
0x335d   :  { %17980 = vmatprep.subr.bf16.mxu1 %v20736_v10 }
0x335f   :  { %17025 = vmatmul.mubr.f32.gmra.mrb[28].mxu1 %v12672_v31 }
0x3360   :  { %17982 = vmatpush3.bf16.msra.mxu1 %v20736_v10  ;;  %17045 = vmatprep.mubr.f32.mxu1 %v12643_v59 }
0x3361   :  { %17984 = vmatprep.subr.bf16.mxu1 %v20742_v14 }
0x3364   :  { %17986 = vmatpush3.bf16.msra.mxu1 %v20742_v14 }
0x3365   :  { %17988 = vmatprep.subr.bf16.mxu1 %v20759_v3 }
0x3368   :  { %17990 = vmatpush3.bf16.msra.mxu1 %v20759_v3 }
0x3369   :  { %17043 = vmatprep.subr.mxu1 %v20779_v52 }
0x336c   :  { %17044 = vmatpush3.msra.mxu1 %v20779_v52 }
0x336d   :  { %17046 = vmatmul.mubr.f32.vlgmr.msra.gmra.mrb[26].mxu1 %v12653_v61  ;;  %17992 = vmatprep.subr.bf16.mxu1 %v20827_v13 }
0x336e   :  { %17048 = vmatprep.mubr.f32.mxu1 %v12663_v44  ;;  %17994 = vmatpush3.bf16.msra.mxu1 %v20827_v13 }
0x336f   :  { %17996 = vmatprep.subr.bf16.mxu1 %v20829_v15 }
0x3371   :  { %17049 = vmatmul.mubr.f32.gmra.mrb[28].mxu1 %v12673_v11 }
0x3372   :  { %17998 = vmatpush3.bf16.msra.mxu1 %v20829_v15  ;;  %17069 = vmatprep.mubr.f32.mxu1 %v20844_v24 }
0x3373   :  { %18000 = vmatprep.subr.bf16.mxu1 %v20831_v38 }
0x3376   :  { %18002 = vmatpush3.bf16.msra.mxu1 %v20831_v38 }
0x3377   :  { %18004 = vmatprep.subr.bf16.mxu1 %v20833_v62 }
0x337a   :  { %18006 = vmatpush3.bf16.msra.mxu1 %v20833_v62 }
0x337b   :  { %17067 = vmatprep.subr.mxu1 %v12740_v27 }
0x337e   :  { %17068 = vmatpush3.msra.mxu1 %v12740_v27 }
0x337f   :  { %17070 = vmatmul.mubr.f32.vlgmr.msra.gmra.mrb[26].mxu1 %v20853_v37  ;;  %18008 = vmatprep.subr.bf16.mxu1 %v20730_v49 }
0x3380   :  { %17072 = vmatprep.mubr.f32.mxu1 %v20869_v2  ;;  %18010 = vmatpush3.bf16.msra.mxu1 %v20730_v49  ;;  %v15010_v49 = vld [vmem:[%s14959_s11] ss:$0 sm:$0xff] }
0x3381   :  { %18012 = vmatprep.subr.bf16.mxu1 %v20736_v10 }
0x3383   :  { %17073 = vmatmul.mubr.f32.gmra.mrb[28].mxu1 %v20879_v12 }
0x3384   :  { %18014 = vmatpush3.bf16.msra.mxu1 %v20736_v10  ;;  %17093 = vmatprep.mubr.f32.mxu1 %v20844_v24 }
0x3385   :  { %18016 = vmatprep.subr.bf16.mxu1 %v20742_v14 }
0x3388   :  { %18018 = vmatpush3.bf16.msra.mxu1 %v20742_v14 }
0x3389   :  { %18020 = vmatprep.subr.bf16.mxu1 %v20759_v3 }
0x338c   :  { %18022 = vmatpush3.bf16.msra.mxu1 %v20759_v3 }
0x338d   :  { %17091 = vmatprep.subr.mxu1 %v20779_v52 }
0x3390   :  { %17092 = vmatpush3.msra.mxu1 %v20779_v52 }
0x3391   :  { %17094 = vmatmul.mubr.f32.vlgmr.msra.gmra.mrb[26].mxu1 %v20853_v37 }
0x3392   :  { %17096 = vmatprep.mubr.f32.mxu1 %v20869_v2 }
0x3395   :  { %17097 = vmatmul.mubr.f32.gmra.mrb[28].mxu1 %v20879_v12 }
0x3464   :  { %v17095_v10 = vpop.f32.mrb[26].mxu1 }
0x3465   :  { %v18244_v14 = vadd.f32 %v17095_v10, %v15010_v49  ;;  %v13224_v18 = vpop.f32.mrb[27].mxu1  ;;  %v13428_v10 = vand.u32 4294901760, %v13397_v0 }
0x3466   :  { %v18245_v3 = vadd.f32 %v15010_v49, %v13224_v18  ;;  %v20981_v18 = vld [vmem:[%s20968_s15 + $0x10] sm:$0xff] }
0x3467   :  { %v13249_v6 = vsel %vm211_vm4, %v18244_v14, 0.0 }
0x3468   :  { %13250 = vadd.xlane.f32.xlu0 %v13249_v6  ;;  %v17098_v52 = vpop.f32.mrb[28].mxu1  ;;  %v13246_v33 = vsel %vm211_vm4, %v18245_v3, 0.0  ;;  %v13431_v6 = vand.u32 4294901760, %v20981_v18 }
0x3469   :  { %v18246_v25 = vadd.f32 %v17098_v52, %v15010_v49  ;;  %v13236_v57 = vpop.f32.mrb[29].mxu1  ;;  %13247 = vadd.xlane.f32.xlu1 %v13246_v33 }
0x346a   :  { %v18247_v46 = vadd.f32 %v15010_v49, %v13236_v57  ;;  %v13425_v49 = vand.u32 4294901760, %v13396_v39 }
0x346b   :  { %v13255_v16 = vsel %vm211_vm4, %v18246_v25, 0.0 }
0x346c   :  { %v13252_v32 = vsel %vm211_vm4, %v18247_v46, 0.0 }
0x346d   :  { %13253 = vadd.xlane.f32.xlu0 %v13252_v32  ;;  %13256 = vadd.xlane.f32.xlu1 %v13255_v16  ;;  %v15012_v32 = vld [vmem:[%s14961_s19] ss:$0 sm:$0xff] }
0x34f5   :  { %v13251_v13 = vpop.xlane.xlu0 %13250 }
0x34f6   :  { %v13259_v15 = vmul.f32 0.041666668, %v13251_v13  ;;  %v13248_v38 = vpop.xlane.xlu1 %13247 }
0x34f7   :  { %v13258_v62 = vmul.f32 0.041666668, %v13248_v38  ;;  %v21000_v38 = vld [vmem:[%s20968_s15 + $0x28] sm:$0xff] }
0x34f8   :  { %v13263_v24 = vsub.f32 %v18244_v14, %v13259_v15  ;;  %v20978_v14 = vpack.c.bf16 %v13428_v10, %v13425_v49  ;;  %v20997_v15 = vld [vmem:[%s20968_s15 + $0x20] sm:$0xff] }
0x34f9   :  { %v13262_v28 = vsub.f32 %v18245_v3, %v13258_v62  ;;  %v20984_v3 = vld [vmem:[%s20968_s15 + $0x18] sm:$0xff]  ;;  %v9213_v62 = vrot.slane %v20020_v36, 1 }
0x34fa   :  { %v13254_v37 = vpop.xlane.xlu0 %13253  ;;  %v13257_v59 = vpop.xlane.xlu1 %13256  ;;  %v13267_v22 = vmul.f32 %v13263_v24, %v13263_v24  ;;  %18024 = vmatprep.subr.bf16.mxu0 %v20978_v14  ;;  %v13434_v52 = vand.u32 4294901760, %v20984_v3 }
0x34fb   :  { %v13260_v48 = vmul.f32 0.041666668, %v13254_v37  ;;  %v13261_v56 = vmul.f32 0.041666668, %v13257_v59  ;;  %v13266_v45 = vmul.f32 %v13262_v28, %v13262_v28  ;;  %18026 = vmatpush3.bf16.msra.mxu0 %v20978_v14  ;;  %v13440_v59 = vand.u32 4294901760, %v21000_v38 }
0x34fc   :  { %v13273_v61 = vsel %vm211_vm4, %v13267_v22, 0.0  ;;  %v20994_v16 = vpack.c.bf16 %v13434_v52, %v13431_v6 }
0x34fd   :  { %v20954_v2 = vsub.f32 %v18247_v46, %v13260_v48  ;;  %v20956_v35 = vsub.f32 %v18246_v25, %v13261_v56  ;;  %13274 = vadd.xlane.f32.xlu1 %v13273_v61  ;;  %v13270_v41 = vsel %vm211_vm4, %v13266_v45, 0.0  ;;  %v15011_v25 = vld [vmem:[%s14960_s8] ss:$0 sm:$0xff]  ;;  %v13575_v17 = vsub.f32 %v21000_v38, %v13440_v59 }
0x34fe   :  { %13271 = vadd.xlane.f32.xlu0 %v13270_v41  ;;  %18028 = vmatprep.subr.bf16.mxu0 %v20994_v16 }
0x34ff   :  { %v13268_v8 = vmul.f32 %v20954_v2, %v20954_v2  ;;  %v13269_v20 = vmul.f32 %v20956_v35, %v20956_v35  ;;  %18030 = vmatpush3.bf16.msra.mxu0 %v20994_v16 }
0x3501   :  { %v13276_v40 = vsel %vm211_vm4, %v13268_v8, 0.0  ;;  %v13279_v30 = vsel %vm211_vm4, %v13269_v20, 0.0  ;;  %v9214_v8 = vrot.slane %v20020_v36, 2  ;;  %v21016_v20 = vadd.f32 %v19116_v47, %v9213_v62 }
0x3502   :  { %13277 = vadd.xlane.f32.xlu0 %v13276_v40  ;;  %13280 = vadd.xlane.f32.xlu1 %v13279_v30 }
0x358a   :  { %v13275_v7 = vpop.xlane.xlu1 %13274 }
0x358b   :  { %v13283_v60 = vmul.f32 0.041666668, %v13275_v7  ;;  %v13272_v12 = vpop.xlane.xlu0 %13271  ;;  %v13402_v7 = vld [vmem:[%s20968_s15 + $0x30] sm:$0xff] }
0x358c   :  { %v13282_v44 = vmul.f32 0.041666668, %v13272_v12 }
0x358d   :  { %v13287_v55 = vadd.f32 1e-05, %v13283_v60  ;;  %v13403_v60 = vld [vmem:[%s20968_s15 + $0x38] sm:$0xff] }
0x358e   :  { %v13286_v31 = vadd.f32 1e-05, %v13282_v44 }
0x358f   :  { %18853 = vrsqrt.f32 %v13287_v55  ;;  %v13278_v42 = vpop.xlane.xlu0 %13277  ;;  %v13281_v34 = vpop.xlane.xlu1 %13280  ;;  %v13443_v55 = vand.u32 4294901760, %v13402_v7 }
0x3590   :  { %18855 = vrsqrt.f32 %v13286_v31  ;;  %v13284_v11 = vmul.f32 0.041666668, %v13278_v42  ;;  %v13285_v27 = vmul.f32 0.041666668, %v13281_v34  ;;  %v13446_v31 = vand.u32 4294901760, %v13403_v60 }
0x3591   :  { %v21026_v42 = vsub.f32 %v13396_v39, %v13425_v49 }
0x3592   :  { %v13288_v51 = vadd.f32 1e-05, %v13284_v11  ;;  %v13289_v63 = vadd.f32 1e-05, %v13285_v27  ;;  %v21032_v27 = vpack.c.bf16 %v13446_v31, %v13443_v55 }
0x3594   :  { %18857 = vrsqrt.f32 %v13288_v51 }
0x3595   :  { %18859 = vrsqrt.f32 %v13289_v63  ;;  %v13541_v63 = vand.u32 4294901760, %v21026_v42 }
0x3596   :  { %18861 = vtanh.f32 %v21016_v20 }
0x3599   :  { %v18854_v33 = vpop.eup %18853 }
0x359a   :  { %v18856_v57 = vpop.eup %18855  ;;  %v13295_v46 = vmul.f32 %v18854_v33, %v13263_v24  ;;  %v13437_v24 = vand.u32 4294901760, %v20997_v15  ;;  %v21035_v33 = vsub.f32 %v13397_v0, %v13428_v10  ;;  %v21051_v0 = vld [vmem:[%s20968_s15 + $0x40] sm:$0xff] }
0x359b   :  { %v13294_v13 = vmul.f32 %v18856_v57, %v13262_v28  ;;  %v21058_v62 = vand.u32 4294901760, %v21051_v0 }
0x359c   :  { %v13306_v37 = vmul.f32 %v15011_v25, %v13295_v46  ;;  %v21011_v56 = vpack.c.bf16 %v13440_v59, %v13437_v24  ;;  %v13548_v10 = vand.u32 4294901760, %v21035_v33 }
0x359d   :  { %v13305_v22 = vmul.f32 %v15011_v25, %v13294_v13 }
0x359e   :  { %v18858_v48 = vpop.eup %18857  ;;  %v13317_v28 = vadd.f32 %v15012_v32, %v13306_v37  ;;  %18032 = vmatprep.subr.bf16.mxu0 %v21011_v56  ;;  %v21063_v37 = vsub.f32 %v20981_v18, %v13431_v6  ;;  %v13561_v18 = vsub.f32 %v20984_v3, %v13434_v52  ;;  %v13568_v3 = vsub.f32 %v20997_v15, %v13437_v24 }
0x359f   :  { %v18860_v45 = vpop.eup %18859  ;;  %v13316_v61 = vadd.f32 %v15012_v32, %v13305_v22  ;;  %v13296_v41 = vmul.f32 %v18858_v48, %v20954_v2  ;;  %18034 = vmatpush3.bf16.msra.mxu0 %v21011_v56 }
0x35a0   :  { %v13297_v40 = vmul.f32 %v18860_v45, %v20956_v35  ;;  %v13321_v30 = vmax.f32 %v13317_v28, 0.0  ;;  %18036 = vmatprep.subr.bf16.mxu0 %v21032_v27  ;;  %v13549_v45 = vsub.f32 %v21035_v33, %v13548_v10  ;;  %v18862_v59 = vpop.eup %18861  ;;  %v21116_v43 = vpack.c.bf16 %v13561_v18, %v21063_v37 }
0x35a1   :  { %v21022_v12 = vmax.f32 %v13316_v61, 0.0  ;;  %v13307_v44 = vmul.f32 %v15011_v25, %v13296_v41 }
0x35a2   :  { %13362 = vrot.lane.b32.xlu1 %v13321_v30, %s18921_s21  ;;  %v13308_v36 = vmul.f32 %v15011_v25, %v13297_v40  ;;  %v13345_v2 = vrot.slane %v13321_v30, 1  ;;  %v13329_v47 = vrot.slane %v13321_v30, 7  ;;  %v21038_v25 = vadd.f32 %v19118_v53, %v9214_v8 }
0x35a3   :  { %13360 = vrot.lane.b32.xlu0 %v21022_v12, %s18921_s21  ;;  %v13344_v35 = vrot.slane %v21022_v12, 1  ;;  %v13318_v34 = vadd.f32 %v15012_v32, %v13307_v44  ;;  %v13328_v11 = vrot.slane %v21022_v12, 7  ;;  %18038 = vmatpush3.bf16.msra.mxu0 %v21032_v27  ;;  %v13542_v53 = vsub.f32 %v21026_v42, %v13541_v63 }
0x35a4   :  { %v13319_v51 = vadd.f32 %v15012_v32, %v13308_v36  ;;  %17115 = vmatprep.subr.mxu0 %v21058_v62  ;;  %v13555_v8 = vand.u32 4294901760, %v21063_v37  ;;  %v13550_v30 = vand.u32 4294901760, %v13549_v45  ;;  %18863 = vtanh.f32 %v21038_v25 }
0x35a5   :  { %v13346_v39 = vsel %vm9291_vm13, %v13344_v35, %v13345_v2  ;;  %v13322_v49 = vmax.f32 %v13318_v34, 0.0  ;;  %v21044_v57 = vsel %vm9273_vm7, %v13328_v11, %v13329_v47  ;;  %v13543_v28 = vand.u32 4294901760, %v13542_v53 }
0x35a6   :  { %13376 = vrot.lane.b32.xlu1 %v13346_v39, %s18922_s22  ;;  %v13323_v46 = vmax.f32 %v13319_v51, 0.0  ;;  %v13556_v44 = vsub.f32 %v21063_v37, %v13555_v8  ;;  %v13562_v36 = vand.u32 4294901760, %v13561_v18  ;;  %v13589_v35 = vsub.f32 %v13403_v60, %v13446_v31 }
0x35a7   :  { %v13347_v32 = vrot.slane %v13322_v49, 1  ;;  %v13331_v13 = vrot.slane %v13322_v49, 7  ;;  %17116 = vmatpush3.msra.mxu0 %v21058_v62  ;;  %v13569_v39 = vand.u32 4294901760, %v13568_v3 }
0x35a8   :  { %v13349_v22 = vrot.slane %v13323_v46, 1  ;;  %v13333_v48 = vrot.slane %v13323_v46, 7  ;;  %v13557_v34 = vand.u32 4294901760, %v13556_v44  ;;  %v13563_v51 = vsub.f32 %v13561_v18, %v13562_v36 }
0x35a9   :  { %v13348_v61 = vsel %vm9291_vm13, %v13345_v2, %v13347_v32  ;;  %v21070_v41 = vsel %vm9273_vm7, %v13329_v47, %v13331_v13  ;;  %v21094_v2 = vpack.c.bf16 %v13550_v30, %v13543_v28  ;;  %v13582_v47 = vsub.f32 %v13402_v7, %v13443_v55 }
0x35aa   :  { %13364 = vrot.lane.b32.xlu1 %v13322_v49, %s18921_s21  ;;  %v13357_v6 = vsel %vm19925_vm5, 0.0, %v13348_v61  ;;  %v21083_v40 = vsel %vm9273_vm7, %v13331_v13, %v13333_v48  ;;  %v13350_v52 = vsel %vm9291_vm13, %v13347_v32, %v13349_v22  ;;  %v13576_v49 = vand.u32 4294901760, %v13575_v17 }
0x35ab   :  { %13378 = vrot.lane.b32.xlu0 %v13357_v6, %s18922_s22  ;;  %v13355_v15 = vsel %vm9291_vm13, %v13349_v22, %v13323_v46  ;;  %18040 = vmatprep.subr.bf16.mxu0 %v21094_v2  ;;  %v13583_v24 = vand.u32 4294901760, %v13582_v47  ;;  %v13590_v38 = vand.u32 4294901760, %v13589_v35  ;;  %v13564_v53 = vand.u32 4294901760, %v13563_v51 }
0x35ac   :  { %v13570_v32 = vsub.f32 %v13568_v3, %v13569_v39  ;;  %v13577_v13 = vsub.f32 %v13575_v17, %v13576_v49  ;;  %v13359_v55 = vsel %vm19950_vm8, 0.0, %v13355_v15  ;;  %v21113_v30 = vpack.c.bf16 %v21035_v33, %v21026_v42 }
0x35ad   :  { %v13584_v7 = vsub.f32 %v13582_v47, %v13583_v24  ;;  %v13591_v60 = vsub.f32 %v13589_v35, %v13590_v38  ;;  %v21103_v31 = vpack.c.bf16 %v13564_v53, %v13557_v34  ;;  %v21118_v44 = vpack.c.bf16 %v13575_v17, %v13568_v3 }
0x35ae   :  { %13380 = vrot.lane.b32.xlu1 %v13350_v52, %s18922_s22  ;;  %v13571_v48 = vand.u32 4294901760, %v13570_v32  ;;  %v13578_v28 = vand.u32 4294901760, %v13577_v13  ;;  %v18864_v6 = vpop.eup %18863  ;;  %v21120_v52 = vpack.c.bf16 %v13589_v35, %v13582_v47  ;;  %v11712_v34 = vsel %vm211_vm4, %v20717_v26, 0.0 }
0x35af   :  { %13366 = vrot.lane.b32.xlu0 %v13323_v46, %s18921_s21  ;;  %v13585_v46 = vand.u32 4294901760, %v13584_v7  ;;  %v13592_v22 = vand.u32 4294901760, %v13591_v60  ;;  %v11709_v51 = vsel %vm211_vm4, %v20719_v23, 0.0  ;;  %v21130_v15 = vpack.c.bf16 %v13548_v10, %v13541_v63  ;;  %s18933_s21 = smov 15  }
0x35b0   :  { %v21106_v45 = vpack.c.bf16 %v13578_v28, %v13571_v48  ;;  %v21132_v37 = vpack.c.bf16 %v13562_v36, %v13555_v8  ;;  %v21134_v18 = vpack.c.bf16 %v13576_v49, %v13569_v39  ;;  %v21136_v3 = vpack.c.bf16 %v13590_v38, %v13583_v24  ;;  %s14954_s27 = sld [smem:[%s21552_s0 + %s18933_s21]]  }
0x35b1   :  { %v21108_v61 = vpack.c.bf16 %v13592_v22, %v13585_v46  ;;  %v13339_v47 = vsel %vm9273_vm7, %v21022_v12, %v13328_v11  ;;  %v13342_v11 = vsel %vm19873_vm15, 0.0, %v21070_v41 }
0x35b2   :  { %9243 = vrot.lane.b32.xlu1 %v18862_v59, %s18913_s3  ;;  %v13340_v42 = vsel %vm19852_vm14, 0.0, %v13339_v47 }
0x35b3   :  { %13382 = vrot.lane.b32.xlu0 %v13359_v55, %s18922_s22 }
0x35b7   :  { %9245 = vrot.lane.b32.xlu0 %v18864_v6, %s18913_s3  ;;  %s14968_s3 = sld [smem:[%s21552_s0 + %s18939_s17]]  }
0x35d6   :  { %11713 = vadd.xlane.f32.xlu0 %v11712_v34  ;;  %11710 = vadd.xlane.f32.xlu1 %v11709_v51 }
0x3614   :  { %v13363_v17 = vpop.permute.xlu1 %13362 }
0x3615   :  { %v13361_v35 = vpop.permute.xlu0 %13360  ;;  %v13389_v49 = vsel %vm211_vm4, %v21044_v57, %v13363_v17 }
0x3616   :  { %v13388_v33 = vsel %vm211_vm4, %v13340_v42, %v13361_v35 }
0x3618   :  { %v13377_v63 = vpop.permute.xlu1 %13376 }
0x3619   :  { %v13392_v10 = vsel %vm10138_vm0, %v13388_v33, %v13377_v63  ;;  %v13596_v33 = vsub.f32 %v21051_v0, %v21058_v62 }
0x361a   :  { %v13413_v8 = vsel %vm10159_vm9, %v13392_v10, 0 }
0x361b   :  { %v21147_v36 = vand.u32 4294901760, %v13413_v8 }
0x361c   :  { %v13365_v39 = vpop.permute.xlu1 %13364 }
0x361d   :  { %v21152_v24 = vsub.f32 %v13413_v8, %v21147_v36  ;;  %v13379_v12 = vpop.permute.xlu0 %13378  ;;  %v13390_v53 = vsel %vm211_vm4, %v13342_v11, %v13365_v39  ;;  %v13597_v39 = vand.u32 4294901760, %v13596_v33 }
0x361e   :  { %v13393_v9 = vsel %vm10138_vm0, %v13389_v49, %v13379_v12 }
0x361f   :  { %v13416_v38 = vsel %vm10159_vm9, %v13393_v9, 0  ;;  %v13500_v59 = vand.u32 4294901760, %v21152_v24  ;;  %v13598_v0 = vsub.f32 %v13596_v33, %v13597_v39 }
0x3620   :  { %v21161_v32 = vand.u32 4294901760, %v13416_v38  ;;  %v13381_v13 = vpop.permute.xlu1 %13380 }
0x3621   :  { %v13394_v57 = vsel %vm10138_vm0, %v13390_v53, %v13381_v13  ;;  %v13367_v7 = vpop.permute.xlu0 %13366  ;;  %v13501_v60 = vsub.f32 %v21152_v24, %v13500_v59 }
0x3622   :  { %v21168_v55 = vsub.f32 %v13416_v38, %v21161_v32  ;;  %v13419_v29 = vsel %vm10159_vm9, %v13394_v57, 0  ;;  %v13391_v22 = vsel %vm211_vm4, %v21083_v40, %v13367_v7 }
0x3623   :  { %v21171_v41 = vand.u32 4294901760, %v13419_v29  ;;  %v13502_v48 = vand.u32 4294901760, %v13501_v60 }
0x3624   :  { %v13510_v28 = vand.u32 4294901760, %v21168_v55  ;;  %v9244_v53 = vpop.permute.xlu1 %9243 }
0x3625   :  { %v21175_v46 = vsub.f32 %v13419_v29, %v21171_v41  ;;  %v13383_v6 = vpop.permute.xlu0 %13382  ;;  %17117 = vmatprep.mubr.f32.mxu0 %v13502_v48 }
0x3626   :  { %v13511_v34 = vsub.f32 %v21168_v55, %v13510_v28  ;;  %v13395_v51 = vsel %vm10138_vm0, %v13391_v22, %v13383_v6 }
0x3627   :  { %v13422_v17 = vsel %vm10159_vm9, %v13395_v51, 0  ;;  %v13520_v47 = vand.u32 4294901760, %v21175_v46 }
0x3628   :  { %v13512_v35 = vand.u32 4294901760, %v13511_v34  ;;  %v21183_v42 = vand.u32 4294901760, %v13422_v17 }
0x3629   :  { %v13521_v63 = vsub.f32 %v21175_v46, %v13520_v47  ;;  %v9246_v11 = vpop.permute.xlu0 %9245 }
0x362a   :  { %v13529_v40 = vsub.f32 %v13422_v17, %v21183_v42  ;;  %17118 = vmatmul.mubr.f32.vlgmr.msra.gmra.mrb[36].mxu0 %v13512_v35 }
0x362b   :  { %18042 = vmatpush3.bf16.msra.mxu0 %v21094_v2  ;;  %v13522_v10 = vand.u32 4294901760, %v13521_v63  ;;  %v13599_v2 = vand.u32 4294901760, %v13598_v0 }
0x362c   :  { %18044 = vmatprep.subr.bf16.mxu0 %v21103_v31  ;;  %v13530_v8 = vand.u32 4294901760, %v13529_v40 }
0x362d   :  { %17120 = vmatprep.mubr.f32.mxu0 %v13522_v10 }
0x362e   :  { %v13531_v49 = vsub.f32 %v13529_v40, %v13530_v8 }
0x362f   :  { %18046 = vmatpush3.bf16.msra.mxu0 %v21103_v31 }
0x3630   :  { %18048 = vmatprep.subr.bf16.mxu0 %v21106_v45  ;;  %v13532_v12 = vand.u32 4294901760, %v13531_v49 }
0x3632   :  { %17121 = vmatmul.mubr.f32.gmra.mrb[38].mxu0 %v13532_v12 }
0x3633   :  { %18050 = vmatpush3.bf16.msra.mxu0 %v21106_v45  ;;  %17141 = vmatprep.mubr.f32.mxu0 %v21147_v36 }
0x3634   :  { %18052 = vmatprep.subr.bf16.mxu0 %v21108_v61 }
0x3637   :  { %18054 = vmatpush3.bf16.msra.mxu0 %v21108_v61 }
0x3638   :  { %17139 = vmatprep.subr.mxu0 %v13599_v2 }
0x363b   :  { %17140 = vmatpush3.msra.mxu0 %v13599_v2 }
0x363c   :  { %17142 = vmatmul.mubr.f32.vlgmr.msra.gmra.mrb[36].mxu0 %v21161_v32  ;;  %18056 = vmatprep.subr.bf16.mxu0 %v21113_v30 }
0x363d   :  { %17144 = vmatprep.mubr.f32.mxu0 %v21171_v41  ;;  %18058 = vmatpush3.bf16.msra.mxu0 %v21113_v30 }
0x363e   :  { %18060 = vmatprep.subr.bf16.mxu0 %v21116_v43 }
0x3640   :  { %17145 = vmatmul.mubr.f32.gmra.mrb[38].mxu0 %v21183_v42 }
0x3641   :  { %18062 = vmatpush3.bf16.msra.mxu0 %v21116_v43  ;;  %17165 = vmatprep.mubr.f32.mxu0 %v21152_v24 }
0x3642   :  { %18064 = vmatprep.subr.bf16.mxu0 %v21118_v44 }
0x3645   :  { %18066 = vmatpush3.bf16.msra.mxu0 %v21118_v44 }
0x3646   :  { %18068 = vmatprep.subr.bf16.mxu0 %v21120_v52 }
0x3649   :  { %18070 = vmatpush3.bf16.msra.mxu0 %v21120_v52 }
0x364a   :  { %17163 = vmatprep.subr.mxu0 %v13596_v33 }
0x364d   :  { %17164 = vmatpush3.msra.mxu0 %v13596_v33 }
0x364e   :  { %17166 = vmatmul.mubr.f32.vlgmr.msra.gmra.mrb[36].mxu0 %v21168_v55  ;;  %18072 = vmatprep.subr.bf16.mxu0 %v20978_v14 }
0x364f   :  { %17168 = vmatprep.mubr.f32.mxu0 %v21175_v46  ;;  %18074 = vmatpush3.bf16.msra.mxu0 %v20978_v14 }
0x3650   :  { %18076 = vmatprep.subr.bf16.mxu0 %v20994_v16 }
0x3652   :  { %17169 = vmatmul.mubr.f32.gmra.mrb[38].mxu0 %v13529_v40 }
0x3653   :  { %18078 = vmatpush3.bf16.msra.mxu0 %v20994_v16  ;;  %17189 = vmatprep.mubr.f32.mxu0 %v13500_v59 }
0x3654   :  { %18080 = vmatprep.subr.bf16.mxu0 %v21011_v56 }
0x3657   :  { %18082 = vmatpush3.bf16.msra.mxu0 %v21011_v56 }
0x3658   :  { %18084 = vmatprep.subr.bf16.mxu0 %v21032_v27 }
0x365b   :  { %18086 = vmatpush3.bf16.msra.mxu0 %v21032_v27 }
0x365c   :  { %17187 = vmatprep.subr.mxu0 %v21058_v62 }
0x365f   :  { %17188 = vmatpush3.msra.mxu0 %v21058_v62 }
0x3660   :  { %17190 = vmatmul.mubr.f32.vlgmr.msra.gmra.mrb[36].mxu0 %v13510_v28  ;;  %18088 = vmatprep.subr.bf16.mxu0 %v21130_v15 }
0x3661   :  { %17192 = vmatprep.mubr.f32.mxu0 %v13520_v47  ;;  %18090 = vmatpush3.bf16.msra.mxu0 %v21130_v15 }
0x3662   :  { %18092 = vmatprep.subr.bf16.mxu0 %v21132_v37 }
0x3663   :  { %v11711_v57 = vpop.xlane.xlu1 %11710  ;;  %v11714_v7 = vpop.xlane.xlu0 %11713 }
0x3664   :  { %17193 = vmatmul.mubr.f32.gmra.mrb[38].mxu0 %v13530_v8  ;;  %v11721_v60 = vmul.f32 0.041666668, %v11711_v57  ;;  %v11722_v55 = vmul.f32 0.041666668, %v11714_v7  ;;  %v21333_v7 = vld [vmem:[%s14955_s30] ss:$0 sm:$0xff] }
0x3665   :  { %18094 = vmatpush3.bf16.msra.mxu0 %v21132_v37  ;;  %17213 = vmatprep.mubr.f32.mxu0 %v21147_v36 }
0x3666   :  { %18096 = vmatprep.subr.bf16.mxu0 %v21134_v18  ;;  %v21272_v29 = vsub.f32 %v20719_v23, %v11721_v60 }
0x3668   :  { %v11729_v48 = vmul.f32 %v21272_v29, %v21272_v29 }
0x3669   :  { %18098 = vmatpush3.bf16.msra.mxu0 %v21134_v18 }
0x366a   :  { %18100 = vmatprep.subr.bf16.mxu0 %v21136_v3  ;;  %v11733_v46 = vsel %vm211_vm4, %v11729_v48, 0.0 }
0x366d   :  { %18102 = vmatpush3.bf16.msra.mxu0 %v21136_v3 }
0x366e   :  { %17211 = vmatprep.subr.mxu0 %v13597_v39 }
0x3671   :  { %17212 = vmatpush3.msra.mxu0 %v13597_v39 }
0x3672   :  { %17214 = vmatmul.mubr.f32.vlgmr.msra.gmra.mrb[36].mxu0 %v21161_v32  ;;  %18104 = vmatprep.subr.bf16.mxu0 %v20978_v14 }
0x3673   :  { %17216 = vmatprep.mubr.f32.mxu0 %v21171_v41  ;;  %18106 = vmatpush3.bf16.msra.mxu0 %v20978_v14  ;;  %v15001_v14 = vmul.f32 -1.442695, %v21038_v25  ;;  %v11718_v25 = vsel %vm211_vm4, %v20721_v54, 0.0 }
0x3674   :  { %18108 = vmatprep.subr.bf16.mxu0 %v20994_v16 }
0x3675   :  { %18865 = vpow2.f32 %v15001_v14 }
0x3676   :  { %17217 = vmatmul.mubr.f32.gmra.mrb[38].mxu0 %v21183_v42 }
0x3677   :  { %18110 = vmatpush3.bf16.msra.mxu0 %v20994_v16  ;;  %17237 = vmatprep.mubr.f32.mxu0 %v21147_v36  ;;  %v15013_v16 = vld [vmem:[%s14963_s20] ss:$0 sm:$0xff] }
0x3678   :  { %18112 = vmatprep.subr.bf16.mxu0 %v21011_v56 }
0x367b   :  { %18114 = vmatpush3.bf16.msra.mxu0 %v21011_v56 }
0x367c   :  { %18116 = vmatprep.subr.bf16.mxu0 %v21032_v27 }
0x367f   :  { %18118 = vmatpush3.bf16.msra.mxu0 %v21032_v27  ;;  %v15000_v27 = vmul.f32 -1.442695, %v21016_v20  ;;  %v11715_v20 = vsel %vm211_vm4, %v20723_v50, 0.0  ;;  %v18866_v37 = vpop.eup %18865 }
0x3680   :  { %17235 = vmatprep.subr.mxu0 %v21058_v62  ;;  %v9226_v3 = vadd.f32 1.0, %v18866_v37 }
0x3681   :  { %18867 = vpow2.f32 %v15000_v27 }
0x3682   :  { %18869 = vrcp.f32 %v9226_v3 }
0x3683   :  { %17236 = vmatpush3.msra.mxu0 %v21058_v62 }
0x3684   :  { %17238 = vmatmul.mubr.f32.vlgmr.msra.gmra.mrb[36].mxu0 %v21161_v32 }
0x3685   :  { %17240 = vmatprep.mubr.f32.mxu0 %v21171_v41  ;;  %v21275_v41 = vsub.f32 %v20717_v26, %v11722_v55 }
0x3687   :  { %v11730_v28 = vmul.f32 %v21275_v41, %v21275_v41 }
0x3688   :  { %17241 = vmatmul.mubr.f32.gmra.mrb[38].mxu0 %v21183_v42 }
0x3689   :  { %v11736_v22 = vsel %vm211_vm4, %v11730_v28, 0.0 }
0x368b   :  { %v18868_v24 = vpop.eup %18867 }
0x368c   :  { %v9225_v9 = vadd.f32 1.0, %v18868_v24  ;;  %v21263_v38 = vpop.eup %18869 }
0x368d   :  { %v9250_v59 = vmul.f32 %v21263_v38, %v9246_v11 }
0x368e   :  { %18871 = vrcp.f32 %v9225_v9 }
0x3698   :  { %v21267_v32 = vpop.eup %18871 }
0x3699   :  { %v9249_v13 = vmul.f32 %v21267_v32, %v9244_v53  ;;  %v21330_v53 = vld [vmem:[%s14954_s27] ss:$0 sm:$0xff] }
0x3757   :  { %v17239_v56 = vpop.f32.mrb[36].mxu0 }
0x3758   :  { %v18248_v31 = vadd.f32 %v17239_v56, %v15013_v16  ;;  %v14081_v62 = vpop.f32.mrb[37].mxu0 }
0x3759   :  { %v18249_v45 = vadd.f32 %v15013_v16, %v14081_v62  ;;  %v9236_v62 = vrot.slane %v19841_v5, 7 }
0x375a   :  { %v14106_v61 = vsel %vm211_vm4, %v18248_v31, 0.0 }
0x375b   :  { %14107 = vadd.xlane.f32.xlu1 %v14106_v61  ;;  %v17242_v30 = vpop.f32.mrb[38].mxu0  ;;  %v14103_v43 = vsel %vm211_vm4, %v18249_v45, 0.0 }
0x375c   :  { %v14093_v44 = vpop.f32.mrb[39].mxu0  ;;  %14104 = vadd.xlane.f32.xlu0 %v14103_v43  ;;  %v18250_v52 = vadd.f32 %v17242_v30, %v15013_v16  ;;  %v9240_v30 = vmul.f32 %v21263_v38, %v9236_v62 }
0x375d   :  { %v18251_v15 = vadd.f32 %v15013_v16, %v14093_v44 }
0x375e   :  { %v14112_v18 = vsel %vm211_vm4, %v18250_v52, 0.0 }
0x375f   :  { %11719 = vadd.xlane.f32.xlu1 %v11718_v25  ;;  %v14109_v36 = vsel %vm211_vm4, %v18251_v15, 0.0 }
0x3760   :  { %11716 = vadd.xlane.f32.xlu0 %v11715_v20 }
0x3763   :  { %14113 = vadd.xlane.f32.xlu1 %v14112_v18 }
0x3764   :  { %14110 = vadd.xlane.f32.xlu0 %v14109_v36 }
0x3774   :  { %9255 = vrot.lane.b32.xlu1 %v9250_v59, %s18914_s4 }
0x377a   :  { %9253 = vrot.lane.b32.xlu0 %v9249_v13, %s18914_s4 }
0x3798   :  { %11734 = vadd.xlane.f32.xlu1 %v11733_v46 }
0x3799   :  { %11737 = vadd.xlane.f32.xlu0 %v11736_v22 }
0x37e8   :  { %v14108_v6 = vpop.xlane.xlu1 %14107 }
0x37e9   :  { %v14116_v34 = vmul.f32 0.041666668, %v14108_v6  ;;  %v14105_v51 = vpop.xlane.xlu0 %14104 }
0x37ea   :  { %v14115_v17 = vmul.f32 0.041666668, %v14105_v51 }
0x37eb   :  { %v21283_v23 = vsub.f32 %v18248_v31, %v14116_v34 }
0x37ec   :  { %v11720_v26 = vpop.xlane.xlu1 %11719  ;;  %v21291_v10 = vsub.f32 %v18249_v45, %v14115_v17 }
0x37ed   :  { %v11724_v47 = vmul.f32 0.041666668, %v11720_v26  ;;  %v11717_v35 = vpop.xlane.xlu0 %11716  ;;  %v14124_v42 = vmul.f32 %v21283_v23, %v21283_v23 }
0x37ee   :  { %v11723_v33 = vmul.f32 0.041666668, %v11717_v35  ;;  %v14123_v27 = vmul.f32 %v21291_v10, %v21291_v10 }
0x37ef   :  { %v21288_v63 = vsub.f32 %v20721_v54, %v11724_v47  ;;  %v14130_v40 = vsel %vm211_vm4, %v14124_v42, 0.0 }
0x37f0   :  { %v21294_v8 = vsub.f32 %v20723_v50, %v11723_v33  ;;  %14131 = vadd.xlane.f32.xlu1 %v14130_v40  ;;  %v14114_v39 = vpop.xlane.xlu1 %14113  ;;  %v14127_v43 = vsel %vm211_vm4, %v14123_v27, 0.0 }
0x37f1   :  { %v14118_v49 = vmul.f32 0.041666668, %v14114_v39  ;;  %v14111_v12 = vpop.xlane.xlu0 %14110  ;;  %v11732_v0 = vmul.f32 %v21288_v63, %v21288_v63 }
0x37f2   :  { %v14117_v2 = vmul.f32 0.041666668, %v14111_v12  ;;  %v11731_v14 = vmul.f32 %v21294_v8, %v21294_v8 }
0x37f3   :  { %v21300_v54 = vsub.f32 %v18250_v52, %v14118_v49  ;;  %v11742_v16 = vsel %vm211_vm4, %v11732_v0, 0.0 }
0x37f4   :  { %v21303_v56 = vsub.f32 %v18251_v15, %v14117_v2  ;;  %11743 = vadd.xlane.f32.xlu1 %v11742_v16  ;;  %v11739_v50 = vsel %vm211_vm4, %v11731_v14, 0.0  ;;  %v9256_v45 = vpop.permute.xlu1 %9255  ;;  %v9235_v15 = vrot.slane %v19839_v4, 7 }
0x37f5   :  { %11740 = vadd.xlane.f32.xlu0 %v11739_v50  ;;  %v14126_v31 = vmul.f32 %v21300_v54, %v21300_v54  ;;  %v9260_v52 = vadd.f32 %v9256_v45, %v9240_v30  ;;  %v9254_v5 = vpop.permute.xlu0 %9253  ;;  %v21355_v45 = vld [vmem:[%s14964_s12] ss:$0 sm:$0xff] }
0x37f6   :  { %v14125_v44 = vmul.f32 %v21303_v56, %v21303_v56  ;;  %v9239_v20 = vmul.f32 %v21267_v32, %v9235_v15  ;;  %v21362_v15 = vld [vmem:[%s14965_s6] ss:$0 sm:$0xff] }
0x37f7   :  { %v14136_v61 = vsel %vm211_vm4, %v14126_v31, 0.0  ;;  %18873 = vtanh.f32 %v9260_v52 }
0x37f8   :  { %14137 = vadd.xlane.f32.xlu1 %v14136_v61  ;;  %v14133_v25 = vsel %vm211_vm4, %v14125_v44, 0.0  ;;  %v9259_v37 = vadd.f32 %v9254_v5, %v9239_v20  ;;  %vm14253_vm4 = vcmask 523264  }
0x37f9   :  { %14128 = vadd.xlane.f32.xlu0 %v14127_v43 }
0x37fa   :  { %18875 = vtanh.f32 %v9259_v37 }
0x37fd   :  { %14134 = vadd.xlane.f32.xlu0 %v14133_v25 }
0x3801   :  { %v18874_v18 = vpop.eup %18873 }
0x3804   :  { %v18876_v3 = vpop.eup %18875 }
0x3809   :  { %9267 = vrot.lane.b32.xlu1 %v18874_v18, %s18915_s5 }
0x380d   :  { %14185 = vrot.lane.b32.xlu1 %v19497_v19, %s18916_s7 }
0x3813   :  { %9265 = vrot.lane.b32.xlu0 %v18876_v3, %s18915_s5  ;;  %s18934_s5 = smov 27  }
0x3814   :  { %s21345_s9 = sld [smem:[%s21552_s0 + %s18934_s5]]  }
0x381a   :  { %v14238_v2 = vld [vmem:[%s21345_s9] sm:$0xff]  ;;  %v14239_v14 = vld [vmem:[%s21345_s9 + $0x8] sm:$0xff]  ;;  %v14240_v44 = vld [vmem:[%s21345_s9 + $0x10] sm:$0xff] }
0x381b   :  { %v14267_v50 = vand.u32 4294901760, %v14238_v2  ;;  %v14270_v27 = vand.u32 4294901760, %v14239_v14  ;;  %v14241_v52 = vld [vmem:[%s21345_s9 + $0x18] sm:$0xff]  ;;  %v14273_v5 = vand.u32 4294901760, %v14240_v44 }
0x381c   :  { %v14276_v20 = vand.u32 4294901760, %v14241_v52 }
0x381d   :  { %v21357_v61 = vpack.c.bf16 %v14270_v27, %v14267_v50 }
0x381f   :  { %18120 = vmatprep.subr.bf16.mxu1 %v21357_v61 }
0x3820   :  { %18122 = vmatpush3.bf16.msra.mxu1 %v21357_v61 }
0x3825   :  { %v11735_v36 = vpop.xlane.xlu1 %11734 }
0x3826   :  { %v11745_v24 = vmul.f32 0.041666668, %v11735_v36  ;;  %v11738_v9 = vpop.xlane.xlu0 %11737 }
0x3827   :  { %v11746_v11 = vmul.f32 0.041666668, %v11738_v9 }
0x3828   :  { %v11749_v59 = vadd.f32 1e-05, %v11745_v24 }
0x3829   :  { %v11750_v4 = vadd.f32 1e-05, %v11746_v11 }
0x382a   :  { %18877 = vrsqrt.f32 %v11749_v59  ;;  %v14242_v59 = vld [vmem:[%s21345_s9 + $0x20] sm:$0xff] }
0x382b   :  { %18879 = vrsqrt.f32 %v11750_v4  ;;  %v14243_v4 = vld [vmem:[%s21345_s9 + $0x28] sm:$0xff] }
0x3834   :  { %v18878_v19 = vpop.eup %18877 }
0x3835   :  { %v18880_v13 = vpop.eup %18879  ;;  %v11757_v57 = vmul.f32 %v18878_v19, %v21272_v29  ;;  %v14279_v19 = vand.u32 4294901760, %v14242_v59 }
0x3836   :  { %v11758_v60 = vmul.f32 %v18880_v13, %v21275_v41  ;;  %v14282_v13 = vand.u32 4294901760, %v14243_v4 }
0x3837   :  { %v11768_v55 = vmul.f32 %v21330_v53, %v11757_v57 }
0x3838   :  { %v11769_v48 = vmul.f32 %v21330_v53, %v11758_v60 }
0x3839   :  { %v11779_v28 = vadd.f32 %v21333_v7, %v11768_v55  ;;  %v21382_v55 = vpack.c.bf16 %v14282_v13, %v14279_v19 }
0x383a   :  { %v11780_v22 = vadd.f32 %v21333_v7, %v11769_v48  ;;  %v21384_v48 = vsub.f32 %v14238_v2, %v14267_v50 }
0x383b   :  { %v11783_v46 = vmax.f32 %v11779_v28, 0.0  ;;  %v21386_v28 = vsub.f32 %v14239_v14, %v14270_v27 }
0x383c   :  { %v11784_v6 = vmax.f32 %v11780_v22, 0.0 }
0x383d   :  { %14201 = vrot.lane.b32.xlu0 %v11783_v46, %s18914_s4 }
0x3841   :  { %14203 = vrot.lane.b32.xlu0 %v11784_v6, %s18914_s4  ;;  %v14244_v6 = vld [vmem:[%s21345_s9 + $0x30] sm:$0xff] }
0x387d   :  { %v14132_v34 = vpop.xlane.xlu1 %14131 }
0x387e   :  { %v14140_v29 = vmul.f32 0.041666668, %v14132_v34  ;;  %v14245_v34 = vld [vmem:[%s21345_s9 + $0x38] sm:$0xff] }
0x3880   :  { %v14144_v51 = vadd.f32 1e-05, %v14140_v29 }
0x3881   :  { %v11744_v17 = vpop.xlane.xlu1 %11743 }
0x3882   :  { %18881 = vrsqrt.f32 %v14144_v51  ;;  %v11748_v41 = vmul.f32 0.041666668, %v11744_v17  ;;  %v11741_v26 = vpop.xlane.xlu0 %11740  ;;  %v14285_v51 = vand.u32 4294901760, %v14244_v6  ;;  %v14288_v17 = vand.u32 4294901760, %v14245_v34 }
0x3883   :  { %v11747_v47 = vmul.f32 0.041666668, %v11741_v26  ;;  %v14382_v26 = vand.u32 4294901760, %v21384_v48 }
0x3884   :  { %v11752_v35 = vadd.f32 1e-05, %v11748_v41 }
0x3885   :  { %v11751_v42 = vadd.f32 1e-05, %v11747_v47  ;;  %v14138_v33 = vpop.xlane.xlu1 %14137  ;;  %v14389_v47 = vand.u32 4294901760, %v21386_v28 }
0x3886   :  { %18883 = vrsqrt.f32 %v11752_v35  ;;  %v14142_v40 = vmul.f32 0.041666668, %v14138_v33  ;;  %v14129_v39 = vpop.xlane.xlu0 %14128 }
0x3887   :  { %18885 = vrsqrt.f32 %v11751_v42  ;;  %v14139_v49 = vmul.f32 0.041666668, %v14129_v39  ;;  %v21401_v42 = vpack.c.bf16 %v14288_v17, %v14285_v51  ;;  %v14402_v39 = vsub.f32 %v14241_v52, %v14276_v20 }
0x3888   :  { %v14146_v12 = vadd.f32 1e-05, %v14142_v40  ;;  %v14390_v40 = vsub.f32 %v21386_v28, %v14389_v47  ;;  %v14416_v52 = vsub.f32 %v14243_v4, %v14282_v13 }
0x3889   :  { %v14143_v0 = vadd.f32 1e-05, %v14139_v49  ;;  %v14403_v50 = vand.u32 4294901760, %v14402_v39 }
0x388a   :  { %18887 = vrsqrt.f32 %v14146_v12  ;;  %v14135_v16 = vpop.xlane.xlu0 %14134 }
0x388b   :  { %18889 = vrsqrt.f32 %v14143_v0  ;;  %v14141_v31 = vmul.f32 0.041666668, %v14135_v16  ;;  %v14391_v16 = vand.u32 4294901760, %v14390_v40 }
0x388c   :  { %v18882_v62 = vpop.eup %18881 }
0x388d   :  { %v14145_v30 = vadd.f32 1e-05, %v14141_v31  ;;  %v14152_v43 = vmul.f32 %v18882_v62, %v21283_v23  ;;  %v21368_v23 = vpack.c.bf16 %v14276_v20, %v14273_v5 }
0x388e   :  { %v9266_v25 = vpop.permute.xlu0 %9265 }
0x388f   :  { %18891 = vrsqrt.f32 %v14145_v30  ;;  %v9271_v37 = vmul.f32 %v21267_v32, %v9266_v25  ;;  %v14163_v18 = vmul.f32 %v21355_v45, %v14152_v43  ;;  %18124 = vmatprep.subr.bf16.mxu1 %v21368_v23  ;;  %v14409_v30 = vsub.f32 %v14242_v59, %v14279_v19  ;;  %v9268_v25 = vpop.permute.xlu1 %9267 }
0x3890   :  { %v18884_v3 = vpop.eup %18883  ;;  %18126 = vmatpush3.bf16.msra.mxu1 %v21368_v23 }
0x3891   :  { %v18886_v36 = vpop.eup %18885  ;;  %v9306_v24 = vsel %vm9291_vm13, %v19894_v58, %v9271_v37  ;;  %v14174_v9 = vadd.f32 %v21362_v15, %v14163_v18  ;;  %v11760_v11 = vmul.f32 %v18884_v3, %v21288_v63  ;;  %18128 = vmatprep.subr.bf16.mxu1 %v21382_v55  ;;  %v14410_v20 = vand.u32 4294901760, %v14409_v30 }
0x3892   :  { %14187 = vrot.lane.b32.xlu1 %v9306_v24, %s18916_s7  ;;  %v11759_v32 = vmul.f32 %v18886_v36, %v21294_v8  ;;  %v14417_v3 = vand.u32 4294901760, %v14416_v52  ;;  %v14423_v24 = vsub.f32 %v14244_v6, %v14285_v51  ;;  %v21438_v6 = vpack.c.bf16 %v21386_v28, %v21384_v48 }
0x3893   :  { %v14178_v57 = vmax.f32 %v14174_v9, 0.0  ;;  %v11771_v60 = vmul.f32 %v21330_v53, %v11760_v11  ;;  %v14411_v36 = vsub.f32 %v14409_v30, %v14410_v20  ;;  %v14430_v9 = vsub.f32 %v14245_v34, %v14288_v17 }
0x3894   :  { %v18888_v58 = vpop.eup %18887  ;;  %v11770_v63 = vmul.f32 %v21330_v53, %v11759_v32  ;;  %18130 = vmatpush3.bf16.msra.mxu1 %v21382_v55  ;;  %v9272_v11 = vmul.f32 %v21263_v38, %v9268_v25  ;;  %v14418_v4 = vsub.f32 %v14416_v52, %v14417_v3  ;;  %v14424_v19 = vand.u32 4294901760, %v14423_v24 }
0x3895   :  { %v18890_v8 = vpop.eup %18889  ;;  %14219 = vrot.lane.b32.xlu0 %v14178_v57, %s18937_s23  ;;  %v11782_v46 = vadd.f32 %v21333_v7, %v11771_v60  ;;  %v14154_v22 = vmul.f32 %v18888_v58, %v21300_v54  ;;  %18132 = vmatprep.subr.bf16.mxu1 %v21401_v42  ;;  %v14412_v32 = vand.u32 4294901760, %v14411_v36  ;;  %v14431_v13 = vand.u32 4294901760, %v14430_v9 }
0x3896   :  { %v11781_v29 = vadd.f32 %v21333_v7, %v11770_v63  ;;  %v14151_v53 = vmul.f32 %v18890_v8, %v21291_v10  ;;  %v14395_v7 = vsub.f32 %v14240_v44, %v14273_v5  ;;  %v14383_v10 = vsub.f32 %v21384_v48, %v14382_v26 }
0x3897   :  { %v14165_v41 = vmul.f32 %v21355_v45, %v14154_v22  ;;  %v11786_v12 = vmax.f32 %v11782_v46, 0.0  ;;  %v14404_v44 = vsub.f32 %v14402_v39, %v14403_v50  ;;  %v14419_v57 = vand.u32 4294901760, %v14418_v4 }
0x3898   :  { %v11785_v35 = vmax.f32 %v11781_v29, 0.0  ;;  %v14162_v54 = vmul.f32 %v21355_v45, %v14151_v53  ;;  %v14396_v0 = vand.u32 4294901760, %v14395_v7  ;;  %18134 = vmatpush3.bf16.msra.mxu1 %v21401_v42  ;;  %v14384_v14 = vand.u32 4294901760, %v14383_v10 }
0x3899   :  { %v18892_v33 = vpop.eup %18891  ;;  %v14176_v2 = vadd.f32 %v21362_v15, %v14165_v41  ;;  %v14405_v18 = vand.u32 4294901760, %v14404_v44  ;;  %v14432_v58 = vsub.f32 %v14430_v9, %v14431_v13  ;;  %v9307_v63 = vsel %vm9291_vm13, %v19898_v1, %v9272_v11 }
0x389a   :  { %14205 = vrot.lane.b32.xlu0 %v11785_v35, %s18914_s4  ;;  %v14173_v49 = vadd.f32 %v21362_v15, %v14162_v54  ;;  %v14153_v31 = vmul.f32 %v18892_v33, %v21303_v56  ;;  %v14397_v62 = vsub.f32 %v14395_v7, %v14396_v0  ;;  %v21415_v43 = vpack.c.bf16 %v14391_v16, %v14384_v14  ;;  %v14186_v35 = vpop.permute.xlu1 %14185 }
0x389b   :  { %v14180_v37 = vmax.f32 %v14176_v2, 0.0  ;;  %v21430_v38 = vpack.c.bf16 %v14419_v57, %v14412_v32  ;;  %v14433_v46 = vand.u32 4294901760, %v14432_v58  ;;  %v21442_v34 = vpack.c.bf16 %v14416_v52, %v14409_v30 }
0x389c   :  { %v14177_v27 = vmax.f32 %v14173_v49, 0.0  ;;  %v14398_v5 = vand.u32 4294901760, %v14397_v62  ;;  %18136 = vmatprep.subr.bf16.mxu1 %v21415_v43  ;;  %v14164_v56 = vmul.f32 %v21355_v45, %v14153_v31  ;;  %v14425_v45 = vsub.f32 %v14423_v24, %v14424_v19 }
0x389d   :  { %v21444_v1 = vpack.c.bf16 %v14430_v9, %v14423_v24  ;;  %v21450_v29 = vpack.c.bf16 %v14389_v47, %v14382_v26  ;;  %v21452_v53 = vpack.c.bf16 %v14403_v50, %v14396_v0  ;;  %v21454_v51 = vpack.c.bf16 %v14417_v3, %v14410_v20 }
0x389e   :  { %14217 = vrot.lane.b32.xlu1 %v14177_v27, %s18937_s23  ;;  %14207 = vrot.lane.b32.xlu0 %v11786_v12, %s18914_s4  ;;  %v21422_v59 = vpack.c.bf16 %v14405_v18, %v14398_v5  ;;  %v14175_v60 = vadd.f32 %v21362_v15, %v14164_v56  ;;  %v14426_v8 = vand.u32 4294901760, %v14425_v45  ;;  %v21440_v15 = vpack.c.bf16 %v14402_v39, %v14395_v7  ;;  %s18938_s4 = smov 28  }
0x389f   :  { %v21456_v17 = vpack.c.bf16 %v14431_v13, %v14424_v19  ;;  %s14967_s13 = sld [smem:[%s21552_s0 + %s18938_s4]]  }
0x38a0   :  { %v21433_v22 = vpack.c.bf16 %v14433_v46, %v14426_v8 }
0x38a2   :  { %14189 = vrot.lane.b32.xlu1 %v19501_v21, %s18916_s7  ;;  %14223 = vrot.lane.b32.xlu0 %v14180_v37, %s18937_s23  ;;  %v14179_v21 = vmax.f32 %v14175_v60, 0.0 }
0x38a6   :  { %14191 = vrot.lane.b32.xlu1 %v9307_v63, %s18916_s7 }
0x38aa   :  { %14221 = vrot.lane.b32.xlu1 %v14179_v21, %s18937_s23 }
0x38af   :  { %v14202_v41 = vpop.permute.xlu0 %14201 }
0x38b0   :  { %v14229_v40 = vsel %vm827_vm6, %v14186_v35, %v14202_v41 }
0x38b3   :  { %v14204_v54 = vpop.permute.xlu0 %14203 }
0x3904   :  { %v14188_v7 = vpop.permute.xlu1 %14187 }
0x3905   :  { %v14230_v33 = vsel %vm827_vm6, %v14188_v7, %v14204_v54 }
0x3907   :  { %v14220_v10 = vpop.permute.xlu0 %14219 }
0x3908   :  { %v14235_v48 = vsel %vm14233_vm3, %v14230_v33, %v14220_v10 }
0x3909   :  { %v14258_v28 = vsel %vm14253_vm4, %v14235_v48, 0 }
0x390a   :  { %v21461_v26 = vand.u32 4294901760, %v14258_v28 }
0x390c   :  { %v14206_v47 = vpop.permute.xlu0 %14205  ;;  %v21465_v39 = vsub.f32 %v14258_v28, %v21461_v26 }
0x390e   :  { %v14351_v16 = vand.u32 4294901760, %v21465_v39 }
0x3910   :  { %v14218_v49 = vpop.permute.xlu1 %14217  ;;  %v14208_v2 = vpop.permute.xlu0 %14207  ;;  %v14352_v62 = vsub.f32 %v21465_v39, %v14351_v16 }
0x3911   :  { %v14234_v12 = vsel %vm14233_vm3, %v14229_v40, %v14218_v49 }
0x3912   :  { %v14255_v0 = vsel %vm14253_vm4, %v14234_v12, 0  ;;  %v14353_v18 = vand.u32 4294901760, %v14352_v62 }
0x3913   :  { %v21469_v14 = vand.u32 4294901760, %v14255_v0 }
0x3914   :  { %v14190_v50 = vpop.permute.xlu1 %14189  ;;  %v14224_v44 = vpop.permute.xlu0 %14223 }
0x3915   :  { %v14340_v27 = vsub.f32 %v14255_v0, %v21469_v14  ;;  %v14231_v3 = vsel %vm827_vm6, %v14190_v50, %v14206_v47 }
0x3917   :  { %v14341_v31 = vand.u32 4294901760, %v14340_v27 }
0x3918   :  { %v14192_v30 = vpop.permute.xlu1 %14191 }
0x3919   :  { %v14232_v52 = vsel %vm827_vm6, %v14192_v30, %v14208_v2  ;;  %v14342_v25 = vsub.f32 %v14340_v27, %v14341_v31 }
0x391a   :  { %v14237_v5 = vsel %vm14233_vm3, %v14232_v52, %v14224_v44 }
0x391b   :  { %v14264_v20 = vsel %vm14253_vm4, %v14237_v5, 0  ;;  %v14343_v37 = vand.u32 4294901760, %v14342_v25 }
0x391c   :  { %v21480_v56 = vand.u32 4294901760, %v14264_v20  ;;  %v14222_v36 = vpop.permute.xlu1 %14221 }
0x391d   :  { %v14236_v24 = vsel %vm14233_vm3, %v14231_v3, %v14222_v36  ;;  %17259 = vmatprep.mubr.f32.mxu1 %v14343_v37 }
0x391e   :  { %v14370_v9 = vsub.f32 %v14264_v20, %v21480_v56  ;;  %v14261_v11 = vsel %vm14253_vm4, %v14236_v24, 0  ;;  %17260 = vmatmul.mubr.f32.vlgmr.msra.gmra.mrb[30].mxu1 %v14353_v18 }
0x391f   :  { %v21485_v4 = vand.u32 4294901760, %v14261_v11  ;;  %18138 = vmatpush3.bf16.msra.mxu1 %v21415_v43 }
0x3920   :  { %18140 = vmatprep.subr.bf16.mxu1 %v21422_v59  ;;  %v14371_v32 = vand.u32 4294901760, %v14370_v9 }
0x3921   :  { %v14360_v19 = vsub.f32 %v14261_v11, %v21485_v4 }
0x3922   :  { %v14372_v57 = vsub.f32 %v14370_v9, %v14371_v32 }
0x3923   :  { %18142 = vmatpush3.bf16.msra.mxu1 %v21422_v59  ;;  %v14361_v13 = vand.u32 4294901760, %v14360_v19 }
0x3924   :  { %18144 = vmatprep.subr.bf16.mxu1 %v21430_v38  ;;  %v14373_v58 = vand.u32 4294901760, %v14372_v57 }
0x3925   :  { %v14362_v60 = vsub.f32 %v14360_v19, %v14361_v13 }
0x3927   :  { %18146 = vmatpush3.bf16.msra.mxu1 %v21430_v38  ;;  %v14363_v45 = vand.u32 4294901760, %v14362_v60 }
0x3928   :  { %18148 = vmatprep.subr.bf16.mxu1 %v21433_v22 }
0x3929   :  { %17262 = vmatprep.mubr.f32.mxu1 %v14363_v45 }
0x392a   :  { %17263 = vmatmul.mubr.f32.gmra.mrb[32].mxu1 %v14373_v58 }
0x392b   :  { %18150 = vmatpush3.bf16.msra.mxu1 %v21433_v22  ;;  %17281 = vmatprep.mubr.f32.mxu1 %v21469_v14 }
0x392c   :  { %18152 = vmatprep.subr.bf16.mxu1 %v21438_v6 }
0x392e   :  { %17282 = vmatmul.mubr.f32.vlgmr.msra.gmra.mrb[30].mxu1 %v21461_v26 }
0x392f   :  { %18154 = vmatpush3.bf16.msra.mxu1 %v21438_v6  ;;  %17284 = vmatprep.mubr.f32.mxu1 %v21485_v4 }
0x3930   :  { %18156 = vmatprep.subr.bf16.mxu1 %v21440_v15 }
0x3932   :  { %17285 = vmatmul.mubr.f32.gmra.mrb[32].mxu1 %v21480_v56 }
0x3933   :  { %18158 = vmatpush3.bf16.msra.mxu1 %v21440_v15  ;;  %17303 = vmatprep.mubr.f32.mxu1 %v14340_v27 }
0x3934   :  { %18160 = vmatprep.subr.bf16.mxu1 %v21442_v34 }
0x3937   :  { %18162 = vmatpush3.bf16.msra.mxu1 %v21442_v34 }
0x3938   :  { %18164 = vmatprep.subr.bf16.mxu1 %v21444_v1 }
0x393b   :  { %18166 = vmatpush3.bf16.msra.mxu1 %v21444_v1 }
0x393c   :  { %18168 = vmatprep.subr.bf16.mxu1 %v21357_v61 }
0x393e   :  { %17304 = vmatmul.mubr.f32.vlgmr.msra.gmra.mrb[30].mxu1 %v21465_v39 }
0x393f   :  { %17306 = vmatprep.mubr.f32.mxu1 %v14360_v19  ;;  %18170 = vmatpush3.bf16.msra.mxu1 %v21357_v61 }
0x3940   :  { %18172 = vmatprep.subr.bf16.mxu1 %v21368_v23 }
0x3942   :  { %17307 = vmatmul.mubr.f32.gmra.mrb[32].mxu1 %v14370_v9 }
0x3943   :  { %18174 = vmatpush3.bf16.msra.mxu1 %v21368_v23  ;;  %17325 = vmatprep.mubr.f32.mxu1 %v14341_v31 }
0x3944   :  { %18176 = vmatprep.subr.bf16.mxu1 %v21382_v55 }
0x3947   :  { %18178 = vmatpush3.bf16.msra.mxu1 %v21382_v55 }
0x3948   :  { %18180 = vmatprep.subr.bf16.mxu1 %v21401_v42 }
0x394b   :  { %18182 = vmatpush3.bf16.msra.mxu1 %v21401_v42 }
0x394c   :  { %18184 = vmatprep.subr.bf16.mxu1 %v21450_v29 }
0x394e   :  { %17326 = vmatmul.mubr.f32.vlgmr.msra.gmra.mrb[30].mxu1 %v14351_v16 }
0x394f   :  { %17328 = vmatprep.mubr.f32.mxu1 %v14361_v13  ;;  %18186 = vmatpush3.bf16.msra.mxu1 %v21450_v29 }
0x3950   :  { %18188 = vmatprep.subr.bf16.mxu1 %v21452_v53 }
0x3952   :  { %17329 = vmatmul.mubr.f32.gmra.mrb[32].mxu1 %v14371_v32 }
0x3953   :  { %18190 = vmatpush3.bf16.msra.mxu1 %v21452_v53  ;;  %17347 = vmatprep.mubr.f32.mxu1 %v21469_v14 }
0x3954   :  { %18192 = vmatprep.subr.bf16.mxu1 %v21454_v51 }
0x3957   :  { %18194 = vmatpush3.bf16.msra.mxu1 %v21454_v51 }
0x3958   :  { %18196 = vmatprep.subr.bf16.mxu1 %v21456_v17 }
0x395b   :  { %18198 = vmatpush3.bf16.msra.mxu1 %v21456_v17 }
0x395c   :  { %18200 = vmatprep.subr.bf16.mxu1 %v21357_v61 }
0x395e   :  { %17348 = vmatmul.mubr.f32.vlgmr.msra.gmra.mrb[30].mxu1 %v21461_v26 }
0x395f   :  { %17350 = vmatprep.mubr.f32.mxu1 %v21485_v4  ;;  %18202 = vmatpush3.bf16.msra.mxu1 %v21357_v61  ;;  %v15016_v61 = vld [vmem:[%s14967_s13] ss:$0 sm:$0xff] }
0x3960   :  { %18204 = vmatprep.subr.bf16.mxu1 %v21368_v23 }
0x3962   :  { %17351 = vmatmul.mubr.f32.gmra.mrb[32].mxu1 %v21480_v56 }
0x3963   :  { %18206 = vmatpush3.bf16.msra.mxu1 %v21368_v23  ;;  %17369 = vmatprep.mubr.f32.mxu1 %v21469_v14 }
0x3964   :  { %18208 = vmatprep.subr.bf16.mxu1 %v21382_v55 }
0x3967   :  { %18210 = vmatpush3.bf16.msra.mxu1 %v21382_v55 }
0x3968   :  { %18212 = vmatprep.subr.bf16.mxu1 %v21401_v42 }
0x396b   :  { %18214 = vmatpush3.bf16.msra.mxu1 %v21401_v42 }
0x396e   :  { %17370 = vmatmul.mubr.f32.vlgmr.msra.gmra.mrb[30].mxu1 %v21461_v26 }
0x396f   :  { %17372 = vmatprep.mubr.f32.mxu1 %v21485_v4 }
0x3972   :  { %17373 = vmatmul.mubr.f32.gmra.mrb[32].mxu1 %v21480_v56 }
0x3a41   :  { %v17371_v23 = vpop.f32.mrb[30].mxu1 }
0x3a42   :  { %v18252_v55 = vadd.f32 %v17371_v23, %v15016_v61  ;;  %v14910_v42 = vpop.f32.mrb[31].mxu1 }
0x3a43   :  { %v18253_v43 = vadd.f32 %v15016_v61, %v14910_v42 }
0x3a44   :  { %14933 = vst.msk [vmem:[%s14968_s3 + $0x8] sm:$0xff] %vm186_vm1, %v18252_v55 }
0x3a45   :  { %14932 = vst.msk [vmem:[%s14968_s3] sm:$0xff] %vm186_vm1, %v18253_v43  ;;  %v17374_v59 = vpop.f32.mrb[32].mxu1 }
0x3a46   :  { %v18254_v63 = vadd.f32 %v17374_v59, %v15016_v61  ;;  %v14922_v38 = vpop.f32.mrb[33].mxu1 }
0x3a47   :  { %v18255_v8 = vadd.f32 %v15016_v61, %v14922_v38 }
0x3a48   :  { %14935 = vst.msk [vmem:[%s14968_s3 + $0x18] sm:$0xff] %vm186_vm1, %v18254_v63 }
0x3a49   :  { %14934 = vst.msk [vmem:[%s14968_s3 + $0x10] sm:$0xff] %vm186_vm1, %v18255_v8 }

</bundles_post_ra>
